<compile_context>
chip_gen: v7x
topology: tpu7x:2x2x1
jax: 0.10.0
libtpu: 0.0.40
codegen_flags: <defaults>
</compile_context>

<pallas_src>
import jax
import jax.numpy as jnp
from jax.experimental import pallas as pl
from jax.experimental.pallas import tpu as pltpu

LANE = 128
BN_EPS = 1e-5


def _pick_tile(dim, candidates):
    for c in candidates:
        if dim % c == 0:
            return c
    return dim


def _pad_last(a, multiple=LANE):
    pad = (-a.shape[-1]) % multiple
    if pad:
        a = jnp.pad(a, [(0, 0)] * (a.ndim - 1) + [(0, pad)])
    return a


# --------------------------------------------------------------------------
# Pallas kernels
# --------------------------------------------------------------------------
def _gemm_stats_kernel(x_ref, w_ref, o_ref, stats_ref):
    """y = x @ w (bf16 in, f32 acc) with fused per-column sum / sum-of-squares."""
    acc = jnp.dot(x_ref[...], w_ref[...], preferred_element_type=jnp.float32)
    o_ref[...] = acc
    s = jnp.sum(acc, axis=0, keepdims=True)
    sq = jnp.sum(acc * acc, axis=0, keepdims=True)
    stats_ref[...] = jnp.concatenate([s, sq], axis=0)


def _gemm_bias_tanh_kernel(x_ref, w_ref, b_ref, o_ref):
    """y = tanh(x @ w + bias) -- bias/tanh epilogue fused into the matmul."""
    acc = jnp.dot(x_ref[...], w_ref[...], preferred_element_type=jnp.float32)
    o_ref[...] = jnp.tanh(acc + b_ref[...])


def _affine_relu_kernel(y_ref, s_ref, b_ref, o_ref):
    """relu(y * scale + shift), cast to output dtype (bf16 activations)."""
    z = y_ref[...] * s_ref[...] + b_ref[...]
    o_ref[...] = jnp.maximum(z, 0.0).astype(o_ref.dtype)


def gemm_stats_pallas(x, w):
    """Batched GEMM y[b] = x[b] @ w[b] with fused column stats.

    x: (B, M, K) bf16, w: (B, K, Np) bf16 (Np % 128 == 0).
    Returns y: (B, M, Np) f32 and stats: (B*Mg, 2, Np) f32 (row 0 = per-column
    sum, row 1 = per-column sum of squares of that row-block of y).
    """
    B, M, K = x.shape
    Np = w.shape[2]
    tm = _pick_tile(M, (1024, 512, 256, 128, 64, 32, 16, 8))
    tn = 256 if Np % 256 == 0 else 128
    mg, ng = M // tm, Np // tn
    return pl.pallas_call(
        _gemm_stats_kernel,
        out_shape=(jax.ShapeDtypeStruct((B, M, Np), jnp.float32),
                   jax.ShapeDtypeStruct((B * mg, 2, Np), jnp.float32)),
        grid_spec=pltpu.PrefetchScalarGridSpec(
            num_scalar_prefetch=0, grid=(B, mg, ng),
            in_specs=[pl.BlockSpec((None, tm, K), lambda b, i, j: (b, i, 0)),
                      pl.BlockSpec((None, K, tn), lambda b, i, j: (b, 0, j))],
            out_specs=[pl.BlockSpec((None, tm, tn), lambda b, i, j: (b, i, j)),
                       pl.BlockSpec((None, 2, tn),
                                    lambda b, i, j: (b * mg + i, 0, j))]),
        compiler_params=pltpu.CompilerParams(
            dimension_semantics=("parallel", "parallel", "parallel")),
    )(x, w)


def gemm_bias_tanh_pallas(x, w, bias):
    """Batched GEMM with fused bias + tanh epilogue.  bias: (1, Np) f32."""
    B, M, K = x.shape
    Np = w.shape[2]
    tm = _pick_tile(M, (1024, 512, 256, 128, 64, 32, 16, 8))
    tn = 256 if Np % 256 == 0 else 128
    return pl.pallas_call(
        _gemm_bias_tanh_kernel,
        out_shape=jax.ShapeDtypeStruct((B, M, Np), jnp.float32),
        grid_spec=pltpu.PrefetchScalarGridSpec(
            num_scalar_prefetch=0, grid=(B, M // tm, Np // tn),
            in_specs=[pl.BlockSpec((None, tm, K), lambda b, i, j: (b, i, 0)),
                      pl.BlockSpec((None, K, tn), lambda b, i, j: (b, 0, j)),
                      pl.BlockSpec((1, tn), lambda b, i, j: (0, j))],
            out_specs=pl.BlockSpec((None, tm, tn), lambda b, i, j: (b, i, j))),
        compiler_params=pltpu.CompilerParams(
            dimension_semantics=("parallel", "parallel", "parallel")),
    )(x, w, bias)


def affine_relu_pallas(y, scale, shift, out_dtype=jnp.bfloat16):
    """y: (M, C) f32; scale, shift: (1, C) f32.  relu(y*scale+shift) -> bf16."""
    M, C = y.shape
    tm = _pick_tile(M, (2048, 1024, 512, 256, 128, 64, 32, 16, 8))
    return pl.pallas_call(
        _affine_relu_kernel,
        out_shape=jax.ShapeDtypeStruct((M, C), out_dtype),
        grid_spec=pltpu.PrefetchScalarGridSpec(
            num_scalar_prefetch=0, grid=(M // tm,),
            in_specs=[pl.BlockSpec((tm, C), lambda i: (i, 0)),
                      pl.BlockSpec((1, C), lambda i: (0, 0)),
                      pl.BlockSpec((1, C), lambda i: (0, 0))],
            out_specs=pl.BlockSpec((tm, C), lambda i: (i, 0))),
        compiler_params=pltpu.CompilerParams(
            dimension_semantics=("parallel",)),
    )(y, scale, shift)


# --------------------------------------------------------------------------
# ConvTranspose2d lowering helpers (pure data-movement glue)
# --------------------------------------------------------------------------
def _bn_scale_shift(sums, sumsq, gamma, beta, count):
    mean = sums / count
    var = jnp.maximum(sumsq / count - mean * mean, 0.0)   # biased var (train BN)
    inv = jax.lax.rsqrt(var + BN_EPS)
    scale = gamma * inv
    shift = beta - mean * scale
    return scale, shift


def _subpixel_operands(x_nhwc, w):
    """Subpixel operands for ConvTranspose2d(k=4, stride=2, padding=1).

    out[n, 2m+ph, 2q+pw, co] =
        sum_{di,dj,ci} xpad[n, m+ph+di, q+pw+dj, ci] * w[ci, co, 3-ph-2di, 3-pw-2dj]
    Returns x_cols: (4, N*H*W, 4*Cin) bf16, w_cols: (4, 4*Cin, Np) bf16.
    """
    N, H, W, Cin = x_nhwc.shape
    Cout = w.shape[1]
    xp = jnp.pad(x_nhwc, ((0, 0), (1, 1), (1, 1), (0, 0)))
    x_cols, w_cols = [], []
    for ph in range(2):
        for pw in range(2):
            patches = jnp.stack(
                [xp[:, ph + di:ph + di + H, pw + dj:pw + dj + W, :]
                 for di in range(2) for dj in range(2)],
                axis=3)                                   # (N, H, W, 4, Cin)
            x_cols.append(patches.reshape(N * H * W, 4 * Cin))
            w_sub = w[:, :, (3 - ph)::-2, (3 - pw)::-2]   # (Cin, Cout, 2, 2)
            w_cols.append(jnp.transpose(w_sub, (2, 3, 0, 1)).reshape(4 * Cin, Cout))
    x_b = jnp.stack(x_cols).astype(jnp.bfloat16)
    w_b = _pad_last(jnp.stack(w_cols)).astype(jnp.bfloat16)
    return x_b, w_b


def _merge_parities(y, N, H, W):
    """(4, N*H*W, C) parity-major -> (N, 2H, 2W, C) NHWC."""
    C = y.shape[-1]
    y = y.reshape(2, 2, N, H, W, C).transpose(2, 3, 0, 4, 1, 5)
    return y.reshape(N, 2 * H, 2 * W, C)


# --------------------------------------------------------------------------
# Layers
# --------------------------------------------------------------------------
def _first_layer(x_nhwc, w, gamma, beta):
    """ConvTranspose2d(k=4, s=1, p=0, bias=False) on 1x1 input -> BN -> ReLU."""
    N, _, _, Cin = x_nhwc.shape
    Cout, k = w.shape[1], w.shape[2]
    Mp = max(8, ((N + 7) // 8) * 8)                     # sublane-aligned row count
    x2 = jnp.zeros((1, Mp, Cin), jnp.bfloat16)
    x2 = x2.at[0, :N].set(x_nhwc.reshape(N, Cin).astype(jnp.bfloat16))
    w2 = jnp.transpose(w, (0, 2, 3, 1)).reshape(Cin, k * k * Cout)  # cols=(kh,kw,co)
    w2 = _pad_last(w2)[None].astype(jnp.bfloat16)
    Np = w2.shape[-1]

    y, stats = gemm_stats_pallas(x2, w2)                # y: (1, Mp, Np)
    col_sums = stats[:, 0, :].sum(axis=0)[:k * k * Cout]
    col_sumsq = stats[:, 1, :].sum(axis=0)[:k * k * Cout]
    ch_sums = col_sums.reshape(k * k, Cout).sum(axis=0)
    ch_sumsq = col_sumsq.reshape(k * k, Cout).sum(axis=0)
    scale_c, shift_c = _bn_scale_shift(ch_sums, ch_sumsq, gamma, beta, N * k * k)
    scale = _pad_last(jnp.tile(scale_c, k * k)[None])    # per-(kh,kw,co) column
    shift = _pad_last(jnp.tile(shift_c, k * k)[None])

    z = affine_relu_pallas(y.reshape(Mp, Np), scale, shift)
    return z[:N, :k * k * Cout].reshape(N, k, k, Cout)


def _up_bn_relu_layer(x_nhwc, w, gamma, beta):
    """ConvTranspose2d(k=4, s=2, p=1, bias=False) -> BN (batch stats) -> ReLU."""
    N, H, W, _ = x_nhwc.shape
    Cout = w.shape[1]
    x_b, w_b = _subpixel_operands(x_nhwc, w)
    Np, M = w_b.shape[-1], x_b.shape[1]

    y, stats = gemm_stats_pallas(x_b, w_b)              # (4, M, Np)
    col_sums = stats[:, 0, :].sum(axis=0)
    col_sumsq = stats[:, 1, :].sum(axis=0)
    gamma_p = _pad_last(gamma[None])[0]
    beta_p = _pad_last(beta[None])[0]
    scale, shift = _bn_scale_shift(col_sums, col_sumsq, gamma_p, beta_p, 4 * M)

    z = affine_relu_pallas(y.reshape(4 * M, Np), scale[None], shift[None])
    return _merge_parities(z.reshape(4, M, Np), N, H, W)[:, :, :, :Cout]


def _out_layer(x_nhwc, w, bias):
    """ConvTranspose2d(k=4, s=2, p=1, bias=True) -> Tanh (fused into the GEMM)."""
    N, H, W, _ = x_nhwc.shape
    Cout = w.shape[1]
    x_b, w_b = _subpixel_operands(x_nhwc, w)
    bias_p = _pad_last(bias[None]).astype(jnp.float32)
    y = gemm_bias_tanh_pallas(x_b, w_b, bias_p)         # (4, M, Np) f32
    return _merge_parities(y, N, H, W)[:, :, :, :Cout]


# --------------------------------------------------------------------------
# GeneratorDCGAN forward + deterministic parameter init
# --------------------------------------------------------------------------
def init_params(key, noise_dim, output_channels, feature_map_gen):
    fg = feature_map_gen
    dims = [(noise_dim, fg * 16), (fg * 16, fg * 8),
            (fg * 8, fg * 4), (fg * 4, fg * 2)]
    keys = jax.random.split(key, len(dims) * 3 + 2)
    layers, ki = [], 0
    for cin, cout in dims:
        w = 0.02 * jax.random.normal(keys[ki], (cin, cout, 4, 4), jnp.float32); ki += 1
        gamma = 1.0 + 0.1 * jax.random.normal(keys[ki], (cout,), jnp.float32); ki += 1
        beta = 0.1 * jax.random.normal(keys[ki], (cout,), jnp.float32); ki += 1
        layers.append((w, gamma, beta))
    w_out = 0.02 * jax.random.normal(keys[ki], (fg * 2, output_channels, 4, 4),
                                     jnp.float32); ki += 1
    b_out = 0.1 * jax.random.normal(keys[ki], (output_channels,), jnp.float32)
    return {"gen_layers": layers, "out_w": w_out, "out_b": b_out}


@jax.jit
def generator_forward(latent_nchw, params):
    # NCHW (PyTorch) -> NHWC (kernel layout)
    x = jnp.transpose(latent_nchw, (0, 2, 3, 1)).astype(jnp.float32)
    w0, g0, b0 = params["gen_layers"][0]
    x = _first_layer(x, w0, g0, b0)
    for w, gamma, beta in params["gen_layers"][1:]:
        x = _up_bn_relu_layer(x, w, gamma, beta)
    x = _out_layer(x, params["out_w"], params["out_b"])
    # NHWC -> NCHW to match the PyTorch module's output convention
    return jnp.transpose(x, (0, 3, 1, 2))


# TODO(synk): nn.BatchNorm2d running_mean / running_var buffer updates (a
# training-time side effect, not part of the functional forward output) are
# not replicated.

if __name__ == "__main__":
    noise_dim, output_channels, feature_map_gen, batch = 16, 3, 4, 2

    key = jax.random.PRNGKey(0)
    k_z, k_p = jax.random.split(key)
    params = init_params(k_p, noise_dim, output_channels, feature_map_gen)
    z = jax.random.normal(k_z, (batch, noise_dim, 1, 1), jnp.float32)

    img = generator_forward(z, params)
    img = jax.block_until_ready(img)

    assert img.shape == (batch, output_channels, 64, 64), img.shape
    assert bool(jnp.all(jnp.isfinite(img)))
    assert bool(jnp.all(jnp.abs(img) <= 1.0 + 1e-6))   # Tanh range
    print("KERNEL_OK")
</pallas_src>

<mosaic_0001>
module attributes {stable_mosaic.version = 11 : i64} {
  func.func @_gemm_stats_kernel(%arg0: i32, %arg1: i32, %arg2: i32, %arg3: memref<1x8x16xbf16, #tpu.memory_space<vmem>>, %arg4: memref<1x16x256xbf16, #tpu.memory_space<vmem>>, %arg5: memref<1x8x256xf32, #tpu.memory_space<vmem>>, %arg6: memref<1x2x256xf32, #tpu.memory_space<vmem>>) attributes {dimension_semantics = [#tpu.dimension_semantics<parallel>, #tpu.dimension_semantics<parallel>, #tpu.dimension_semantics<parallel>], iteration_bounds = array<i64: 1, 1, 4>, scalar_prefetch = 0 : i64, scratch_operands = 0 : i64, tpu.core_type = #tpu.core_type<tc>, window_params = [{transform_indices = @transform_0, window_bounds = array<i64: 1, 8, 16>}, {transform_indices = @transform_1, window_bounds = array<i64: 1, 16, 256>}, {transform_indices = @transform_2, window_bounds = array<i64: 1, 8, 256>}, {transform_indices = @transform_3, window_bounds = array<i64: 1, 2, 256>}]} {
    %c0 = arith.constant 0 : index
    %c0_0 = arith.constant 0 : index
    %c0_1 = arith.constant 0 : index
    %0 = vector.load %arg3[%c0, %c0_0, %c0_1] : memref<1x8x16xbf16, #tpu.memory_space<vmem>>, vector<1x8x16xbf16>
    %1 = vector.shape_cast %0 : vector<1x8x16xbf16> to vector<8x16xbf16>
    %c0_2 = arith.constant 0 : index
    %c0_3 = arith.constant 0 : index
    %c0_4 = arith.constant 0 : index
    %2 = vector.load %arg4[%c0_2, %c0_3, %c0_4] : memref<1x16x256xbf16, #tpu.memory_space<vmem>>, vector<1x16x256xbf16>
    %3 = vector.shape_cast %2 : vector<1x16x256xbf16> to vector<16x256xbf16>
    %cst = arith.constant dense<0.000000e+00> : vector<8x256xf32>
    %4 = tpu.matmul %1, %3, %cst {dimension_numbers = #tpu.dot_dimension_numbers<[1], [0], [0], [1], [0, 0, 1, 1], [], []>} : vector<8x16xbf16>, vector<16x256xbf16>, vector<8x256xf32> -> vector<8x256xf32>
    %c0_5 = arith.constant 0 : index
    %c0_6 = arith.constant 0 : index
    %c0_7 = arith.constant 0 : index
    %5 = vector.load %arg5[%c0_5, %c0_6, %c0_7] : memref<1x8x256xf32, #tpu.memory_space<vmem>>, vector<1x8x256xf32>
    %6 = vector.shape_cast %5 : vector<1x8x256xf32> to vector<8x256xf32>
    %7 = vector.shape_cast %4 : vector<8x256xf32> to vector<1x8x256xf32>
    tpu.vector_store %arg5[%c0_5, %c0_6, %c0_7], %7 {strides = array<i32>} : memref<1x8x256xf32, #tpu.memory_space<vmem>>, vector<1x8x256xf32>,
    %cst_8 = arith.constant dense<0.000000e+00> : vector<256xf32>
    %8 = vector.multi_reduction <add>, %4, %cst_8 [0] : vector<8x256xf32> to vector<256xf32>
    %9 = vector.shape_cast %8 : vector<256xf32> to vector<1x256xf32>
    %10 = arith.mulf %4, %4 : vector<8x256xf32>
    %cst_9 = arith.constant dense<0.000000e+00> : vector<256xf32>
    %11 = vector.multi_reduction <add>, %10, %cst_9 [0] : vector<8x256xf32> to vector<256xf32>
    %12 = vector.shape_cast %11 : vector<256xf32> to vector<1x256xf32>
    %13 = tpu.concatenate %9, %12 in 0 : vector<1x256xf32>, vector<1x256xf32> -> vector<2x256xf32>
    %c0_10 = arith.constant 0 : index
    %c0_11 = arith.constant 0 : index
    %c0_12 = arith.constant 0 : index
    %14 = vector.load %arg6[%c0_10, %c0_11, %c0_12] : memref<1x2x256xf32, #tpu.memory_space<vmem>>, vector<1x2x256xf32>
    %15 = vector.shape_cast %14 : vector<1x2x256xf32> to vector<2x256xf32>
    %16 = vector.shape_cast %13 : vector<2x256xf32> to vector<1x2x256xf32>
    tpu.vector_store %arg6[%c0_10, %c0_11, %c0_12], %16 {strides = array<i32>} : memref<1x2x256xf32, #tpu.memory_space<vmem>>, vector<1x2x256xf32>,
    return
  }
  func.func @transform_0(%arg0: i32, %arg1: i32, %arg2: i32) -> (i32, i32, i32) {
    %c0_i32 = arith.constant 0 : i32
    %c0_i32_0 = arith.constant 0 : i32
    return %arg0, %arg1, %c0_i32 : i32, i32, i32
  }
  func.func @transform_1(%arg0: i32, %arg1: i32, %arg2: i32) -> (i32, i32, i32) {
    %c0_i32 = arith.constant 0 : i32
    %c0_i32_0 = arith.constant 0 : i32
    return %arg0, %c0_i32, %arg2 : i32, i32, i32
  }
  func.func @transform_2(%arg0: i32, %arg1: i32, %arg2: i32) -> (i32, i32, i32) {
    %c0_i32 = arith.constant 0 : i32
    return %arg0, %arg1, %arg2 : i32, i32, i32
  }
  func.func @transform_3(%arg0: i32, %arg1: i32, %arg2: i32) -> (i32, i32, i32) {
    %c1_i32 = arith.constant 1 : i32
    %0 = arith.muli %arg0, %c1_i32 : i32
    %1 = arith.addi %0, %arg1 : i32
    %c0_i32 = arith.constant 0 : i32
    %c0_i32_0 = arith.constant 0 : i32
    return %1, %c0_i32, %arg2 : i32, i32, i32
  }
}

module attributes {stable_mosaic.version = 11 : i64} {
  func.func @_affine_relu_kernel(%arg0: i32, %arg1: memref<8x1024xf32, #tpu.memory_space<vmem>>, %arg2: memref<1x1024xf32, #tpu.memory_space<vmem>>, %arg3: memref<1x1024xf32, #tpu.memory_space<vmem>>, %arg4: memref<8x1024xbf16, #tpu.memory_space<vmem>>) attributes {dimension_semantics = [#tpu.dimension_semantics<parallel>], iteration_bounds = array<i64: 1>, scalar_prefetch = 0 : i64, scratch_operands = 0 : i64, tpu.core_type = #tpu.core_type<tc>, window_params = [{transform_indices = @transform_0, window_bounds = array<i64: 8, 1024>}, {pipeline_mode = #tpu.pipeline_mode<synchronous>, transform_indices = @transform_1, window_bounds = array<i64: 1, 1024>}, {pipeline_mode = #tpu.pipeline_mode<synchronous>, transform_indices = @transform_2, window_bounds = array<i64: 1, 1024>}, {transform_indices = @transform_3, window_bounds = array<i64: 8, 1024>}]} {
    %c0 = arith.constant 0 : index
    %c0_0 = arith.constant 0 : index
    %0 = vector.load %arg1[%c0, %c0_0] : memref<8x1024xf32, #tpu.memory_space<vmem>>, vector<8x1024xf32>
    %c0_1 = arith.constant 0 : index
    %c0_2 = arith.constant 0 : index
    %1 = vector.load %arg2[%c0_1, %c0_2] : memref<1x1024xf32, #tpu.memory_space<vmem>>, vector<1x1024xf32>
    %2 = vector.broadcast %1 : vector<1x1024xf32> to vector<8x1024xf32>
    %3 = arith.mulf %0, %2 : vector<8x1024xf32>
    %c0_3 = arith.constant 0 : index
    %c0_4 = arith.constant 0 : index
    %4 = vector.load %arg3[%c0_3, %c0_4] : memref<1x1024xf32, #tpu.memory_space<vmem>>, vector<1x1024xf32>
    %5 = vector.broadcast %4 : vector<1x1024xf32> to vector<8x1024xf32>
    %6 = arith.addf %3, %5 : vector<8x1024xf32>
    %cst = arith.constant 0.000000e+00 : f32
    %7 = vector.broadcast %cst : f32 to vector<8x1024xf32>
    %8 = arith.maximumf %6, %7 : vector<8x1024xf32>
    %9 = arith.truncf %8 : vector<8x1024xf32> to vector<8x1024xbf16>
    %c0_5 = arith.constant 0 : index
    %c0_6 = arith.constant 0 : index
    %10 = vector.load %arg4[%c0_5, %c0_6] : memref<8x1024xbf16, #tpu.memory_space<vmem>>, vector<8x1024xbf16>
    tpu.vector_store %arg4[%c0_5, %c0_6], %9 {strides = array<i32>} : memref<8x1024xbf16, #tpu.memory_space<vmem>>, vector<8x1024xbf16>,
    return
  }
  func.func @transform_0(%arg0: i32) -> (i32, i32) {
    %c0_i32 = arith.constant 0 : i32
    %c0_i32_0 = arith.constant 0 : i32
    return %arg0, %c0_i32 : i32, i32
  }
  func.func @transform_1(%arg0: i32) -> (i32, i32) {
    %c0_i32 = arith.constant 0 : i32
    %c0_i32_0 = arith.constant 0 : i32
    %c0_i32_1 = arith.constant 0 : i32
    return %c0_i32, %c0_i32_0 : i32, i32
  }
  func.func @transform_2(%arg0: i32) -> (i32, i32) {
    %c0_i32 = arith.constant 0 : i32
    %c0_i32_0 = arith.constant 0 : i32
    %c0_i32_1 = arith.constant 0 : i32
    return %c0_i32, %c0_i32_0 : i32, i32
  }
  func.func @transform_3(%arg0: i32) -> (i32, i32) {
    %c0_i32 = arith.constant 0 : i32
    %c0_i32_0 = arith.constant 0 : i32
    return %arg0, %c0_i32 : i32, i32
  }
}

module attributes {stable_mosaic.version = 11 : i64} {
  func.func @_gemm_stats_kernel(%arg0: i32, %arg1: i32, %arg2: i32, %arg3: memref<1x32x256xbf16, #tpu.memory_space<vmem>>, %arg4: memref<1x256x128xbf16, #tpu.memory_space<vmem>>, %arg5: memref<1x32x128xf32, #tpu.memory_space<vmem>>, %arg6: memref<1x2x128xf32, #tpu.memory_space<vmem>>) attributes {dimension_semantics = [#tpu.dimension_semantics<parallel>, #tpu.dimension_semantics<parallel>, #tpu.dimension_semantics<parallel>], iteration_bounds = array<i64: 4, 1, 1>, scalar_prefetch = 0 : i64, scratch_operands = 0 : i64, tpu.core_type = #tpu.core_type<tc>, window_params = [{transform_indices = @transform_0, window_bounds = array<i64: 1, 32, 256>}, {transform_indices = @transform_1, window_bounds = array<i64: 1, 256, 128>}, {transform_indices = @transform_2, window_bounds = array<i64: 1, 32, 128>}, {transform_indices = @transform_3, window_bounds = array<i64: 1, 2, 128>}]} {
    %c0 = arith.constant 0 : index
    %c0_0 = arith.constant 0 : index
    %c0_1 = arith.constant 0 : index
    %0 = vector.load %arg3[%c0, %c0_0, %c0_1] : memref<1x32x256xbf16, #tpu.memory_space<vmem>>, vector<1x32x256xbf16>
    %1 = vector.shape_cast %0 : vector<1x32x256xbf16> to vector<32x256xbf16>
    %c0_2 = arith.constant 0 : index
    %c0_3 = arith.constant 0 : index
    %c0_4 = arith.constant 0 : index
    %2 = vector.load %arg4[%c0_2, %c0_3, %c0_4] : memref<1x256x128xbf16, #tpu.memory_space<vmem>>, vector<1x256x128xbf16>
    %3 = vector.shape_cast %2 : vector<1x256x128xbf16> to vector<256x128xbf16>
    %cst = arith.constant dense<0.000000e+00> : vector<32x128xf32>
    %4 = tpu.matmul %1, %3, %cst {dimension_numbers = #tpu.dot_dimension_numbers<[1], [0], [0], [1], [0, 0, 1, 1], [], []>} : vector<32x256xbf16>, vector<256x128xbf16>, vector<32x128xf32> -> vector<32x128xf32>
    %c0_5 = arith.constant 0 : index
    %c0_6 = arith.constant 0 : index
    %c0_7 = arith.constant 0 : index
    %5 = vector.load %arg5[%c0_5, %c0_6, %c0_7] : memref<1x32x128xf32, #tpu.memory_space<vmem>>, vector<1x32x128xf32>
    %6 = vector.shape_cast %5 : vector<1x32x128xf32> to vector<32x128xf32>
    %7 = vector.shape_cast %4 : vector<32x128xf32> to vector<1x32x128xf32>
    tpu.vector_store %arg5[%c0_5, %c0_6, %c0_7], %7 {strides = array<i32>} : memref<1x32x128xf32, #tpu.memory_space<vmem>>, vector<1x32x128xf32>,
    %cst_8 = arith.constant dense<0.000000e+00> : vector<128xf32>
    %8 = vector.multi_reduction <add>, %4, %cst_8 [0] : vector<32x128xf32> to vector<128xf32>
    %9 = vector.shape_cast %8 : vector<128xf32> to vector<1x128xf32>
    %10 = arith.mulf %4, %4 : vector<32x128xf32>
    %cst_9 = arith.constant dense<0.000000e+00> : vector<128xf32>
    %11 = vector.multi_reduction <add>, %10, %cst_9 [0] : vector<32x128xf32> to vector<128xf32>
    %12 = vector.shape_cast %11 : vector<128xf32> to vector<1x128xf32>
    %13 = tpu.concatenate %9, %12 in 0 : vector<1x128xf32>, vector<1x128xf32> -> vector<2x128xf32>
    %c0_10 = arith.constant 0 : index
    %c0_11 = arith.constant 0 : index
    %c0_12 = arith.constant 0 : index
    %14 = vector.load %arg6[%c0_10, %c0_11, %c0_12] : memref<1x2x128xf32, #tpu.memory_space<vmem>>, vector<1x2x128xf32>
    %15 = vector.shape_cast %14 : vector<1x2x128xf32> to vector<2x128xf32>
    %16 = vector.shape_cast %13 : vector<2x128xf32> to vector<1x2x128xf32>
    tpu.vector_store %arg6[%c0_10, %c0_11, %c0_12], %16 {strides = array<i32>} : memref<1x2x128xf32, #tpu.memory_space<vmem>>, vector<1x2x128xf32>,
    return
  }
  func.func @transform_0(%arg0: i32, %arg1: i32, %arg2: i32) -> (i32, i32, i32) {
    %c0_i32 = arith.constant 0 : i32
    %c0_i32_0 = arith.constant 0 : i32
    return %arg0, %arg1, %c0_i32 : i32, i32, i32
  }
  func.func @transform_1(%arg0: i32, %arg1: i32, %arg2: i32) -> (i32, i32, i32) {
    %c0_i32 = arith.constant 0 : i32
    %c0_i32_0 = arith.constant 0 : i32
    return %arg0, %c0_i32, %arg2 : i32, i32, i32
  }
  func.func @transform_2(%arg0: i32, %arg1: i32, %arg2: i32) -> (i32, i32, i32) {
    %c0_i32 = arith.constant 0 : i32
    return %arg0, %arg1, %arg2 : i32, i32, i32
  }
  func.func @transform_3(%arg0: i32, %arg1: i32, %arg2: i32) -> (i32, i32, i32) {
    %c1_i32 = arith.constant 1 : i32
    %0 = arith.muli %arg0, %c1_i32 : i32
    %1 = arith.addi %0, %arg1 : i32
    %c0_i32 = arith.constant 0 : i32
    %c0_i32_0 = arith.constant 0 : i32
    return %1, %c0_i32, %arg2 : i32, i32, i32
  }
}

module attributes {stable_mosaic.version = 11 : i64} {
  func.func @_affine_relu_kernel(%arg0: i32, %arg1: memref<128x128xf32, #tpu.memory_space<vmem>>, %arg2: memref<1x128xf32, #tpu.memory_space<vmem>>, %arg3: memref<1x128xf32, #tpu.memory_space<vmem>>, %arg4: memref<128x128xbf16, #tpu.memory_space<vmem>>) attributes {dimension_semantics = [#tpu.dimension_semantics<parallel>], iteration_bounds = array<i64: 1>, scalar_prefetch = 0 : i64, scratch_operands = 0 : i64, tpu.core_type = #tpu.core_type<tc>, window_params = [{transform_indices = @transform_0, window_bounds = array<i64: 128, 128>}, {pipeline_mode = #tpu.pipeline_mode<synchronous>, transform_indices = @transform_1, window_bounds = array<i64: 1, 128>}, {pipeline_mode = #tpu.pipeline_mode<synchronous>, transform_indices = @transform_2, window_bounds = array<i64: 1, 128>}, {transform_indices = @transform_3, window_bounds = array<i64: 128, 128>}]} {
    %c0 = arith.constant 0 : index
    %c0_0 = arith.constant 0 : index
    %0 = vector.load %arg1[%c0, %c0_0] : memref<128x128xf32, #tpu.memory_space<vmem>>, vector<128x128xf32>
    %c0_1 = arith.constant 0 : index
    %c0_2 = arith.constant 0 : index
    %1 = vector.load %arg2[%c0_1, %c0_2] : memref<1x128xf32, #tpu.memory_space<vmem>>, vector<1x128xf32>
    %2 = vector.broadcast %1 : vector<1x128xf32> to vector<128x128xf32>
    %3 = arith.mulf %0, %2 : vector<128x128xf32>
    %c0_3 = arith.constant 0 : index
    %c0_4 = arith.constant 0 : index
    %4 = vector.load %arg3[%c0_3, %c0_4] : memref<1x128xf32, #tpu.memory_space<vmem>>, vector<1x128xf32>
    %5 = vector.broadcast %4 : vector<1x128xf32> to vector<128x128xf32>
    %6 = arith.addf %3, %5 : vector<128x128xf32>
    %cst = arith.constant 0.000000e+00 : f32
    %7 = vector.broadcast %cst : f32 to vector<128x128xf32>
    %8 = arith.maximumf %6, %7 : vector<128x128xf32>
    %9 = arith.truncf %8 : vector<128x128xf32> to vector<128x128xbf16>
    %c0_5 = arith.constant 0 : index
    %c0_6 = arith.constant 0 : index
    %10 = vector.load %arg4[%c0_5, %c0_6] : memref<128x128xbf16, #tpu.memory_space<vmem>>, vector<128x128xbf16>
    tpu.vector_store %arg4[%c0_5, %c0_6], %9 {strides = array<i32>} : memref<128x128xbf16, #tpu.memory_space<vmem>>, vector<128x128xbf16>,
    return
  }
  func.func @transform_0(%arg0: i32) -> (i32, i32) {
    %c0_i32 = arith.constant 0 : i32
    %c0_i32_0 = arith.constant 0 : i32
    return %arg0, %c0_i32 : i32, i32
  }
  func.func @transform_1(%arg0: i32) -> (i32, i32) {
    %c0_i32 = arith.constant 0 : i32
    %c0_i32_0 = arith.constant 0 : i32
    %c0_i32_1 = arith.constant 0 : i32
    return %c0_i32, %c0_i32_0 : i32, i32
  }
  func.func @transform_2(%arg0: i32) -> (i32, i32) {
    %c0_i32 = arith.constant 0 : i32
    %c0_i32_0 = arith.constant 0 : i32
    %c0_i32_1 = arith.constant 0 : i32
    return %c0_i32, %c0_i32_0 : i32, i32
  }
  func.func @transform_3(%arg0: i32) -> (i32, i32) {
    %c0_i32 = arith.constant 0 : i32
    %c0_i32_0 = arith.constant 0 : i32
    return %arg0, %c0_i32 : i32, i32
  }
}

module attributes {stable_mosaic.version = 11 : i64} {
  func.func @_gemm_stats_kernel(%arg0: i32, %arg1: i32, %arg2: i32, %arg3: memref<1x128x128xbf16, #tpu.memory_space<vmem>>, %arg4: memref<1x128x128xbf16, #tpu.memory_space<vmem>>, %arg5: memref<1x128x128xf32, #tpu.memory_space<vmem>>, %arg6: memref<1x2x128xf32, #tpu.memory_space<vmem>>) attributes {dimension_semantics = [#tpu.dimension_semantics<parallel>, #tpu.dimension_semantics<parallel>, #tpu.dimension_semantics<parallel>], iteration_bounds = array<i64: 4, 1, 1>, scalar_prefetch = 0 : i64, scratch_operands = 0 : i64, tpu.core_type = #tpu.core_type<tc>, window_params = [{transform_indices = @transform_0, window_bounds = array<i64: 1, 128, 128>}, {transform_indices = @transform_1, window_bounds = array<i64: 1, 128, 128>}, {transform_indices = @transform_2, window_bounds = array<i64: 1, 128, 128>}, {transform_indices = @transform_3, window_bounds = array<i64: 1, 2, 128>}]} {
    %c0 = arith.constant 0 : index
    %c0_0 = arith.constant 0 : index
    %c0_1 = arith.constant 0 : index
    %0 = vector.load %arg3[%c0, %c0_0, %c0_1] : memref<1x128x128xbf16, #tpu.memory_space<vmem>>, vector<1x128x128xbf16>
    %1 = vector.shape_cast %0 : vector<1x128x128xbf16> to vector<128x128xbf16>
    %c0_2 = arith.constant 0 : index
    %c0_3 = arith.constant 0 : index
    %c0_4 = arith.constant 0 : index
    %2 = vector.load %arg4[%c0_2, %c0_3, %c0_4] : memref<1x128x128xbf16, #tpu.memory_space<vmem>>, vector<1x128x128xbf16>
    %3 = vector.shape_cast %2 : vector<1x128x128xbf16> to vector<128x128xbf16>
    %cst = arith.constant dense<0.000000e+00> : vector<128x128xf32>
    %4 = tpu.matmul %1, %3, %cst {dimension_numbers = #tpu.dot_dimension_numbers<[1], [0], [0], [1], [0, 0, 1, 1], [], []>} : vector<128x128xbf16>, vector<128x128xbf16>, vector<128x128xf32> -> vector<128x128xf32>
    %c0_5 = arith.constant 0 : index
    %c0_6 = arith.constant 0 : index
    %c0_7 = arith.constant 0 : index
    %5 = vector.load %arg5[%c0_5, %c0_6, %c0_7] : memref<1x128x128xf32, #tpu.memory_space<vmem>>, vector<1x128x128xf32>
    %6 = vector.shape_cast %5 : vector<1x128x128xf32> to vector<128x128xf32>
    %7 = vector.shape_cast %4 : vector<128x128xf32> to vector<1x128x128xf32>
    tpu.vector_store %arg5[%c0_5, %c0_6, %c0_7], %7 {strides = array<i32>} : memref<1x128x128xf32, #tpu.memory_space<vmem>>, vector<1x128x128xf32>,
    %cst_8 = arith.constant dense<0.000000e+00> : vector<128xf32>
    %8 = vector.multi_reduction <add>, %4, %cst_8 [0] : vector<128x128xf32> to vector<128xf32>
    %9 = vector.shape_cast %8 : vector<128xf32> to vector<1x128xf32>
    %10 = arith.mulf %4, %4 : vector<128x128xf32>
    %cst_9 = arith.constant dense<0.000000e+00> : vector<128xf32>
    %11 = vector.multi_reduction <add>, %10, %cst_9 [0] : vector<128x128xf32> to vector<128xf32>
    %12 = vector.shape_cast %11 : vector<128xf32> to vector<1x128xf32>
    %13 = tpu.concatenate %9, %12 in 0 : vector<1x128xf32>, vector<1x128xf32> -> vector<2x128xf32>
    %c0_10 = arith.constant 0 : index
    %c0_11 = arith.constant 0 : index
    %c0_12 = arith.constant 0 : index
    %14 = vector.load %arg6[%c0_10, %c0_11, %c0_12] : memref<1x2x128xf32, #tpu.memory_space<vmem>>, vector<1x2x128xf32>
    %15 = vector.shape_cast %14 : vector<1x2x128xf32> to vector<2x128xf32>
    %16 = vector.shape_cast %13 : vector<2x128xf32> to vector<1x2x128xf32>
    tpu.vector_store %arg6[%c0_10, %c0_11, %c0_12], %16 {strides = array<i32>} : memref<1x2x128xf32, #tpu.memory_space<vmem>>, vector<1x2x128xf32>,
    return
  }
  func.func @transform_0(%arg0: i32, %arg1: i32, %arg2: i32) -> (i32, i32, i32) {
    %c0_i32 = arith.constant 0 : i32
    %c0_i32_0 = arith.constant 0 : i32
    return %arg0, %arg1, %c0_i32 : i32, i32, i32
  }
  func.func @transform_1(%arg0: i32, %arg1: i32, %arg2: i32) -> (i32, i32, i32) {
    %c0_i32 = arith.constant 0 : i32
    %c0_i32_0 = arith.constant 0 : i32
    return %arg0, %c0_i32, %arg2 : i32, i32, i32
  }
  func.func @transform_2(%arg0: i32, %arg1: i32, %arg2: i32) -> (i32, i32, i32) {
    %c0_i32 = arith.constant 0 : i32
    return %arg0, %arg1, %arg2 : i32, i32, i32
  }
  func.func @transform_3(%arg0: i32, %arg1: i32, %arg2: i32) -> (i32, i32, i32) {
    %c1_i32 = arith.constant 1 : i32
    %0 = arith.muli %arg0, %c1_i32 : i32
    %1 = arith.addi %0, %arg1 : i32
    %c0_i32 = arith.constant 0 : i32
    %c0_i32_0 = arith.constant 0 : i32
    return %1, %c0_i32, %arg2 : i32, i32, i32
  }
}

module attributes {stable_mosaic.version = 11 : i64} {
  func.func @_affine_relu_kernel(%arg0: i32, %arg1: memref<512x128xf32, #tpu.memory_space<vmem>>, %arg2: memref<1x128xf32, #tpu.memory_space<vmem>>, %arg3: memref<1x128xf32, #tpu.memory_space<vmem>>, %arg4: memref<512x128xbf16, #tpu.memory_space<vmem>>) attributes {dimension_semantics = [#tpu.dimension_semantics<parallel>], iteration_bounds = array<i64: 1>, scalar_prefetch = 0 : i64, scratch_operands = 0 : i64, tpu.core_type = #tpu.core_type<tc>, window_params = [{transform_indices = @transform_0, window_bounds = array<i64: 512, 128>}, {pipeline_mode = #tpu.pipeline_mode<synchronous>, transform_indices = @transform_1, window_bounds = array<i64: 1, 128>}, {pipeline_mode = #tpu.pipeline_mode<synchronous>, transform_indices = @transform_2, window_bounds = array<i64: 1, 128>}, {transform_indices = @transform_3, window_bounds = array<i64: 512, 128>}]} {
    %c0 = arith.constant 0 : index
    %c0_0 = arith.constant 0 : index
    %0 = vector.load %arg1[%c0, %c0_0] : memref<512x128xf32, #tpu.memory_space<vmem>>, vector<512x128xf32>
    %c0_1 = arith.constant 0 : index
    %c0_2 = arith.constant 0 : index
    %1 = vector.load %arg2[%c0_1, %c0_2] : memref<1x128xf32, #tpu.memory_space<vmem>>, vector<1x128xf32>
    %2 = vector.broadcast %1 : vector<1x128xf32> to vector<512x128xf32>
    %3 = arith.mulf %0, %2 : vector<512x128xf32>
    %c0_3 = arith.constant 0 : index
    %c0_4 = arith.constant 0 : index
    %4 = vector.load %arg3[%c0_3, %c0_4] : memref<1x128xf32, #tpu.memory_space<vmem>>, vector<1x128xf32>
    %5 = vector.broadcast %4 : vector<1x128xf32> to vector<512x128xf32>
    %6 = arith.addf %3, %5 : vector<512x128xf32>
    %cst = arith.constant 0.000000e+00 : f32
    %7 = vector.broadcast %cst : f32 to vector<512x128xf32>
    %8 = arith.maximumf %6, %7 : vector<512x128xf32>
    %9 = arith.truncf %8 : vector<512x128xf32> to vector<512x128xbf16>
    %c0_5 = arith.constant 0 : index
    %c0_6 = arith.constant 0 : index
    %10 = vector.load %arg4[%c0_5, %c0_6] : memref<512x128xbf16, #tpu.memory_space<vmem>>, vector<512x128xbf16>
    tpu.vector_store %arg4[%c0_5, %c0_6], %9 {strides = array<i32>} : memref<512x128xbf16, #tpu.memory_space<vmem>>, vector<512x128xbf16>,
    return
  }
  func.func @transform_0(%arg0: i32) -> (i32, i32) {
    %c0_i32 = arith.constant 0 : i32
    %c0_i32_0 = arith.constant 0 : i32
    return %arg0, %c0_i32 : i32, i32
  }
  func.func @transform_1(%arg0: i32) -> (i32, i32) {
    %c0_i32 = arith.constant 0 : i32
    %c0_i32_0 = arith.constant 0 : i32
    %c0_i32_1 = arith.constant 0 : i32
    return %c0_i32, %c0_i32_0 : i32, i32
  }
  func.func @transform_2(%arg0: i32) -> (i32, i32) {
    %c0_i32 = arith.constant 0 : i32
    %c0_i32_0 = arith.constant 0 : i32
    %c0_i32_1 = arith.constant 0 : i32
    return %c0_i32, %c0_i32_0 : i32, i32
  }
  func.func @transform_3(%arg0: i32) -> (i32, i32) {
    %c0_i32 = arith.constant 0 : i32
    %c0_i32_0 = arith.constant 0 : i32
    return %arg0, %c0_i32 : i32, i32
  }
}

module attributes {stable_mosaic.version = 11 : i64} {
  func.func @_gemm_stats_kernel(%arg0: i32, %arg1: i32, %arg2: i32, %arg3: memref<1x512x64xbf16, #tpu.memory_space<vmem>>, %arg4: memref<1x64x128xbf16, #tpu.memory_space<vmem>>, %arg5: memref<1x512x128xf32, #tpu.memory_space<vmem>>, %arg6: memref<1x2x128xf32, #tpu.memory_space<vmem>>) attributes {dimension_semantics = [#tpu.dimension_semantics<parallel>, #tpu.dimension_semantics<parallel>, #tpu.dimension_semantics<parallel>], iteration_bounds = array<i64: 4, 1, 1>, scalar_prefetch = 0 : i64, scratch_operands = 0 : i64, tpu.core_type = #tpu.core_type<tc>, window_params = [{transform_indices = @transform_0, window_bounds = array<i64: 1, 512, 64>}, {transform_indices = @transform_1, window_bounds = array<i64: 1, 64, 128>}, {transform_indices = @transform_2, window_bounds = array<i64: 1, 512, 128>}, {transform_indices = @transform_3, window_bounds = array<i64: 1, 2, 128>}]} {
    %c0 = arith.constant 0 : index
    %c0_0 = arith.constant 0 : index
    %c0_1 = arith.constant 0 : index
    %0 = vector.load %arg3[%c0, %c0_0, %c0_1] : memref<1x512x64xbf16, #tpu.memory_space<vmem>>, vector<1x512x64xbf16>
    %1 = vector.shape_cast %0 : vector<1x512x64xbf16> to vector<512x64xbf16>
    %c0_2 = arith.constant 0 : index
    %c0_3 = arith.constant 0 : index
    %c0_4 = arith.constant 0 : index
    %2 = vector.load %arg4[%c0_2, %c0_3, %c0_4] : memref<1x64x128xbf16, #tpu.memory_space<vmem>>, vector<1x64x128xbf16>
    %3 = vector.shape_cast %2 : vector<1x64x128xbf16> to vector<64x128xbf16>
    %cst = arith.constant dense<0.000000e+00> : vector<512x128xf32>
    %4 = tpu.matmul %1, %3, %cst {dimension_numbers = #tpu.dot_dimension_numbers<[1], [0], [0], [1], [0, 0, 1, 1], [], []>} : vector<512x64xbf16>, vector<64x128xbf16>, vector<512x128xf32> -> vector<512x128xf32>
    %c0_5 = arith.constant 0 : index
    %c0_6 = arith.constant 0 : index
    %c0_7 = arith.constant 0 : index
    %5 = vector.load %arg5[%c0_5, %c0_6, %c0_7] : memref<1x512x128xf32, #tpu.memory_space<vmem>>, vector<1x512x128xf32>
    %6 = vector.shape_cast %5 : vector<1x512x128xf32> to vector<512x128xf32>
    %7 = vector.shape_cast %4 : vector<512x128xf32> to vector<1x512x128xf32>
    tpu.vector_store %arg5[%c0_5, %c0_6, %c0_7], %7 {strides = array<i32>} : memref<1x512x128xf32, #tpu.memory_space<vmem>>, vector<1x512x128xf32>,
    %cst_8 = arith.constant dense<0.000000e+00> : vector<128xf32>
    %8 = vector.multi_reduction <add>, %4, %cst_8 [0] : vector<512x128xf32> to vector<128xf32>
    %9 = vector.shape_cast %8 : vector<128xf32> to vector<1x128xf32>
    %10 = arith.mulf %4, %4 : vector<512x128xf32>
    %cst_9 = arith.constant dense<0.000000e+00> : vector<128xf32>
    %11 = vector.multi_reduction <add>, %10, %cst_9 [0] : vector<512x128xf32> to vector<128xf32>
    %12 = vector.shape_cast %11 : vector<128xf32> to vector<1x128xf32>
    %13 = tpu.concatenate %9, %12 in 0 : vector<1x128xf32>, vector<1x128xf32> -> vector<2x128xf32>
    %c0_10 = arith.constant 0 : index
    %c0_11 = arith.constant 0 : index
    %c0_12 = arith.constant 0 : index
    %14 = vector.load %arg6[%c0_10, %c0_11, %c0_12] : memref<1x2x128xf32, #tpu.memory_space<vmem>>, vector<1x2x128xf32>
    %15 = vector.shape_cast %14 : vector<1x2x128xf32> to vector<2x128xf32>
    %16 = vector.shape_cast %13 : vector<2x128xf32> to vector<1x2x128xf32>
    tpu.vector_store %arg6[%c0_10, %c0_11, %c0_12], %16 {strides = array<i32>} : memref<1x2x128xf32, #tpu.memory_space<vmem>>, vector<1x2x128xf32>,
    return
  }
  func.func @transform_0(%arg0: i32, %arg1: i32, %arg2: i32) -> (i32, i32, i32) {
    %c0_i32 = arith.constant 0 : i32
    %c0_i32_0 = arith.constant 0 : i32
    return %arg0, %arg1, %c0_i32 : i32, i32, i32
  }
  func.func @transform_1(%arg0: i32, %arg1: i32, %arg2: i32) -> (i32, i32, i32) {
    %c0_i32 = arith.constant 0 : i32
    %c0_i32_0 = arith.constant 0 : i32
    return %arg0, %c0_i32, %arg2 : i32, i32, i32
  }
  func.func @transform_2(%arg0: i32, %arg1: i32, %arg2: i32) -> (i32, i32, i32) {
    %c0_i32 = arith.constant 0 : i32
    return %arg0, %arg1, %arg2 : i32, i32, i32
  }
  func.func @transform_3(%arg0: i32, %arg1: i32, %arg2: i32) -> (i32, i32, i32) {
    %c1_i32 = arith.constant 1 : i32
    %0 = arith.muli %arg0, %c1_i32 : i32
    %1 = arith.addi %0, %arg1 : i32
    %c0_i32 = arith.constant 0 : i32
    %c0_i32_0 = arith.constant 0 : i32
    return %1, %c0_i32, %arg2 : i32, i32, i32
  }
}

module attributes {stable_mosaic.version = 11 : i64} {
  func.func @_affine_relu_kernel(%arg0: i32, %arg1: memref<2048x128xf32, #tpu.memory_space<vmem>>, %arg2: memref<1x128xf32, #tpu.memory_space<vmem>>, %arg3: memref<1x128xf32, #tpu.memory_space<vmem>>, %arg4: memref<2048x128xbf16, #tpu.memory_space<vmem>>) attributes {dimension_semantics = [#tpu.dimension_semantics<parallel>], iteration_bounds = array<i64: 1>, scalar_prefetch = 0 : i64, scratch_operands = 0 : i64, tpu.core_type = #tpu.core_type<tc>, window_params = [{transform_indices = @transform_0, window_bounds = array<i64: 2048, 128>}, {pipeline_mode = #tpu.pipeline_mode<synchronous>, transform_indices = @transform_1, window_bounds = array<i64: 1, 128>}, {pipeline_mode = #tpu.pipeline_mode<synchronous>, transform_indices = @transform_2, window_bounds = array<i64: 1, 128>}, {transform_indices = @transform_3, window_bounds = array<i64: 2048, 128>}]} {
    %c0 = arith.constant 0 : index
    %c0_0 = arith.constant 0 : index
    %0 = vector.load %arg1[%c0, %c0_0] : memref<2048x128xf32, #tpu.memory_space<vmem>>, vector<2048x128xf32>
    %c0_1 = arith.constant 0 : index
    %c0_2 = arith.constant 0 : index
    %1 = vector.load %arg2[%c0_1, %c0_2] : memref<1x128xf32, #tpu.memory_space<vmem>>, vector<1x128xf32>
    %2 = vector.broadcast %1 : vector<1x128xf32> to vector<2048x128xf32>
    %3 = arith.mulf %0, %2 : vector<2048x128xf32>
    %c0_3 = arith.constant 0 : index
    %c0_4 = arith.constant 0 : index
    %4 = vector.load %arg3[%c0_3, %c0_4] : memref<1x128xf32, #tpu.memory_space<vmem>>, vector<1x128xf32>
    %5 = vector.broadcast %4 : vector<1x128xf32> to vector<2048x128xf32>
    %6 = arith.addf %3, %5 : vector<2048x128xf32>
    %cst = arith.constant 0.000000e+00 : f32
    %7 = vector.broadcast %cst : f32 to vector<2048x128xf32>
    %8 = arith.maximumf %6, %7 : vector<2048x128xf32>
    %9 = arith.truncf %8 : vector<2048x128xf32> to vector<2048x128xbf16>
    %c0_5 = arith.constant 0 : index
    %c0_6 = arith.constant 0 : index
    %10 = vector.load %arg4[%c0_5, %c0_6] : memref<2048x128xbf16, #tpu.memory_space<vmem>>, vector<2048x128xbf16>
    tpu.vector_store %arg4[%c0_5, %c0_6], %9 {strides = array<i32>} : memref<2048x128xbf16, #tpu.memory_space<vmem>>, vector<2048x128xbf16>,
    return
  }
  func.func @transform_0(%arg0: i32) -> (i32, i32) {
    %c0_i32 = arith.constant 0 : i32
    %c0_i32_0 = arith.constant 0 : i32
    return %arg0, %c0_i32 : i32, i32
  }
  func.func @transform_1(%arg0: i32) -> (i32, i32) {
    %c0_i32 = arith.constant 0 : i32
    %c0_i32_0 = arith.constant 0 : i32
    %c0_i32_1 = arith.constant 0 : i32
    return %c0_i32, %c0_i32_0 : i32, i32
  }
  func.func @transform_2(%arg0: i32) -> (i32, i32) {
    %c0_i32 = arith.constant 0 : i32
    %c0_i32_0 = arith.constant 0 : i32
    %c0_i32_1 = arith.constant 0 : i32
    return %c0_i32, %c0_i32_0 : i32, i32
  }
  func.func @transform_3(%arg0: i32) -> (i32, i32) {
    %c0_i32 = arith.constant 0 : i32
    %c0_i32_0 = arith.constant 0 : i32
    return %arg0, %c0_i32 : i32, i32
  }
}

module attributes {stable_mosaic.version = 11 : i64} {
  func.func @_gemm_bias_tanh_kernel(%arg0: i32, %arg1: i32, %arg2: i32, %arg3: memref<1x1024x32xbf16, #tpu.memory_space<vmem>>, %arg4: memref<1x32x128xbf16, #tpu.memory_space<vmem>>, %arg5: memref<1x128xf32, #tpu.memory_space<vmem>>, %arg6: memref<1x1024x128xf32, #tpu.memory_space<vmem>>) attributes {dimension_semantics = [#tpu.dimension_semantics<parallel>, #tpu.dimension_semantics<parallel>, #tpu.dimension_semantics<parallel>], iteration_bounds = array<i64: 4, 2, 1>, scalar_prefetch = 0 : i64, scratch_operands = 0 : i64, tpu.core_type = #tpu.core_type<tc>, window_params = [{transform_indices = @transform_0, window_bounds = array<i64: 1, 1024, 32>}, {transform_indices = @transform_1, window_bounds = array<i64: 1, 32, 128>}, {transform_indices = @transform_2, window_bounds = array<i64: 1, 128>}, {transform_indices = @transform_3, window_bounds = array<i64: 1, 1024, 128>}]} {
    %c0 = arith.constant 0 : index
    %c0_0 = arith.constant 0 : index
    %c0_1 = arith.constant 0 : index
    %0 = vector.load %arg3[%c0, %c0_0, %c0_1] : memref<1x1024x32xbf16, #tpu.memory_space<vmem>>, vector<1x1024x32xbf16>
    %1 = vector.shape_cast %0 : vector<1x1024x32xbf16> to vector<1024x32xbf16>
    %c0_2 = arith.constant 0 : index
    %c0_3 = arith.constant 0 : index
    %c0_4 = arith.constant 0 : index
    %2 = vector.load %arg4[%c0_2, %c0_3, %c0_4] : memref<1x32x128xbf16, #tpu.memory_space<vmem>>, vector<1x32x128xbf16>
    %3 = vector.shape_cast %2 : vector<1x32x128xbf16> to vector<32x128xbf16>
    %cst = arith.constant dense<0.000000e+00> : vector<1024x128xf32>
    %4 = tpu.matmul %1, %3, %cst {dimension_numbers = #tpu.dot_dimension_numbers<[1], [0], [0], [1], [0, 0, 1, 1], [], []>} : vector<1024x32xbf16>, vector<32x128xbf16>, vector<1024x128xf32> -> vector<1024x128xf32>
    %c0_5 = arith.constant 0 : index
    %c0_6 = arith.constant 0 : index
    %5 = vector.load %arg5[%c0_5, %c0_6] : memref<1x128xf32, #tpu.memory_space<vmem>>, vector<1x128xf32>
    %6 = vector.broadcast %5 : vector<1x128xf32> to vector<1024x128xf32>
    %7 = arith.addf %4, %6 : vector<1024x128xf32>
    %8 = math.tanh %7 : vector<1024x128xf32>
    %c0_7 = arith.constant 0 : index
    %c0_8 = arith.constant 0 : index
    %c0_9 = arith.constant 0 : index
    %9 = vector.load %arg6[%c0_7, %c0_8, %c0_9] : memref<1x1024x128xf32, #tpu.memory_space<vmem>>, vector<1x1024x128xf32>
    %10 = vector.shape_cast %9 : vector<1x1024x128xf32> to vector<1024x128xf32>
    %11 = vector.shape_cast %8 : vector<1024x128xf32> to vector<1x1024x128xf32>
    tpu.vector_store %arg6[%c0_7, %c0_8, %c0_9], %11 {strides = array<i32>} : memref<1x1024x128xf32, #tpu.memory_space<vmem>>, vector<1x1024x128xf32>,
    return
  }
  func.func @transform_0(%arg0: i32, %arg1: i32, %arg2: i32) -> (i32, i32, i32) {
    %c0_i32 = arith.constant 0 : i32
    %c0_i32_0 = arith.constant 0 : i32
    return %arg0, %arg1, %c0_i32 : i32, i32, i32
  }
  func.func @transform_1(%arg0: i32, %arg1: i32, %arg2: i32) -> (i32, i32, i32) {
    %c0_i32 = arith.constant 0 : i32
    %c0_i32_0 = arith.constant 0 : i32
    return %arg0, %c0_i32, %arg2 : i32, i32, i32
  }
  func.func @transform_2(%arg0: i32, %arg1: i32, %arg2: i32) -> (i32, i32) {
    %c0_i32 = arith.constant 0 : i32
    %c0_i32_0 = arith.constant 0 : i32
    return %c0_i32, %arg2 : i32, i32
  }
  func.func @transform_3(%arg0: i32, %arg1: i32, %arg2: i32) -> (i32, i32, i32) {
    %c0_i32 = arith.constant 0 : i32
    return %arg0, %arg1, %arg2 : i32, i32, i32
  }
}

</mosaic_0001>

<bundles_post_ra>
// kernel: tile.13
= control target key start
LH: loop header
LB: loop body
LE: loop exit
PB: predicated region body
PF: predicated region fallthrough
CT: control target
= control target key end

     0   :  { %s28_s0 = inlined_call_operand.vmem [shape: f32[64], index: 0, kind: input, shape index: {}]   ;;  %s29_s1 = inlined_call_operand.vmem [shape: f32[16,64], index: 1, kind: output, shape index: {}]  }
   0x1   :  { %v4_v0 = vld [vmem:[%s28_s0] ss:$0 sm:$0xff] }
   0x2   :  { %5 = vst [vmem:[%s29_s1] sm:$0xff] %v4_v0  ;;  %8 = vst [vmem:[%s29_s1 + $0x8] sm:$0xff] %v4_v0 }

// kernel: tile.14
= control target key start
LH: loop header
LB: loop body
LE: loop exit
PB: predicated region body
PF: predicated region fallthrough
CT: control target
= control target key end

     0   :  { %vm3_vm0 = vcmask 523264   ;;  %vm10_vm1 = vcmask 1048064   ;;  %s116_s0 = inlined_call_operand.vmem [shape: f32[16,64], index: 0, kind: input, shape index: {}]   ;;  %s117_s1 = inlined_call_operand.vmem [shape: f32[1,1024], index: 1, kind: output, shape index: {}]  }
   0x1   :  { %v66_v0 = vld [vmem:[%s116_s0 + $0x1] ss:$2 sm:$0xff]   ;;  %v2_v1 = vld [vmem:[%s116_s0] ss:$2 sm:$0xff]   ;;  %s75_s0 = smov 64  }
   0x2   :  { %8 = vrot.lane.b32.xlu0 %v66_v0, %s75_s0  ;;  %4 = vst.msk [vmem:[#allocation0] ss:$8 sm:$0xf] %vm3_vm0, %v2_v1   ;;  %5 = vst.msk [vmem:[#allocation0] ss:$8 sm:$0xf0] %vm3_vm0, %v2_v1  }
  0x74   :  { %v9_v2 = vpop.permute.xlu0 %8  }
  0x75   :  { %11 = vst.msk [vmem:[#allocation0] ss:$8 sm:$0xf] %vm10_vm1, %v9_v2   ;;  %12 = vst.msk [vmem:[#allocation0] ss:$8 sm:$0xf0] %vm10_vm1, %v9_v2  }
  0x7c   :  { %v16_v3 = vld [vmem:[#allocation0] sm:$0x1]  ;;  %v20_v4 = vld [vmem:[#allocation0 + $0x8] sm:$0x1]  ;;  %v25_v5 = vld [vmem:[#allocation0 + $0x10] sm:$0x1] }
  0x7d   :  { %18 = vst [vmem:[%s117_s1] sm:$0x1] %v16_v3  ;;  %67 = vst [vmem:[%s117_s1 + $0x1] sm:$0x1] %v20_v4  ;;  %v31_v6 = vld [vmem:[#allocation0 + $0x18] sm:$0x1] }
  0x7e   :  { %68 = vst [vmem:[%s117_s1 + $0x2] sm:$0x1] %v25_v5  ;;  %v37_v7 = vld [vmem:[#allocation0 + $0x20] sm:$0x1]  ;;  %v43_v8 = vld [vmem:[#allocation0 + $0x28] sm:$0x1] }
  0x7f   :  { %69 = vst [vmem:[%s117_s1 + $0x3] sm:$0x1] %v31_v6  ;;  %70 = vst [vmem:[%s117_s1 + $0x4] sm:$0x1] %v37_v7  ;;  %v49_v9 = vld [vmem:[#allocation0 + $0x30] sm:$0x1] }
  0x80   :  { %71 = vst [vmem:[%s117_s1 + $0x5] sm:$0x1] %v43_v8  ;;  %v55_v10 = vld [vmem:[#allocation0 + $0x38] sm:$0x1]  ;;  %72 = vst [vmem:[%s117_s1 + $0x6] sm:$0x1] %v49_v9 }
  0x81   :  { %73 = vst [vmem:[%s117_s1 + $0x7] sm:$0x1] %v55_v10 }

// kernel: generator_forward.10
= control target key start
LH: loop header
LB: loop body
LE: loop exit
PB: predicated region body
PF: predicated region fallthrough
CT: control target
= control target key end

     0   :  { %v24_v0 = vlaneseq  ;;  %s240_s1 = inlined_call_operand.vmem [shape: f32[1,1024], index: 1, kind: input, shape index: {}]   ;;  %s241_s2 = inlined_call_operand.vmem [shape: f32[1,1024], index: 2, kind: input, shape index: {}]   ;;  %s242_s0 = inlined_call_operand.vmem [shape: f32[8,1024], index: 0, kind: input, shape index: {}]   ;;  %s243_s3 = inlined_call_operand.vmem [shape: bf16[8,1024], index: 3, kind: output, shape index: {}]  }
   0x1   :  { %v22_v2 = vld [vmem:[%s240_s1] sm:$0xff]  ;;  %v15_v9 = vld [vmem:[%s242_s0 + $0x8] sm:$0xff]  ;;  %v16_v18 = vld [vmem:[%s242_s0 + $0x10] sm:$0xff] }
   0x2   :  { %v25_v1 = vshrl.u32 %v24_v0, 7  ;;  %v72_v3 = vld [vmem:[%s241_s2] sm:$0xff]  ;;  %v17_v19 = vld [vmem:[%s242_s0 + $0x18] sm:$0xff]  ;;  %v19_v25 = vld [vmem:[%s242_s0 + $0x28] sm:$0xff] }
   0x3   :  { %v14_v8 = vld [vmem:[%s242_s0] sm:$0xff]  ;;  %v20_v38 = vld [vmem:[%s242_s0 + $0x30] sm:$0xff]  ;;  %v21_v39 = vld [vmem:[%s242_s0 + $0x38] sm:$0xff] }
   0x4   :  { %v26_v4 = vsub.s32 0, %v25_v1  ;;  %v30_v5 = vsub.s32 1, %v25_v1  ;;  %v34_v6 = vsub.s32 2, %v25_v1  ;;  %v38_v7 = vsub.s32 3, %v25_v1  ;;  %v18_v24 = vld [vmem:[%s242_s0 + $0x20] sm:$0xff] }
   0x5   :  { %v42_v10 = vsub.s32 4, %v25_v1  ;;  %v46_v11 = vsub.s32 5, %v25_v1  ;;  %v50_v12 = vsub.s32 6, %v25_v1  ;;  %v54_v13 = vsub.s32 7, %v25_v1 }
   0x6   :  { %v27_v14 = vrot.slane %v22_v2, %v26_v4  ;;  %v31_v15 = vrot.slane %v22_v2, %v30_v5  ;;  %v77_v16 = vrot.slane %v72_v3, %v26_v4  ;;  %v81_v17 = vrot.slane %v72_v3, %v30_v5 }
   0x7   :  { %v35_v20 = vrot.slane %v22_v2, %v34_v6  ;;  %v39_v21 = vrot.slane %v22_v2, %v38_v7  ;;  %v85_v22 = vrot.slane %v72_v3, %v34_v6  ;;  %v89_v23 = vrot.slane %v72_v3, %v38_v7 }
   0x8   :  { %v64_v26 = vmul.f32 %v27_v14, %v14_v8  ;;  %v65_v27 = vmul.f32 %v31_v15, %v15_v9  ;;  %v43_v28 = vrot.slane %v22_v2, %v42_v10  ;;  %v47_v29 = vrot.slane %v22_v2, %v46_v11 }
   0x9   :  { %v66_v30 = vmul.f32 %v35_v20, %v16_v18  ;;  %v67_v31 = vmul.f32 %v39_v21, %v17_v19  ;;  %v93_v32 = vrot.slane %v72_v3, %v42_v10  ;;  %v97_v33 = vrot.slane %v72_v3, %v46_v11 }
   0xa   :  { %v114_v34 = vadd.f32 %v77_v16, %v64_v26  ;;  %v115_v35 = vadd.f32 %v81_v17, %v65_v27  ;;  %v68_v36 = vmul.f32 %v43_v28, %v18_v24  ;;  %v69_v37 = vmul.f32 %v47_v29, %v19_v25 }
   0xb   :  { %v116_v40 = vadd.f32 %v85_v22, %v66_v30  ;;  %v117_v41 = vadd.f32 %v89_v23, %v67_v31  ;;  %v51_v42 = vrot.slane %v22_v2, %v50_v12  ;;  %v55_v43 = vrot.slane %v22_v2, %v54_v13 }
   0xc   :  { %v122_v44 = vmax.f32 %v114_v34, 0.0  ;;  %v123_v45 = vmax.f32 %v115_v35, 0.0  ;;  %v118_v46 = vadd.f32 %v93_v32, %v68_v36  ;;  %v119_v47 = vadd.f32 %v97_v33, %v69_v37 }
   0xd   :  { %v124_v48 = vmax.f32 %v116_v40, 0.0  ;;  %v125_v49 = vmax.f32 %v117_v41, 0.0  ;;  %v70_v50 = vmul.f32 %v51_v42, %v20_v38  ;;  %v71_v51 = vmul.f32 %v55_v43, %v21_v39 }
   0xe   :  { %v174_v52 = vpack.c.bf16 %v123_v45, %v122_v44  ;;  %v126_v53 = vmax.f32 %v118_v46, 0.0  ;;  %v127_v54 = vmax.f32 %v119_v47, 0.0  ;;  %v101_v55 = vrot.slane %v72_v3, %v50_v12 }
   0xf   :  { %v175_v56 = vpack.c.bf16 %v125_v49, %v124_v48  ;;  %v105_v57 = vrot.slane %v72_v3, %v54_v13 }
  0x10   :  { %162 = vst [vmem:[%s243_s3] sm:$0xff] %v174_v52  ;;  %v176_v58 = vpack.c.bf16 %v127_v54, %v126_v53  ;;  %v120_v59 = vadd.f32 %v101_v55, %v70_v50 }
  0x11   :  { %163 = vst [vmem:[%s243_s3 + $0x8] sm:$0xff] %v175_v56  ;;  %v121_v60 = vadd.f32 %v105_v57, %v71_v51 }
  0x12   :  { %164 = vst [vmem:[%s243_s3 + $0x10] sm:$0xff] %v176_v58  ;;  %v128_v61 = vmax.f32 %v120_v59, 0.0 }
  0x13   :  { %v129_v62 = vmax.f32 %v121_v60, 0.0 }
  0x15   :  { %v177_v63 = vpack.c.bf16 %v129_v62, %v128_v61 }
  0x17   :  { %165 = vst [vmem:[%s243_s3 + $0x18] sm:$0xff] %v177_v63 }

// kernel: generator_forward.9
= control target key start
LH: loop header
LB: loop body
LE: loop exit
PB: predicated region body
PF: predicated region fallthrough
CT: control target
= control target key end

     0   :  { %s720_s12 = smov 0   ;;  %s722_s13 = smov 0   ;;  %s795_s0 = inlined_call_operand.vmem [shape: bf16[1,8,16], index: 0, kind: input, shape index: {}]   ;;  %s796_s1 = inlined_call_operand.vmem [shape: bf16[1,16,1024], index: 1, kind: input, shape index: {}]   ;;  %s797_s2 = inlined_call_operand.vmem [shape: f32[1,8,1024], index: 2, kind: output, shape index: {0}]   ;;  %s798_s3 = inlined_call_operand.vmem [shape: f32[1,2,1024], index: 3, kind: output, shape index: {1}]  }
   0x1   :  { %s724_s14 = smov 0   ;;  %s726_s15 = smov 0  }
   0x2   :  { %s728_s16 = smov 0  }
   0x3 LB: > { %s26_s17 = sadd.s32 1, %s693_s15  ;;  %p77_p1 = scmp.ne.s32.totalorder %s685_s13, %s681_s12  ;;  %s697_s16 = sphi %s728_s16, %s14_s16   ;;  %s693_s15 = sphi %s726_s15, %s802_s15   ;;  %s689_s14 = sphi %s724_s14, %s801_s14   ;;  %s685_s13 = sphi %s722_s13, %s800_s13   ;;  %s681_s12 = sphi %s720_s12, %s799_s12  }
   0x4   : > { %p27_p0 = scmp.ge.s32.totalorder %s26_s17, 4  ;;  %p78_p2 = scmp.eq.s32.totalorder %s697_s16, 0 }
   0x5   : > { %s70_s19 = sadd.s32 1, %s685_s13  ;;  %p598_p5 = scmp.ge.s32.totalorder %s697_s16, 4 }
   0x6   : > { %s804_s17 = smov (%p27_p0, %s26_s17), 0  ;;  %p79_p3 = por %p78_p2, %p77_p1 }
   0x7   : > { %s66_s18 = ssub.s32 %s693_s15, %s804_s17  ;;  %173 = sbr.rel (%p598_p5) target bundleno = 21 (0x15), region = 20 }
   0x8   : > { %p68_p4 = scmp.eq.s32.totalorder %s66_s18, 0 }
   0xa   : > { %s755_s20 = scalar_select %p68_p4, %s685_s13, %s70_s19  }
   0xe   : > { %176 = sbr.rel (!%p79_p3) target bundleno = 21 (0x15), region = 24  ;;  %s178_s21 = sand.u32 (%p79_p3), 1, %s685_s13  }
   0xf   : > { %s614_s22 = sshll.u32 (%p79_p3), %s693_s15, 3  ;;  %s599_s23 = sshll.u32 (%p79_p3), %s178_s21, 4 }
  0x10   : > { %s185_s26 = scalar_lea.vmem (%p79_p3), %s796_s1, %s614_s22  ;;  %s180_s27 = scalar_lea.vmem (%p79_p3), [#allocation2], %s599_s23 }
  0x11   : > { %v215_v0 = vld [vmem:[%s185_s26] sm:$0xff] (%p79_p3) }
  0x12   : > { %v217_v1 = vld [vmem:[%s185_s26 + $0x20] sm:$0xff] (%p79_p3)  ;;  %216 = vst [vmem:[%s180_s27] sm:$0xff] (%p79_p3), %v215_v0 }
  0x13   : > { %218 = vst [vmem:[%s180_s27 + $0x8] sm:$0xff] (%p79_p3), %v217_v1 }
  0x15 PF: > { %p602_p6 = scmp.ge.s32.totalorder %s697_s16, 1  ;;  %p223_p7 = scmp.lt.s32.totalorder %s697_s16, 5 }
  0x17   : > { %p224_p8 = pnand %p602_p6, %p223_p7 }
  0x18   : > { %s230_s28 = sand.u32 (!%p224_p8), 1, %s681_s12   ;;  %v699_v2 = vmov (!%p224_p8), 0   ;;  %v313_v5 = vld [vmem:[%s795_s0] sm:$0xf] (!%p224_p8)  ;;  %vm326_vm0 = vcmask (!%p224_p8), 130048   ;;  %s604_s6 = sshll.u32 (!%p224_p8), %s689_s14, 1 }
  0x19   : > { %227 = sbr.rel (%p224_p8) target bundleno = 263 (0x107), region = 62  ;;  %s603_s29 = sshll.u32 (!%p224_p8), %s230_s28, 4  ;;  %362 = vmatprep.mubr.bf16.mxu0 (!%p224_p8), %v699_v2  ;;  %vm399_vm1 = vcmask (!%p224_p8), 1040384  }
  0x1a   : > { %s232_s30 = scalar_lea.vmem (!%p224_p8), [#allocation2], %s603_s29  ;;  %p291_p9 = scmp.lt.s32.totalorder (!%p224_p8), %s604_s6, 7 }
  0x1b   : > { %v656_v3 = vld [vmem:[%s232_s30 + $0x4] ss:$8 sps:$4 sm:$0xff] (!%p224_p8)   ;;  %v658_v4 = vld [vmem:[%s232_s30] ss:$8 sps:$4 sm:$0xff] (!%p224_p8)  }
  0x1c   : > { %330 = vmatprep.subr.bf16.mxu0 (!%p224_p8), %v656_v3 }
  0x1d   : > { %331 = vmatpush1.bf16.msra.mxu0 (!%p224_p8), %v658_v4 }
  0x20   : > { %610 = vmatmul.mubr.msk.bf16.vlgmr.msra.gmra.mrb[0].mxu0 %vm326_vm0, %v313_v5  ;;  %s806_s6 = smov (!%p291_p9, %s604_s6), 7 }
  0x21   : > { %s605_s7 = sshll.u32 %s806_s6, 3  ;;  %s607_s11 = sshll.u32 %s806_s6, 1 }
  0x22   : > { %s298_s10 = scalar_lea.vmem %s797_s2, %s605_s7  ;;  %s309_s18 = scalar_lea.vmem %s798_s3, %s607_s11 }
  0xf3   : > { %v364_v6 = vpop.f32.mrb[0].mxu0 }
  0xf4   : > { %371 = vst [vmem:[%s298_s10] sm:$0xff] %v364_v6  ;;  %v373_v7 = vrot.slane %v364_v6, 4  ;;  %v385_v8 = vmul.f32 %v364_v6, %v364_v6  ;;  %v366_v9 = vpop.f32.mrb[1].mxu0 }
  0xf5   : > { %372 = vst [vmem:[%s298_s10 + $0x8] sm:$0xff] %v366_v9  ;;  %v379_v10 = vrot.slane %v366_v9, 4  ;;  %v386_v11 = vmul.f32 %v366_v9, %v366_v9  ;;  %v368_v12 = vpop.f32.mrb[2].mxu0 }
  0xf6   : > { %v374_v13 = vadd.f32 %v373_v7, %v364_v6  ;;  %v387_v14 = vrot.slane %v385_v8, 4  ;;  %v369_v15 = vpop.f32.mrb[3].mxu0 }
  0xf7   : > { %v380_v16 = vadd.f32 %v379_v10, %v366_v9  ;;  %v393_v17 = vrot.slane %v386_v11, 4 }
  0xf8   : > { %v375_v18 = vrot.slane %v374_v13, 2  ;;  %v388_v19 = vadd.f32 %v387_v14, %v385_v8 }
  0xf9   : > { %v381_v20 = vrot.slane %v380_v16, 2  ;;  %v394_v21 = vadd.f32 %v393_v17, %v386_v11 }
  0xfa   : > { %v376_v22 = vadd.f32 %v375_v18, %v374_v13  ;;  %v389_v23 = vrot.slane %v388_v19, 2 }
  0xfb   : > { %v382_v24 = vadd.f32 %v381_v20, %v380_v16  ;;  %v395_v25 = vrot.slane %v394_v21, 2 }
  0xfc   : > { %v377_v26 = vrot.slane %v376_v22, 1  ;;  %v390_v27 = vadd.f32 %v389_v23, %v388_v19 }
  0xfd   : > { %v383_v28 = vrot.slane %v382_v24, 1  ;;  %v396_v29 = vadd.f32 %v395_v25, %v394_v21 }
  0xfe   : > { %v391_v30 = vrot.slane %v390_v27, 1  ;;  %v378_v32 = vadd.f32 %v377_v26, %v376_v22 }
  0xff   : > { %v397_v31 = vrot.slane %v396_v29, 1  ;;  %v384_v34 = vadd.f32 %v383_v28, %v382_v24 }
 0x100   : > { %v392_v33 = vadd.f32 %v391_v30, %v390_v27 }
 0x101   : > { %v398_v35 = vadd.f32 %v397_v31, %v396_v29 }
 0x102   : > { %v400_v36 = vsel %vm399_vm1, %v378_v32, %v392_v33 }
 0x103   : > { %v401_v37 = vsel %vm399_vm1, %v384_v34, %v398_v35 }
 0x104   : > { %v404_v38 = vcombine.low %v400_v36, %v401_v37 }
 0x106   : > { %611 = vst.sshfl [vmem:[%s309_s18] sm:$0x33 pattern:$0x76325410] %v404_v38 }
 0x107 PF: > { %s14_s16 = sadd.s32 1, %s697_s16   ;;  %s799_s12 = smov %s685_s13 }
 0x108   : > { %p11_p10 = scmp.ge.s32.totalorder %s14_s16, 6   ;;  %s800_s13 = smov %s755_s20 }
 0x109   : > { %s801_s14 = smov %s693_s15  ;;  %s802_s15 = smov %s804_s17 }
 0x10a   :  { %13 = sbr.rel (!%p11_p10) target bundleno = 3 (0x3), region = 116 }

// kernel: generator_forward.11
= control target key start
LH: loop header
LB: loop body
LE: loop exit
PB: predicated region body
PF: predicated region fallthrough
CT: control target
= control target key end

     0   :  { %s850_s12 = smov 0   ;;  %s852_s13 = smov 0   ;;  %s916_s0 = inlined_call_operand.vmem [shape: bf16[4,32,256], index: 0, kind: input, shape index: {}]   ;;  %s917_s1 = inlined_call_operand.vmem [shape: bf16[4,256,128], index: 1, kind: input, shape index: {}]   ;;  %s918_s2 = inlined_call_operand.vmem [shape: f32[4,32,128], index: 2, kind: output, shape index: {0}]   ;;  %s919_s3 = inlined_call_operand.vmem [shape: f32[4,2,128], index: 3, kind: output, shape index: {1}]  }
   0x1   :  { %s854_s14 = smov 0  }
   0x2 LB: > { %s33_s15 = sadd.s32 1, %s824_s13  ;;  %p683_p0 = scmp.ge.s32.totalorder %s828_s14, 1  ;;  %s828_s14 = sphi %s854_s14, %s14_s14   ;;  %s824_s13 = sphi %s852_s13, %s921_s13   ;;  %s820_s12 = sphi %s850_s12, %s920_s12  }
   0x3   : > { %p35_p1 = scmp.ge.s32.totalorder %s33_s15, 4  ;;  %p190_p2 = scmp.lt.s32.totalorder %s828_s14, 5 }
   0x5   : > { %s923_s15 = smov (%p35_p1, %s33_s15), 0  ;;  %p191_p3 = pnand %p683_p0, %p190_p2 }
   0x6   : > { %p243_p4 = scmp.lt.s32.totalorder (!%p191_p3), %s820_s12, 3  ;;  %vm511_vm0 = vcmask (!%p191_p3), 1040384  }
   0x7   : > { %194 = sbr.rel (%p191_p3) target bundleno = 289 (0x121), region = 28 }
   0xe   : > { %s925_s12 = smov (!%p243_p4, %s820_s12), 3 }
   0xf   : > { %s714_s16 = sshll.u32 %s925_s12, 7  ;;  %s713_s20 = sshll.u32 %s925_s12, 5 }
  0x10   : > { %s874_s19 = scalar_lea.vmem %s917_s1, %s714_s16  ;;  %s251_s23 = scalar_lea.vmem %s916_s0, %s713_s20 }
  0x11   : > { %v784_v0 = vld [vmem:[%s874_s19 + $0x40] sm:$0xff]   ;;  %v786_v2 = vld [vmem:[%s874_s19 + $0x48] sm:$0xff]   ;;  %v788_v4 = vld [vmem:[%s874_s19 + $0x50] sm:$0xff]   ;;  %s272_s26 = scalar_lea.vmem %s918_s2, %s713_s20  ;;  %s690_s27 = sshll.u32 %s925_s12, 1 }
  0x12   : > { %v785_v1 = vld [vmem:[%s874_s19] sm:$0xff]   ;;  %716 = vmatprep.subr.bf16.mxu0 %v784_v0  ;;  %744 = vmatprep.subr.bf16.mxu1 %v784_v0  ;;  %v787_v3 = vld [vmem:[%s874_s19 + $0x8] sm:$0xff]   ;;  %v789_v5 = vld [vmem:[%s874_s19 + $0x10] sm:$0xff]   ;;  %s281_s30 = scalar_lea.vmem %s919_s3, %s690_s27 }
  0x13   : > { %717 = vmatpush3.bf16.msra.mxu0 %v785_v1  ;;  %752 = vmatpush3.bf16.msra.mxu1 %v785_v1  ;;  %v790_v6 = vld [vmem:[%s874_s19 + $0x58] sm:$0xff]   ;;  %v792_v8 = vld [vmem:[%s874_s19 + $0x60] sm:$0xff]   ;;  %v794_v10 = vld [vmem:[%s874_s19 + $0x68] sm:$0xff]  }
  0x14   : > { %718 = vmatprep.subr.bf16.mxu0 %v786_v2  ;;  %745 = vmatprep.subr.bf16.mxu1 %v786_v2  ;;  %v791_v7 = vld [vmem:[%s874_s19 + $0x18] sm:$0xff]   ;;  %v793_v9 = vld [vmem:[%s874_s19 + $0x20] sm:$0xff]   ;;  %v795_v13 = vld [vmem:[%s874_s19 + $0x28] sm:$0xff]  }
  0x15   : > { %v802_v11 = vld [vmem:[%s251_s23 + $0x4] ss:$8 sps:$4 sm:$0xff]   ;;  %v805_v12 = vld [vmem:[%s251_s23 + $0x14] ss:$8 sps:$4 sm:$0xff]   ;;  %v800_v18 = vld [vmem:[%s251_s23] ss:$8 sps:$4 sm:$0xff]  }
  0x16   : > { %v796_v14 = vld [vmem:[%s874_s19 + $0x70] sm:$0xff]   ;;  %468 = vmatprep.mubr.bf16.mxu0 %v802_v11  ;;  %476 = vmatprep.mubr.bf16.mxu1 %v805_v12  ;;  %v798_v16 = vld [vmem:[%s874_s19 + $0x78] sm:$0xff]  }
  0x17   : > { %719 = vmatpush3.bf16.msra.mxu0 %v787_v3  ;;  %753 = vmatpush3.bf16.msra.mxu1 %v787_v3  ;;  %v797_v15 = vld [vmem:[%s874_s19 + $0x30] sm:$0xff]   ;;  %v799_v17 = vld [vmem:[%s874_s19 + $0x38] sm:$0xff]  }
  0x18   : > { %720 = vmatprep.subr.bf16.mxu0 %v788_v4  ;;  %746 = vmatprep.subr.bf16.mxu1 %v788_v4  ;;  %v803_v19 = vld [vmem:[%s251_s23 + $0x10] ss:$8 sps:$4 sm:$0xff]  }
  0x1b   : > { %721 = vmatpush3.bf16.msra.mxu0 %v789_v5  ;;  %754 = vmatpush3.bf16.msra.mxu1 %v789_v5 }
  0x1c   : > { %722 = vmatprep.subr.bf16.mxu0 %v790_v6  ;;  %747 = vmatprep.subr.bf16.mxu1 %v790_v6 }
  0x1f   : > { %723 = vmatpush3.bf16.msra.mxu0 %v791_v7  ;;  %755 = vmatpush3.bf16.msra.mxu1 %v791_v7 }
  0x20   : > { %724 = vmatprep.subr.bf16.mxu0 %v792_v8  ;;  %748 = vmatprep.subr.bf16.mxu1 %v792_v8 }
  0x23   : > { %725 = vmatpush3.bf16.msra.mxu0 %v793_v9  ;;  %756 = vmatpush3.bf16.msra.mxu1 %v793_v9 }
  0x24   : > { %726 = vmatprep.subr.bf16.mxu0 %v794_v10  ;;  %749 = vmatprep.subr.bf16.mxu1 %v794_v10 }
  0x27   : > { %727 = vmatpush3.bf16.msra.mxu0 %v795_v13  ;;  %757 = vmatpush3.bf16.msra.mxu1 %v795_v13 }
  0x28   : > { %728 = vmatprep.subr.bf16.mxu0 %v796_v14  ;;  %750 = vmatprep.subr.bf16.mxu1 %v796_v14 }
  0x2b   : > { %729 = vmatpush3.bf16.msra.mxu0 %v797_v15  ;;  %758 = vmatpush3.bf16.msra.mxu1 %v797_v15 }
  0x2c   : > { %730 = vmatprep.subr.bf16.mxu0 %v798_v16  ;;  %751 = vmatprep.subr.bf16.mxu1 %v798_v16 }
  0x2f   : > { %731 = vmatpush3.bf16.msra.mxu0 %v799_v17  ;;  %759 = vmatpush3.bf16.msra.mxu1 %v799_v17 }
  0x32   : > { %469 = vmatmul.mubr.bf16.vlgmr.msra.gmra.mrb[0].mxu0 %v800_v18  ;;  %477 = vmatmul.mubr.bf16.vlgmr.msra.gmra.mrb[0].mxu1 %v803_v19 }
 0x105   : > { %v732_v20 = vpop.f32.mrb[0].mxu0  ;;  %v738_v21 = vpop.f32.mrb[0].mxu1 }
 0x106   : > { %v733_v22 = vpop.f32.mrb[1].mxu0  ;;  %v739_v23 = vpop.f32.mrb[1].mxu1 }
 0x107   : > { %v734_v24 = vadd.f32 %v733_v22, %v732_v20  ;;  %v735_v25 = vpop.f32.mrb[2].mxu0  ;;  %v740_v26 = vadd.f32 %v739_v23, %v738_v21  ;;  %v741_v27 = vpop.f32.mrb[2].mxu1 }
 0x108   : > { %v736_v28 = vpop.f32.mrb[3].mxu0  ;;  %v742_v29 = vpop.f32.mrb[3].mxu1 }
 0x109   : > { %485 = vst [vmem:[%s272_s26] sm:$0xff] %v734_v24  ;;  %487 = vst [vmem:[%s272_s26 + $0x10] sm:$0xff] %v740_v26  ;;  %v737_v30 = vadd.f32 %v736_v28, %v735_v25  ;;  %v743_v31 = vadd.f32 %v742_v29, %v741_v27  ;;  %v498_v32 = vmul.f32 %v734_v24, %v734_v24 }
 0x10a   : > { %v500_v33 = vmul.f32 %v740_v26, %v740_v26 }
 0x10b   : > { %486 = vst [vmem:[%s272_s26 + $0x8] sm:$0xff] %v737_v30  ;;  %v489_v34 = vadd.f32 %v737_v30, %v734_v24  ;;  %v499_v35 = vmul.f32 %v737_v30, %v737_v30  ;;  %488 = vst [vmem:[%s272_s26 + $0x18] sm:$0xff] %v743_v31  ;;  %v501_v39 = vmul.f32 %v743_v31, %v743_v31 }
 0x10d   : > { %v502_v36 = vadd.f32 %v499_v35, %v498_v32  ;;  %v490_v37 = vadd.f32 %v740_v26, %v489_v34 }
 0x10f   : > { %v491_v38 = vadd.f32 %v743_v31, %v490_v37  ;;  %v503_v40 = vadd.f32 %v502_v36, %v500_v33 }
 0x111   : > { %v492_v41 = vrot.slane %v491_v38, 4  ;;  %v504_v42 = vadd.f32 %v503_v40, %v501_v39 }
 0x113   : > { %v493_v43 = vadd.f32 %v492_v41, %v491_v38  ;;  %v505_v44 = vrot.slane %v504_v42, 4 }
 0x115   : > { %v494_v45 = vrot.slane %v493_v43, 2  ;;  %v506_v46 = vadd.f32 %v505_v44, %v504_v42 }
 0x117   : > { %v495_v47 = vadd.f32 %v494_v45, %v493_v43  ;;  %v507_v48 = vrot.slane %v506_v46, 2 }
 0x119   : > { %v496_v49 = vrot.slane %v495_v47, 1  ;;  %v508_v50 = vadd.f32 %v507_v48, %v506_v46 }
 0x11b   : > { %v509_v51 = vrot.slane %v508_v50, 1  ;;  %v497_v52 = vadd.f32 %v496_v49, %v495_v47 }
 0x11d   : > { %v510_v53 = vadd.f32 %v509_v51, %v508_v50 }
 0x11f   : > { %v512_v54 = vsel %vm511_vm0, %v497_v52, %v510_v53 }
 0x120   : > { %513 = vst [vmem:[%s281_s30] sm:$0x3] %v512_v54 }
 0x121 PF: > { %s14_s14 = sadd.s32 1, %s828_s14   ;;  %s920_s12 = smov %s824_s13 }
 0x122   : > { %p11_p5 = scmp.ge.s32.totalorder %s14_s14, 6   ;;  %s921_s13 = smov %s923_s15 }
 0x124   :  { %13 = sbr.rel (!%p11_p5) target bundleno = 2 (0x2), region = 73 }

// kernel: generator_forward.12
= control target key start
LH: loop header
LB: loop body
LE: loop exit
PB: predicated region body
PF: predicated region fallthrough
CT: control target
= control target key end

     0   :  { %s391_s0 = inlined_call_operand.vmem [shape: f32[128,128], index: 0, kind: input, shape index: {}]   ;;  %s392_s1 = inlined_call_operand.vmem [shape: f32[1,128], index: 1, kind: input, shape index: {}]   ;;  %s393_s2 = inlined_call_operand.vmem [shape: f32[1,128], index: 2, kind: input, shape index: {}]   ;;  %s394_s3 = inlined_call_operand.vmem [shape: bf16[128,128], index: 3, kind: output, shape index: {}]  }
   0x1   :  { %v14_v0 = vld [vmem:[%s391_s0] sm:$0xff]  ;;  %v15_v1 = vld [vmem:[%s391_s0 + $0x8] sm:$0xff]  ;;  %v16_v6 = vld [vmem:[%s391_s0 + $0x10] sm:$0xff] }
   0x2   :  { %v286_v2 = vld [vmem:[%s392_s1] ss:$0 sm:$0xff]  ;;  %v17_v7 = vld [vmem:[%s391_s0 + $0x18] sm:$0xff]  ;;  %v19_v11 = vld [vmem:[%s391_s0 + $0x28] sm:$0xff] }
   0x3   :  { %v37_v3 = vmul.f32 %v286_v2, %v14_v0  ;;  %v38_v4 = vmul.f32 %v286_v2, %v15_v1  ;;  %v293_v5 = vld [vmem:[%s393_s2] ss:$0 sm:$0xff]  ;;  %v39_v8 = vmul.f32 %v286_v2, %v16_v6  ;;  %v40_v9 = vmul.f32 %v286_v2, %v17_v7  ;;  %v20_v12 = vld [vmem:[%s391_s0 + $0x30] sm:$0xff]  ;;  %v21_v17 = vld [vmem:[%s391_s0 + $0x38] sm:$0xff] }
   0x4   :  { %v18_v10 = vld [vmem:[%s391_s0 + $0x20] sm:$0xff]  ;;  %v42_v16 = vmul.f32 %v286_v2, %v19_v11  ;;  %v43_v20 = vmul.f32 %v286_v2, %v20_v12  ;;  %v44_v21 = vmul.f32 %v286_v2, %v21_v17  ;;  %v23_v27 = vld [vmem:[%s391_s0 + $0x48] sm:$0xff]  ;;  %v24_v32 = vld [vmem:[%s391_s0 + $0x50] sm:$0xff] }
   0x5   :  { %v60_v13 = vadd.f32 %v293_v5, %v37_v3  ;;  %v61_v14 = vadd.f32 %v293_v5, %v38_v4  ;;  %v41_v15 = vmul.f32 %v286_v2, %v18_v10  ;;  %v62_v18 = vadd.f32 %v293_v5, %v39_v8  ;;  %v22_v22 = vld [vmem:[%s391_s0 + $0x40] sm:$0xff]  ;;  %v25_v33 = vld [vmem:[%s391_s0 + $0x58] sm:$0xff]  ;;  %v27_v39 = vld [vmem:[%s391_s0 + $0x68] sm:$0xff] }
   0x6   :  { %v63_v19 = vadd.f32 %v293_v5, %v40_v9  ;;  %v65_v26 = vadd.f32 %v293_v5, %v42_v16  ;;  %v66_v30 = vadd.f32 %v293_v5, %v43_v20  ;;  %v67_v31 = vadd.f32 %v293_v5, %v44_v21  ;;  %v26_v38 = vld [vmem:[%s391_s0 + $0x60] sm:$0xff]  ;;  %v28_v44 = vld [vmem:[%s391_s0 + $0x70] sm:$0xff]  ;;  %v29_v49 = vld [vmem:[%s391_s0 + $0x78] sm:$0xff] }
   0x7   :  { %v76_v23 = vmax.f32 %v60_v13, 0.0  ;;  %v77_v24 = vmax.f32 %v61_v14, 0.0  ;;  %v64_v25 = vadd.f32 %v293_v5, %v41_v15  ;;  %v78_v28 = vmax.f32 %v62_v18, 0.0 }
   0x8   :  { %v79_v29 = vmax.f32 %v63_v19, 0.0  ;;  %v81_v36 = vmax.f32 %v65_v26, 0.0  ;;  %v45_v37 = vmul.f32 %v286_v2, %v22_v22  ;;  %v82_v41 = vmax.f32 %v66_v30, 0.0 }
   0x9   :  { %v213_v34 = vpack.c.bf16 %v77_v24, %v76_v23  ;;  %v80_v35 = vmax.f32 %v64_v25, 0.0  ;;  %v83_v42 = vmax.f32 %v67_v31, 0.0  ;;  %v46_v43 = vmul.f32 %v286_v2, %v23_v27 }
   0xa   :  { %v218_v40 = vpack.c.bf16 %v79_v29, %v78_v28  ;;  %v68_v46 = vadd.f32 %v293_v5, %v45_v37  ;;  %v47_v47 = vmul.f32 %v286_v2, %v24_v32  ;;  %v48_v48 = vmul.f32 %v286_v2, %v25_v33 }
   0xb   :  { %214 = vst [vmem:[%s394_s3] sm:$0xff] %v213_v34   ;;  %v223_v45 = vpack.c.bf16 %v81_v36, %v80_v35  ;;  %v228_v50 = vpack.c.bf16 %v83_v42, %v82_v41  ;;  %v69_v51 = vadd.f32 %v293_v5, %v46_v43  ;;  %v49_v52 = vmul.f32 %v286_v2, %v26_v38 }
   0xc   :  { %250 = vst [vmem:[%s394_s3 + $0x8] sm:$0xff] %v218_v40   ;;  %v50_v53 = vmul.f32 %v286_v2, %v27_v39  ;;  %v84_v54 = vmax.f32 %v68_v46, 0.0  ;;  %v70_v55 = vadd.f32 %v293_v5, %v47_v47  ;;  %v71_v56 = vadd.f32 %v293_v5, %v48_v48 }
   0xd   :  { %251 = vst [vmem:[%s394_s3 + $0x10] sm:$0xff] %v223_v45   ;;  %v51_v57 = vmul.f32 %v286_v2, %v28_v44  ;;  %252 = vst [vmem:[%s394_s3 + $0x18] sm:$0xff] %v228_v50   ;;  %v85_v58 = vmax.f32 %v69_v51, 0.0  ;;  %v72_v59 = vadd.f32 %v293_v5, %v49_v52  ;;  %v52_v61 = vmul.f32 %v286_v2, %v29_v49 }
   0xe   :  { %v73_v60 = vadd.f32 %v293_v5, %v50_v53  ;;  %v86_v62 = vmax.f32 %v70_v55, 0.0  ;;  %v87_v63 = vmax.f32 %v71_v56, 0.0 }
   0xf   :  { %v74_v0 = vadd.f32 %v293_v5, %v51_v57  ;;  %v233_v1 = vpack.c.bf16 %v85_v58, %v84_v54  ;;  %v88_v3 = vmax.f32 %v72_v59, 0.0  ;;  %v75_v6 = vadd.f32 %v293_v5, %v52_v61 }
  0x10   :  { %v89_v4 = vmax.f32 %v73_v60, 0.0  ;;  %v238_v7 = vpack.c.bf16 %v87_v63, %v86_v62 }
  0x11   :  { %v90_v8 = vmax.f32 %v74_v0, 0.0  ;;  %253 = vst [vmem:[%s394_s3 + $0x20] sm:$0xff] %v233_v1   ;;  %v91_v10 = vmax.f32 %v75_v6, 0.0 }
  0x12   :  { %v243_v9 = vpack.c.bf16 %v89_v4, %v88_v3  ;;  %254 = vst [vmem:[%s394_s3 + $0x28] sm:$0xff] %v238_v7  }
  0x13   :  { %v248_v2 = vpack.c.bf16 %v91_v10, %v90_v8 }
  0x14   :  { %255 = vst [vmem:[%s394_s3 + $0x30] sm:$0xff] %v243_v9  }
  0x15   :  { %256 = vst [vmem:[%s394_s3 + $0x38] sm:$0xff] %v248_v2  }

// kernel: generator_forward.13
= control target key start
LH: loop header
LB: loop body
LE: loop exit
PB: predicated region body
PF: predicated region fallthrough
CT: control target
= control target key end

     0   :  { %s926_s12 = smov 0   ;;  %s928_s13 = smov 0   ;;  %s1008_s0 = inlined_call_operand.vmem [shape: bf16[4,128,128], index: 0, kind: input, shape index: {}]   ;;  %s1009_s1 = inlined_call_operand.vmem [shape: bf16[4,128,128], index: 1, kind: input, shape index: {}]   ;;  %s1010_s2 = inlined_call_operand.vmem [shape: f32[4,128,128], index: 2, kind: output, shape index: {0}]   ;;  %s1011_s3 = inlined_call_operand.vmem [shape: f32[4,2,128], index: 3, kind: output, shape index: {1}]  }
   0x1   :  { %s930_s14 = smov 0  }
   0x2 LB: > { %s33_s15 = sadd.s32 1, %s900_s13  ;;  %p749_p0 = scmp.ge.s32.totalorder %s904_s14, 1  ;;  %s904_s14 = sphi %s930_s14, %s14_s14   ;;  %s900_s13 = sphi %s928_s13, %s1013_s13   ;;  %s896_s12 = sphi %s926_s12, %s1012_s12  }
   0x3   : > { %p35_p1 = scmp.ge.s32.totalorder %s33_s15, 4  ;;  %p189_p2 = scmp.lt.s32.totalorder %s904_s14, 5 }
   0x5   : > { %s1015_s15 = smov (%p35_p1, %s33_s15), 0  ;;  %p190_p3 = pnand %p749_p0, %p189_p2 }
   0x6   : > { %p241_p4 = scmp.lt.s32.totalorder (!%p190_p3), %s896_s12, 3  ;;  %vm580_vm0 = vcmask (!%p190_p3), 1040384  }
   0x7   : > { %193 = sbr.rel (%p190_p3) target bundleno = 311 (0x137), region = 28 }
   0xe   : > { %s1017_s12 = smov (!%p241_p4, %s896_s12), 3 }
   0xf   : > { %s775_s16 = sshll.u32 %s1017_s12, 6  ;;  %s777_s23 = sshll.u32 %s1017_s12, 7 }
  0x10   : > { %s950_s19 = scalar_lea.vmem %s1009_s1, %s775_s16  ;;  %s958_s22 = scalar_lea.vmem %s1008_s0, %s775_s16 }
  0x11   : > { %v866_v0 = vld [vmem:[%s950_s19] sm:$0xff]   ;;  %v867_v1 = vld [vmem:[%s950_s19 + $0x8] sm:$0xff]   ;;  %v868_v2 = vld [vmem:[%s950_s19 + $0x10] sm:$0xff]   ;;  %s977_s26 = scalar_lea.vmem %s1010_s2, %s777_s23  ;;  %s756_s27 = sshll.u32 %s1017_s12, 1 }
  0x12   : > { %794 = vmatprep.subr.bf16.mxu0 %v866_v0  ;;  %826 = vmatprep.subr.bf16.mxu1 %v866_v0  ;;  %v869_v3 = vld [vmem:[%s950_s19 + $0x18] sm:$0xff]   ;;  %v874_v4 = vld [vmem:[%s958_s22] sm:$0xff]   ;;  %v871_v7 = vld [vmem:[%s950_s19 + $0x28] sm:$0xff]   ;;  %s278_s30 = scalar_lea.vmem %s1011_s3, %s756_s27 }
  0x13   : > { %795 = vmatpush3.bf16.msra.mxu0 %v866_v0  ;;  %834 = vmatpush3.bf16.msra.mxu1 %v866_v0  ;;  %v870_v5 = vld [vmem:[%s950_s19 + $0x20] sm:$0xff]   ;;  %v872_v8 = vld [vmem:[%s950_s19 + $0x30] sm:$0xff]   ;;  %v873_v9 = vld [vmem:[%s950_s19 + $0x38] sm:$0xff]  }
  0x14   : > { %796 = vmatprep.subr.bf16.mxu0 %v867_v1  ;;  %827 = vmatprep.subr.bf16.mxu1 %v867_v1  ;;  %v878_v6 = vld [vmem:[%s958_s22 + $0x20] sm:$0xff]   ;;  %v875_v10 = vld [vmem:[%s958_s22 + $0x8] sm:$0xff]   ;;  %v876_v12 = vld [vmem:[%s958_s22 + $0x10] sm:$0xff]  }
  0x15   : > { %810 = vmatprep.mubr.bf16.mxu0 %v874_v4  ;;  %818 = vmatprep.mubr.bf16.mxu1 %v878_v6  ;;  %v879_v11 = vld [vmem:[%s958_s22 + $0x28] sm:$0xff]   ;;  %v880_v13 = vld [vmem:[%s958_s22 + $0x30] sm:$0xff]   ;;  %v877_v14 = vld [vmem:[%s958_s22 + $0x18] sm:$0xff]  }
  0x16   : > { %v881_v15 = vld [vmem:[%s958_s22 + $0x38] sm:$0xff]  }
  0x17   : > { %797 = vmatpush3.bf16.msra.mxu0 %v867_v1  ;;  %835 = vmatpush3.bf16.msra.mxu1 %v867_v1 }
  0x18   : > { %798 = vmatprep.subr.bf16.mxu0 %v868_v2  ;;  %828 = vmatprep.subr.bf16.mxu1 %v868_v2 }
  0x1b   : > { %799 = vmatpush3.bf16.msra.mxu0 %v868_v2  ;;  %836 = vmatpush3.bf16.msra.mxu1 %v868_v2 }
  0x1c   : > { %800 = vmatprep.subr.bf16.mxu0 %v869_v3  ;;  %829 = vmatprep.subr.bf16.mxu1 %v869_v3 }
  0x1f   : > { %801 = vmatpush3.bf16.msra.mxu0 %v869_v3  ;;  %837 = vmatpush3.bf16.msra.mxu1 %v869_v3 }
  0x20   : > { %802 = vmatprep.subr.bf16.mxu0 %v870_v5  ;;  %830 = vmatprep.subr.bf16.mxu1 %v870_v5 }
  0x23   : > { %803 = vmatpush3.bf16.msra.mxu0 %v870_v5  ;;  %838 = vmatpush3.bf16.msra.mxu1 %v870_v5 }
  0x24   : > { %804 = vmatprep.subr.bf16.mxu0 %v871_v7  ;;  %831 = vmatprep.subr.bf16.mxu1 %v871_v7 }
  0x27   : > { %805 = vmatpush3.bf16.msra.mxu0 %v871_v7  ;;  %839 = vmatpush3.bf16.msra.mxu1 %v871_v7 }
  0x28   : > { %806 = vmatprep.subr.bf16.mxu0 %v872_v8  ;;  %832 = vmatprep.subr.bf16.mxu1 %v872_v8 }
  0x2b   : > { %807 = vmatpush3.bf16.msra.mxu0 %v872_v8  ;;  %840 = vmatpush3.bf16.msra.mxu1 %v872_v8 }
  0x2c   : > { %808 = vmatprep.subr.bf16.mxu0 %v873_v9  ;;  %833 = vmatprep.subr.bf16.mxu1 %v873_v9 }
  0x2f   : > { %809 = vmatpush3.bf16.msra.mxu0 %v873_v9  ;;  %841 = vmatpush3.bf16.msra.mxu1 %v873_v9 }
  0x32   : > { %811 = vmatmul.mubr.bf16.vlgmr.msra.gmra.mrb[0].mxu0 %v875_v10  ;;  %819 = vmatmul.mubr.bf16.vlgmr.msra.gmra.mrb[0].mxu1 %v879_v11 }
  0x33   : > { %814 = vmatprep.mubr.bf16.mxu0 %v876_v12  ;;  %822 = vmatprep.mubr.bf16.mxu1 %v880_v13 }
  0x3a   : > { %815 = vmatmul.mubr.bf16.gmra.mrb[4].mxu0 %v877_v14  ;;  %823 = vmatmul.mubr.bf16.gmra.mrb[4].mxu1 %v881_v15 }
 0x105   : > { %v812_v16 = vpop.f32.mrb[0].mxu0  ;;  %v820_v17 = vpop.f32.mrb[0].mxu1 }
 0x106   : > { %508 = vst [vmem:[%s977_s26 + $0x10] sm:$0xff] %v812_v16  ;;  %v443_v18 = vpop.f32.mrb[1].mxu0  ;;  %516 = vst [vmem:[%s977_s26 + $0x50] sm:$0xff] %v820_v17  ;;  %v475_v19 = vpop.f32.mrb[1].mxu1  ;;  %v545_v27 = vmul.f32 %v812_v16, %v812_v16  ;;  %v553_v59 = vmul.f32 %v820_v17, %v820_v17 }
 0x107   : > { %506 = vst [vmem:[%s977_s26] sm:$0xff] %v443_v18  ;;  %v813_v20 = vpop.f32.mrb[2].mxu0  ;;  %514 = vst [vmem:[%s977_s26 + $0x40] sm:$0xff] %v475_v19  ;;  %v821_v21 = vpop.f32.mrb[2].mxu1  ;;  %v543_v24 = vmul.f32 %v443_v18, %v443_v18  ;;  %v551_v53 = vmul.f32 %v475_v19, %v475_v19 }
 0x108   : > { %509 = vst [vmem:[%s977_s26 + $0x18] sm:$0xff] %v813_v20  ;;  %v446_v22 = vpop.f32.mrb[3].mxu0  ;;  %517 = vst [vmem:[%s977_s26 + $0x58] sm:$0xff] %v821_v21  ;;  %v478_v23 = vpop.f32.mrb[3].mxu1  ;;  %v546_v30 = vmul.f32 %v813_v20, %v813_v20  ;;  %v554_v62 = vmul.f32 %v821_v21, %v821_v21 }
 0x109   : > { %507 = vst [vmem:[%s977_s26 + $0x8] sm:$0xff] %v446_v22  ;;  %v522_v25 = vadd.f32 %v446_v22, %v443_v18  ;;  %v544_v26 = vmul.f32 %v446_v22, %v446_v22  ;;  %515 = vst [vmem:[%s977_s26 + $0x48] sm:$0xff] %v478_v23  ;;  %v552_v58 = vmul.f32 %v478_v23, %v478_v23 }
 0x10b   : > { %v523_v28 = vadd.f32 %v812_v16, %v522_v25  ;;  %v559_v29 = vadd.f32 %v544_v26, %v543_v24 }
 0x10d   : > { %v560_v31 = vadd.f32 %v559_v29, %v545_v27  ;;  %v816_v32 = vpop.f32.mrb[4].mxu0  ;;  %v524_v33 = vadd.f32 %v813_v20, %v523_v28  ;;  %v824_v34 = vpop.f32.mrb[4].mxu1 }
 0x10e   : > { %512 = vst [vmem:[%s977_s26 + $0x30] sm:$0xff] %v816_v32  ;;  %v459_v35 = vpop.f32.mrb[5].mxu0  ;;  %520 = vst [vmem:[%s977_s26 + $0x70] sm:$0xff] %v824_v34  ;;  %v491_v36 = vpop.f32.mrb[5].mxu1  ;;  %v549_v47 = vmul.f32 %v816_v32, %v816_v32  ;;  %v557_v7 = vmul.f32 %v824_v34, %v824_v34 }
 0x10f   : > { %510 = vst [vmem:[%s977_s26 + $0x20] sm:$0xff] %v459_v35  ;;  %v525_v37 = vadd.f32 %v524_v33, %v459_v35  ;;  %v547_v38 = vmul.f32 %v459_v35, %v459_v35  ;;  %v561_v39 = vadd.f32 %v560_v31, %v546_v30  ;;  %v817_v40 = vpop.f32.mrb[6].mxu0  ;;  %518 = vst [vmem:[%s977_s26 + $0x60] sm:$0xff] %v491_v36  ;;  %v825_v41 = vpop.f32.mrb[6].mxu1 }
 0x110   : > { %513 = vst [vmem:[%s977_s26 + $0x38] sm:$0xff] %v817_v40  ;;  %v462_v42 = vpop.f32.mrb[7].mxu0  ;;  %521 = vst [vmem:[%s977_s26 + $0x78] sm:$0xff] %v825_v41  ;;  %v494_v43 = vpop.f32.mrb[7].mxu1  ;;  %v550_v50 = vmul.f32 %v817_v40, %v817_v40  ;;  %v555_v1 = vmul.f32 %v491_v36, %v491_v36  ;;  %v558_v10 = vmul.f32 %v825_v41, %v825_v41 }
 0x111   : > { %v562_v44 = vadd.f32 %v561_v39, %v547_v38  ;;  %511 = vst [vmem:[%s977_s26 + $0x28] sm:$0xff] %v462_v42  ;;  %v526_v45 = vadd.f32 %v525_v37, %v462_v42  ;;  %v548_v46 = vmul.f32 %v462_v42, %v462_v42  ;;  %519 = vst [vmem:[%s977_s26 + $0x68] sm:$0xff] %v494_v43 }
 0x112   : > { %v556_v6 = vmul.f32 %v494_v43, %v494_v43 }
 0x113   : > { %v527_v48 = vadd.f32 %v816_v32, %v526_v45  ;;  %v563_v49 = vadd.f32 %v562_v44, %v548_v46 }
 0x115   : > { %v564_v51 = vadd.f32 %v563_v49, %v549_v47  ;;  %v528_v52 = vadd.f32 %v817_v40, %v527_v48 }
 0x117   : > { %v529_v54 = vadd.f32 %v528_v52, %v475_v19  ;;  %v565_v55 = vadd.f32 %v564_v51, %v550_v50 }
 0x119   : > { %v566_v56 = vadd.f32 %v565_v55, %v551_v53  ;;  %v530_v57 = vadd.f32 %v529_v54, %v478_v23 }
 0x11b   : > { %v531_v60 = vadd.f32 %v820_v17, %v530_v57  ;;  %v567_v61 = vadd.f32 %v566_v56, %v552_v58 }
 0x11d   : > { %v568_v63 = vadd.f32 %v567_v61, %v553_v59  ;;  %v532_v0 = vadd.f32 %v821_v21, %v531_v60 }
 0x11f   : > { %v533_v2 = vadd.f32 %v532_v0, %v491_v36  ;;  %v569_v3 = vadd.f32 %v568_v63, %v554_v62 }
 0x121   : > { %v570_v4 = vadd.f32 %v569_v3, %v555_v1  ;;  %v534_v5 = vadd.f32 %v533_v2, %v494_v43 }
 0x123   : > { %v535_v8 = vadd.f32 %v824_v34, %v534_v5  ;;  %v571_v9 = vadd.f32 %v570_v4, %v556_v6 }
 0x125   : > { %v536_v11 = vadd.f32 %v825_v41, %v535_v8  ;;  %v572_v12 = vadd.f32 %v571_v9, %v557_v7 }
 0x127   : > { %v537_v13 = vrot.slane %v536_v11, 4  ;;  %v573_v14 = vadd.f32 %v572_v12, %v558_v10 }
 0x129   : > { %v538_v15 = vadd.f32 %v537_v13, %v536_v11  ;;  %v574_v16 = vrot.slane %v573_v14, 4 }
 0x12b   : > { %v539_v17 = vrot.slane %v538_v15, 2  ;;  %v575_v18 = vadd.f32 %v574_v16, %v573_v14 }
 0x12d   : > { %v540_v19 = vadd.f32 %v539_v17, %v538_v15  ;;  %v576_v20 = vrot.slane %v575_v18, 2 }
 0x12f   : > { %v541_v21 = vrot.slane %v540_v19, 1  ;;  %v577_v22 = vadd.f32 %v576_v20, %v575_v18 }
 0x131   : > { %v578_v23 = vrot.slane %v577_v22, 1  ;;  %v542_v24 = vadd.f32 %v541_v21, %v540_v19 }
 0x133   : > { %v579_v25 = vadd.f32 %v578_v23, %v577_v22 }
 0x135   : > { %v581_v26 = vsel %vm580_vm0, %v542_v24, %v579_v25 }
 0x136   : > { %582 = vst [vmem:[%s278_s30] sm:$0x3] %v581_v26 }
 0x137 PF: > { %s14_s14 = sadd.s32 1, %s904_s14   ;;  %s1012_s12 = smov %s900_s13 }
 0x138   : > { %p11_p5 = scmp.ge.s32.totalorder %s14_s14, 6   ;;  %s1013_s13 = smov %s1015_s15 }
 0x13a   :  { %13 = sbr.rel (!%p11_p5) target bundleno = 2 (0x2), region = 73 }

// kernel: generator_forward.14
= control target key start
LH: loop header
LB: loop body
LE: loop exit
PB: predicated region body
PF: predicated region fallthrough
CT: control target
= control target key end

     0   :  { %s1375_s0 = inlined_call_operand.vmem [shape: f32[512,128], index: 0, kind: input, shape index: {}]   ;;  %s1376_s1 = inlined_call_operand.vmem [shape: f32[1,128], index: 1, kind: input, shape index: {}]   ;;  %s1377_s2 = inlined_call_operand.vmem [shape: f32[1,128], index: 2, kind: input, shape index: {}]   ;;  %s1378_s3 = inlined_call_operand.vmem [shape: bf16[512,128], index: 3, kind: output, shape index: {}]  }
   0x1   :  { %v14_v0 = vld [vmem:[%s1375_s0] sm:$0xff]  ;;  %v15_v1 = vld [vmem:[%s1375_s0 + $0x8] sm:$0xff]  ;;  %v16_v6 = vld [vmem:[%s1375_s0 + $0x10] sm:$0xff] }
   0x2   :  { %v958_v2 = vld [vmem:[%s1376_s1] ss:$0 sm:$0xff]  ;;  %v17_v7 = vld [vmem:[%s1375_s0 + $0x18] sm:$0xff]  ;;  %v19_v11 = vld [vmem:[%s1375_s0 + $0x28] sm:$0xff] }
   0x3   :  { %v85_v3 = vmul.f32 %v958_v2, %v14_v0  ;;  %v86_v4 = vmul.f32 %v958_v2, %v15_v1  ;;  %v965_v5 = vld [vmem:[%s1377_s2] ss:$0 sm:$0xff]  ;;  %v87_v8 = vmul.f32 %v958_v2, %v16_v6  ;;  %v88_v9 = vmul.f32 %v958_v2, %v17_v7  ;;  %v20_v12 = vld [vmem:[%s1375_s0 + $0x30] sm:$0xff]  ;;  %v21_v17 = vld [vmem:[%s1375_s0 + $0x38] sm:$0xff] }
   0x4   :  { %v18_v10 = vld [vmem:[%s1375_s0 + $0x20] sm:$0xff]  ;;  %v90_v16 = vmul.f32 %v958_v2, %v19_v11  ;;  %v91_v20 = vmul.f32 %v958_v2, %v20_v12  ;;  %v92_v21 = vmul.f32 %v958_v2, %v21_v17  ;;  %v23_v27 = vld [vmem:[%s1375_s0 + $0x48] sm:$0xff]  ;;  %v24_v32 = vld [vmem:[%s1375_s0 + $0x50] sm:$0xff] }
   0x5   :  { %v156_v13 = vadd.f32 %v965_v5, %v85_v3  ;;  %v157_v14 = vadd.f32 %v965_v5, %v86_v4  ;;  %v89_v15 = vmul.f32 %v958_v2, %v18_v10  ;;  %v158_v18 = vadd.f32 %v965_v5, %v87_v8  ;;  %v22_v22 = vld [vmem:[%s1375_s0 + $0x40] sm:$0xff]  ;;  %v25_v33 = vld [vmem:[%s1375_s0 + $0x58] sm:$0xff]  ;;  %v27_v39 = vld [vmem:[%s1375_s0 + $0x68] sm:$0xff] }
   0x6   :  { %v159_v19 = vadd.f32 %v965_v5, %v88_v9  ;;  %v161_v26 = vadd.f32 %v965_v5, %v90_v16  ;;  %v162_v30 = vadd.f32 %v965_v5, %v91_v20  ;;  %v163_v31 = vadd.f32 %v965_v5, %v92_v21  ;;  %v26_v38 = vld [vmem:[%s1375_s0 + $0x60] sm:$0xff]  ;;  %v28_v44 = vld [vmem:[%s1375_s0 + $0x70] sm:$0xff]  ;;  %v29_v49 = vld [vmem:[%s1375_s0 + $0x78] sm:$0xff] }
   0x7   :  { %v220_v23 = vmax.f32 %v156_v13, 0.0  ;;  %v221_v24 = vmax.f32 %v157_v14, 0.0  ;;  %v160_v25 = vadd.f32 %v965_v5, %v89_v15  ;;  %v222_v28 = vmax.f32 %v158_v18, 0.0  ;;  %v30_v54 = vld [vmem:[%s1375_s0 + $0x80] sm:$0xff]  ;;  %v31_v63 = vld [vmem:[%s1375_s0 + $0x88] sm:$0xff]  ;;  %v32_v6 = vld [vmem:[%s1375_s0 + $0x90] sm:$0xff] }
   0x8   :  { %v223_v29 = vmax.f32 %v159_v19, 0.0  ;;  %v225_v36 = vmax.f32 %v161_v26, 0.0  ;;  %v93_v37 = vmul.f32 %v958_v2, %v22_v22  ;;  %v226_v41 = vmax.f32 %v162_v30, 0.0  ;;  %v33_v7 = vld [vmem:[%s1375_s0 + $0x98] sm:$0xff]  ;;  %v34_v12 = vld [vmem:[%s1375_s0 + $0xa0] sm:$0xff]  ;;  %v35_v13 = vld [vmem:[%s1375_s0 + $0xa8] sm:$0xff] }
   0x9   :  { %v741_v34 = vpack.c.bf16 %v221_v24, %v220_v23  ;;  %v224_v35 = vmax.f32 %v160_v25, 0.0  ;;  %v227_v42 = vmax.f32 %v163_v31, 0.0  ;;  %v94_v43 = vmul.f32 %v958_v2, %v23_v27  ;;  %v36_v18 = vld [vmem:[%s1375_s0 + $0xb0] sm:$0xff]  ;;  %v37_v23 = vld [vmem:[%s1375_s0 + $0xb8] sm:$0xff] }
   0xa   :  { %v746_v40 = vpack.c.bf16 %v223_v29, %v222_v28  ;;  %v164_v46 = vadd.f32 %v965_v5, %v93_v37  ;;  %v95_v47 = vmul.f32 %v958_v2, %v24_v32  ;;  %v96_v48 = vmul.f32 %v958_v2, %v25_v33  ;;  %v38_v28 = vld [vmem:[%s1375_s0 + $0xc0] sm:$0xff]  ;;  %v39_v37 = vld [vmem:[%s1375_s0 + $0xc8] sm:$0xff] }
   0xb   :  { %742 = vst [vmem:[%s1378_s3] sm:$0xff] %v741_v34   ;;  %v751_v45 = vpack.c.bf16 %v225_v36, %v224_v35  ;;  %v756_v50 = vpack.c.bf16 %v227_v42, %v226_v41  ;;  %v165_v51 = vadd.f32 %v965_v5, %v94_v43  ;;  %v97_v52 = vmul.f32 %v958_v2, %v26_v38  ;;  %v40_v42 = vld [vmem:[%s1375_s0 + $0xd0] sm:$0xff]  ;;  %v41_v43 = vld [vmem:[%s1375_s0 + $0xd8] sm:$0xff] }
   0xc   :  { %898 = vst [vmem:[%s1378_s3 + $0x8] sm:$0xff] %v746_v40   ;;  %v98_v53 = vmul.f32 %v958_v2, %v27_v39  ;;  %v228_v55 = vmax.f32 %v164_v46, 0.0  ;;  %v166_v56 = vadd.f32 %v965_v5, %v95_v47  ;;  %v167_v57 = vadd.f32 %v965_v5, %v96_v48  ;;  %v42_v48 = vld [vmem:[%s1375_s0 + $0xe0] sm:$0xff] }
   0xd   :  { %899 = vst [vmem:[%s1378_s3 + $0x10] sm:$0xff] %v751_v45   ;;  %v99_v58 = vmul.f32 %v958_v2, %v28_v44  ;;  %900 = vst [vmem:[%s1378_s3 + $0x18] sm:$0xff] %v756_v50   ;;  %v229_v59 = vmax.f32 %v165_v51, 0.0  ;;  %v168_v60 = vadd.f32 %v965_v5, %v97_v52  ;;  %v100_v62 = vmul.f32 %v958_v2, %v29_v49  ;;  %v43_v49 = vld [vmem:[%s1375_s0 + $0xe8] sm:$0xff] }
   0xe   :  { %v169_v61 = vadd.f32 %v965_v5, %v98_v53  ;;  %v230_v0 = vmax.f32 %v166_v56, 0.0  ;;  %v231_v1 = vmax.f32 %v167_v57, 0.0  ;;  %v101_v4 = vmul.f32 %v958_v2, %v30_v54  ;;  %v44_v54 = vld [vmem:[%s1375_s0 + $0xf0] sm:$0xff] }
   0xf   :  { %v170_v3 = vadd.f32 %v965_v5, %v99_v58  ;;  %v761_v8 = vpack.c.bf16 %v229_v59, %v228_v55  ;;  %v232_v9 = vmax.f32 %v168_v60, 0.0  ;;  %v171_v11 = vadd.f32 %v965_v5, %v100_v62  ;;  %v45_v59 = vld [vmem:[%s1375_s0 + $0xf8] sm:$0xff] }
  0x10   :  { %v233_v10 = vmax.f32 %v169_v61, 0.0  ;;  %v766_v14 = vpack.c.bf16 %v231_v1, %v230_v0  ;;  %v102_v16 = vmul.f32 %v958_v2, %v31_v63  ;;  %v172_v17 = vadd.f32 %v965_v5, %v101_v4  ;;  %v46_v0 = vld [vmem:[%s1375_s0 + $0x100] sm:$0xff] }
  0x11   :  { %v234_v15 = vmax.f32 %v170_v3, 0.0  ;;  %901 = vst [vmem:[%s1378_s3 + $0x20] sm:$0xff] %v761_v8   ;;  %v235_v20 = vmax.f32 %v171_v11, 0.0  ;;  %v103_v21 = vmul.f32 %v958_v2, %v32_v6  ;;  %v104_v22 = vmul.f32 %v958_v2, %v33_v7  ;;  %v47_v11 = vld [vmem:[%s1375_s0 + $0x108] sm:$0xff] }
  0x12   :  { %v771_v19 = vpack.c.bf16 %v233_v10, %v232_v9  ;;  %902 = vst [vmem:[%s1378_s3 + $0x28] sm:$0xff] %v766_v14   ;;  %v173_v24 = vadd.f32 %v965_v5, %v102_v16  ;;  %v236_v25 = vmax.f32 %v172_v17, 0.0  ;;  %v105_v26 = vmul.f32 %v958_v2, %v34_v12  ;;  %v48_v16 = vld [vmem:[%s1375_s0 + $0x110] sm:$0xff]  ;;  %v49_v17 = vld [vmem:[%s1375_s0 + $0x118] sm:$0xff] }
  0x13   :  { %v106_v27 = vmul.f32 %v958_v2, %v35_v13  ;;  %v776_v29 = vpack.c.bf16 %v235_v20, %v234_v15  ;;  %v174_v30 = vadd.f32 %v965_v5, %v103_v21  ;;  %v175_v31 = vadd.f32 %v965_v5, %v104_v22  ;;  %v50_v22 = vld [vmem:[%s1375_s0 + $0x120] sm:$0xff] }
  0x14   :  { %903 = vst [vmem:[%s1378_s3 + $0x30] sm:$0xff] %v771_v19   ;;  %v107_v32 = vmul.f32 %v958_v2, %v36_v18  ;;  %v237_v33 = vmax.f32 %v173_v24, 0.0  ;;  %v176_v34 = vadd.f32 %v965_v5, %v105_v26  ;;  %v108_v36 = vmul.f32 %v958_v2, %v37_v23  ;;  %v51_v23 = vld [vmem:[%s1375_s0 + $0x128] sm:$0xff] }
  0x15   :  { %v177_v35 = vadd.f32 %v965_v5, %v106_v27  ;;  %904 = vst [vmem:[%s1378_s3 + $0x38] sm:$0xff] %v776_v29   ;;  %v238_v38 = vmax.f32 %v174_v30, 0.0  ;;  %v239_v39 = vmax.f32 %v175_v31, 0.0  ;;  %v109_v41 = vmul.f32 %v958_v2, %v38_v28  ;;  %v52_v28 = vld [vmem:[%s1375_s0 + $0x130] sm:$0xff] }
  0x16   :  { %v178_v40 = vadd.f32 %v965_v5, %v107_v32  ;;  %v781_v44 = vpack.c.bf16 %v237_v33, %v236_v25  ;;  %v240_v45 = vmax.f32 %v176_v34, 0.0  ;;  %v179_v47 = vadd.f32 %v965_v5, %v108_v36  ;;  %v53_v33 = vld [vmem:[%s1375_s0 + $0x138] sm:$0xff] }
  0x17   :  { %v241_v46 = vmax.f32 %v177_v35, 0.0  ;;  %v786_v50 = vpack.c.bf16 %v239_v39, %v238_v38  ;;  %v110_v52 = vmul.f32 %v958_v2, %v39_v37  ;;  %v180_v53 = vadd.f32 %v965_v5, %v109_v41  ;;  %v54_v38 = vld [vmem:[%s1375_s0 + $0x140] sm:$0xff] }
  0x18   :  { %v242_v51 = vmax.f32 %v178_v40, 0.0  ;;  %905 = vst [vmem:[%s1378_s3 + $0x40] sm:$0xff] %v781_v44   ;;  %v243_v56 = vmax.f32 %v179_v47, 0.0  ;;  %v111_v57 = vmul.f32 %v958_v2, %v40_v42  ;;  %v112_v58 = vmul.f32 %v958_v2, %v41_v43  ;;  %v55_v47 = vld [vmem:[%s1375_s0 + $0x148] sm:$0xff] }
  0x19   :  { %v791_v55 = vpack.c.bf16 %v241_v46, %v240_v45  ;;  %906 = vst [vmem:[%s1378_s3 + $0x48] sm:$0xff] %v786_v50   ;;  %v181_v60 = vadd.f32 %v965_v5, %v110_v52  ;;  %v244_v61 = vmax.f32 %v180_v53, 0.0  ;;  %v113_v62 = vmul.f32 %v958_v2, %v42_v48  ;;  %v56_v52 = vld [vmem:[%s1375_s0 + $0x150] sm:$0xff]  ;;  %v57_v53 = vld [vmem:[%s1375_s0 + $0x158] sm:$0xff] }
  0x1a   :  { %v114_v63 = vmul.f32 %v958_v2, %v43_v49  ;;  %v796_v1 = vpack.c.bf16 %v243_v56, %v242_v51  ;;  %v182_v3 = vadd.f32 %v965_v5, %v111_v57  ;;  %v183_v4 = vadd.f32 %v965_v5, %v112_v58  ;;  %v58_v58 = vld [vmem:[%s1375_s0 + $0x160] sm:$0xff] }
  0x1b   :  { %907 = vst [vmem:[%s1378_s3 + $0x50] sm:$0xff] %v791_v55   ;;  %v115_v6 = vmul.f32 %v958_v2, %v44_v54  ;;  %v245_v7 = vmax.f32 %v181_v60, 0.0  ;;  %v184_v8 = vadd.f32 %v965_v5, %v113_v62  ;;  %v116_v10 = vmul.f32 %v958_v2, %v45_v59  ;;  %v59_v59 = vld [vmem:[%s1375_s0 + $0x168] sm:$0xff] }
  0x1c   :  { %v185_v9 = vadd.f32 %v965_v5, %v114_v63  ;;  %908 = vst [vmem:[%s1378_s3 + $0x58] sm:$0xff] %v796_v1   ;;  %v246_v12 = vmax.f32 %v182_v3, 0.0  ;;  %v247_v13 = vmax.f32 %v183_v4, 0.0  ;;  %v117_v15 = vmul.f32 %v958_v2, %v46_v0  ;;  %v60_v0 = vld [vmem:[%s1375_s0 + $0x170] sm:$0xff] }
  0x1d   :  { %v186_v14 = vadd.f32 %v965_v5, %v115_v6  ;;  %v801_v18 = vpack.c.bf16 %v245_v7, %v244_v61  ;;  %v248_v19 = vmax.f32 %v184_v8, 0.0  ;;  %v187_v21 = vadd.f32 %v965_v5, %v116_v10  ;;  %v61_v7 = vld [vmem:[%s1375_s0 + $0x178] sm:$0xff] }
  0x1e   :  { %v249_v20 = vmax.f32 %v185_v9, 0.0  ;;  %v806_v24 = vpack.c.bf16 %v247_v13, %v246_v12  ;;  %v118_v26 = vmul.f32 %v958_v2, %v47_v11  ;;  %v188_v27 = vadd.f32 %v965_v5, %v117_v15  ;;  %v62_v12 = vld [vmem:[%s1375_s0 + $0x180] sm:$0xff] }
  0x1f   :  { %v250_v25 = vmax.f32 %v186_v14, 0.0  ;;  %909 = vst [vmem:[%s1378_s3 + $0x60] sm:$0xff] %v801_v18   ;;  %v251_v30 = vmax.f32 %v187_v21, 0.0  ;;  %v119_v31 = vmul.f32 %v958_v2, %v48_v16  ;;  %v120_v32 = vmul.f32 %v958_v2, %v49_v17  ;;  %v63_v21 = vld [vmem:[%s1375_s0 + $0x188] sm:$0xff] }
  0x20   :  { %v811_v29 = vpack.c.bf16 %v249_v20, %v248_v19  ;;  %910 = vst [vmem:[%s1378_s3 + $0x68] sm:$0xff] %v806_v24   ;;  %v189_v34 = vadd.f32 %v965_v5, %v118_v26  ;;  %v252_v35 = vmax.f32 %v188_v27, 0.0  ;;  %v121_v36 = vmul.f32 %v958_v2, %v50_v22  ;;  %v64_v26 = vld [vmem:[%s1375_s0 + $0x190] sm:$0xff]  ;;  %v65_v27 = vld [vmem:[%s1375_s0 + $0x198] sm:$0xff] }
  0x21   :  { %v122_v37 = vmul.f32 %v958_v2, %v51_v23  ;;  %v816_v39 = vpack.c.bf16 %v251_v30, %v250_v25  ;;  %v190_v40 = vadd.f32 %v965_v5, %v119_v31  ;;  %v191_v41 = vadd.f32 %v965_v5, %v120_v32  ;;  %v66_v32 = vld [vmem:[%s1375_s0 + $0x1a0] sm:$0xff] }
  0x22   :  { %911 = vst [vmem:[%s1378_s3 + $0x70] sm:$0xff] %v811_v29   ;;  %v123_v42 = vmul.f32 %v958_v2, %v52_v28  ;;  %v253_v43 = vmax.f32 %v189_v34, 0.0  ;;  %v192_v44 = vadd.f32 %v965_v5, %v121_v36  ;;  %v124_v46 = vmul.f32 %v958_v2, %v53_v33  ;;  %v67_v33 = vld [vmem:[%s1375_s0 + $0x1a8] sm:$0xff] }
  0x23   :  { %v193_v45 = vadd.f32 %v965_v5, %v122_v37  ;;  %912 = vst [vmem:[%s1378_s3 + $0x78] sm:$0xff] %v816_v39   ;;  %v254_v48 = vmax.f32 %v190_v40, 0.0  ;;  %v255_v49 = vmax.f32 %v191_v41, 0.0  ;;  %v125_v51 = vmul.f32 %v958_v2, %v54_v38  ;;  %v68_v38 = vld [vmem:[%s1375_s0 + $0x1b0] sm:$0xff] }
  0x24   :  { %v194_v50 = vadd.f32 %v965_v5, %v123_v42  ;;  %v821_v54 = vpack.c.bf16 %v253_v43, %v252_v35  ;;  %v256_v55 = vmax.f32 %v192_v44, 0.0  ;;  %v195_v57 = vadd.f32 %v965_v5, %v124_v46  ;;  %v69_v43 = vld [vmem:[%s1375_s0 + $0x1b8] sm:$0xff] }
  0x25   :  { %v257_v56 = vmax.f32 %v193_v45, 0.0  ;;  %v826_v60 = vpack.c.bf16 %v255_v49, %v254_v48  ;;  %v126_v62 = vmul.f32 %v958_v2, %v55_v47  ;;  %v196_v63 = vadd.f32 %v965_v5, %v125_v51  ;;  %v70_v48 = vld [vmem:[%s1375_s0 + $0x1c0] sm:$0xff] }
  0x26   :  { %v258_v61 = vmax.f32 %v194_v50, 0.0  ;;  %913 = vst [vmem:[%s1378_s3 + $0x80] sm:$0xff] %v821_v54   ;;  %v259_v3 = vmax.f32 %v195_v57, 0.0  ;;  %v127_v4 = vmul.f32 %v958_v2, %v56_v52  ;;  %v128_v6 = vmul.f32 %v958_v2, %v57_v53  ;;  %v71_v57 = vld [vmem:[%s1375_s0 + $0x1c8] sm:$0xff] }
  0x27   :  { %v831_v1 = vpack.c.bf16 %v257_v56, %v256_v55  ;;  %914 = vst [vmem:[%s1378_s3 + $0x88] sm:$0xff] %v826_v60   ;;  %v197_v8 = vadd.f32 %v965_v5, %v126_v62  ;;  %v260_v9 = vmax.f32 %v196_v63, 0.0  ;;  %v129_v10 = vmul.f32 %v958_v2, %v58_v58  ;;  %v72_v62 = vld [vmem:[%s1375_s0 + $0x1d0] sm:$0xff]  ;;  %v73_v63 = vld [vmem:[%s1375_s0 + $0x1d8] sm:$0xff] }
  0x28   :  { %v130_v11 = vmul.f32 %v958_v2, %v59_v59  ;;  %v836_v13 = vpack.c.bf16 %v259_v3, %v258_v61  ;;  %v198_v14 = vadd.f32 %v965_v5, %v127_v4  ;;  %v199_v15 = vadd.f32 %v965_v5, %v128_v6  ;;  %v74_v6 = vld [vmem:[%s1375_s0 + $0x1e0] sm:$0xff] }
  0x29   :  { %915 = vst [vmem:[%s1378_s3 + $0x90] sm:$0xff] %v831_v1   ;;  %v131_v16 = vmul.f32 %v958_v2, %v60_v0  ;;  %v261_v17 = vmax.f32 %v197_v8, 0.0  ;;  %v200_v18 = vadd.f32 %v965_v5, %v129_v10  ;;  %v132_v20 = vmul.f32 %v958_v2, %v61_v7  ;;  %v75_v7 = vld [vmem:[%s1375_s0 + $0x1e8] sm:$0xff] }
  0x2a   :  { %v201_v19 = vadd.f32 %v965_v5, %v130_v11  ;;  %916 = vst [vmem:[%s1378_s3 + $0x98] sm:$0xff] %v836_v13   ;;  %v262_v22 = vmax.f32 %v198_v14, 0.0  ;;  %v263_v23 = vmax.f32 %v199_v15, 0.0  ;;  %v133_v25 = vmul.f32 %v958_v2, %v62_v12  ;;  %v76_v12 = vld [vmem:[%s1375_s0 + $0x1f0] sm:$0xff] }
  0x2b   :  { %v202_v24 = vadd.f32 %v965_v5, %v131_v16  ;;  %v841_v28 = vpack.c.bf16 %v261_v17, %v260_v9  ;;  %v264_v29 = vmax.f32 %v200_v18, 0.0  ;;  %v203_v31 = vadd.f32 %v965_v5, %v132_v20  ;;  %v77_v17 = vld [vmem:[%s1375_s0 + $0x1f8] sm:$0xff] }
  0x2c   :  { %v265_v30 = vmax.f32 %v201_v19, 0.0  ;;  %v846_v34 = vpack.c.bf16 %v263_v23, %v262_v22  ;;  %v134_v36 = vmul.f32 %v958_v2, %v63_v21  ;;  %v204_v37 = vadd.f32 %v965_v5, %v133_v25 }
  0x2d   :  { %v266_v35 = vmax.f32 %v202_v24, 0.0  ;;  %917 = vst [vmem:[%s1378_s3 + $0xa0] sm:$0xff] %v841_v28   ;;  %v267_v40 = vmax.f32 %v203_v31, 0.0  ;;  %v135_v41 = vmul.f32 %v958_v2, %v64_v26  ;;  %v136_v42 = vmul.f32 %v958_v2, %v65_v27 }
  0x2e   :  { %v851_v39 = vpack.c.bf16 %v265_v30, %v264_v29  ;;  %918 = vst [vmem:[%s1378_s3 + $0xa8] sm:$0xff] %v846_v34   ;;  %v205_v44 = vadd.f32 %v965_v5, %v134_v36  ;;  %v268_v45 = vmax.f32 %v204_v37, 0.0  ;;  %v137_v46 = vmul.f32 %v958_v2, %v66_v32 }
  0x2f   :  { %v138_v47 = vmul.f32 %v958_v2, %v67_v33  ;;  %v856_v49 = vpack.c.bf16 %v267_v40, %v266_v35  ;;  %v206_v50 = vadd.f32 %v965_v5, %v135_v41  ;;  %v207_v51 = vadd.f32 %v965_v5, %v136_v42 }
  0x30   :  { %919 = vst [vmem:[%s1378_s3 + $0xb0] sm:$0xff] %v851_v39   ;;  %v139_v52 = vmul.f32 %v958_v2, %v68_v38  ;;  %v269_v53 = vmax.f32 %v205_v44, 0.0  ;;  %v208_v54 = vadd.f32 %v965_v5, %v137_v46  ;;  %v140_v56 = vmul.f32 %v958_v2, %v69_v43 }
  0x31   :  { %v209_v55 = vadd.f32 %v965_v5, %v138_v47  ;;  %920 = vst [vmem:[%s1378_s3 + $0xb8] sm:$0xff] %v856_v49   ;;  %v270_v58 = vmax.f32 %v206_v50, 0.0  ;;  %v271_v59 = vmax.f32 %v207_v51, 0.0  ;;  %v141_v61 = vmul.f32 %v958_v2, %v70_v48 }
  0x32   :  { %v210_v60 = vadd.f32 %v965_v5, %v139_v52  ;;  %v861_v0 = vpack.c.bf16 %v269_v53, %v268_v45  ;;  %v272_v1 = vmax.f32 %v208_v54, 0.0  ;;  %v211_v4 = vadd.f32 %v965_v5, %v140_v56 }
  0x33   :  { %v273_v3 = vmax.f32 %v209_v55, 0.0  ;;  %v866_v8 = vpack.c.bf16 %v271_v59, %v270_v58  ;;  %v142_v10 = vmul.f32 %v958_v2, %v71_v57  ;;  %v212_v11 = vadd.f32 %v965_v5, %v141_v61 }
  0x34   :  { %v274_v9 = vmax.f32 %v210_v60, 0.0  ;;  %921 = vst [vmem:[%s1378_s3 + $0xc0] sm:$0xff] %v861_v0   ;;  %v275_v14 = vmax.f32 %v211_v4, 0.0  ;;  %v143_v15 = vmul.f32 %v958_v2, %v72_v62  ;;  %v144_v16 = vmul.f32 %v958_v2, %v73_v63 }
  0x35   :  { %v871_v13 = vpack.c.bf16 %v273_v3, %v272_v1  ;;  %922 = vst [vmem:[%s1378_s3 + $0xc8] sm:$0xff] %v866_v8   ;;  %v213_v18 = vadd.f32 %v965_v5, %v142_v10  ;;  %v276_v19 = vmax.f32 %v212_v11, 0.0  ;;  %v145_v20 = vmul.f32 %v958_v2, %v74_v6 }
  0x36   :  { %v146_v21 = vmul.f32 %v958_v2, %v75_v7  ;;  %v876_v22 = vpack.c.bf16 %v275_v14, %v274_v9  ;;  %v214_v23 = vadd.f32 %v965_v5, %v143_v15  ;;  %v215_v24 = vadd.f32 %v965_v5, %v144_v16 }
  0x37   :  { %923 = vst [vmem:[%s1378_s3 + $0xd0] sm:$0xff] %v871_v13   ;;  %v147_v25 = vmul.f32 %v958_v2, %v76_v12  ;;  %v277_v26 = vmax.f32 %v213_v18, 0.0  ;;  %v216_v27 = vadd.f32 %v965_v5, %v145_v20  ;;  %v148_v29 = vmul.f32 %v958_v2, %v77_v17 }
  0x38   :  { %v217_v28 = vadd.f32 %v965_v5, %v146_v21  ;;  %924 = vst [vmem:[%s1378_s3 + $0xd8] sm:$0xff] %v876_v22   ;;  %v278_v30 = vmax.f32 %v214_v23, 0.0  ;;  %v279_v31 = vmax.f32 %v215_v24, 0.0 }
  0x39   :  { %v218_v32 = vadd.f32 %v965_v5, %v147_v25  ;;  %v881_v33 = vpack.c.bf16 %v277_v26, %v276_v19  ;;  %v280_v34 = vmax.f32 %v216_v27, 0.0  ;;  %v219_v36 = vadd.f32 %v965_v5, %v148_v29 }
  0x3a   :  { %v281_v35 = vmax.f32 %v217_v28, 0.0  ;;  %v886_v37 = vpack.c.bf16 %v279_v31, %v278_v30 }
  0x3b   :  { %v282_v38 = vmax.f32 %v218_v32, 0.0  ;;  %925 = vst [vmem:[%s1378_s3 + $0xe0] sm:$0xff] %v881_v33   ;;  %v283_v39 = vmax.f32 %v219_v36, 0.0 }
  0x3c   :  { %v891_v2 = vpack.c.bf16 %v281_v35, %v280_v34  ;;  %926 = vst [vmem:[%s1378_s3 + $0xe8] sm:$0xff] %v886_v37  }
  0x3d   :  { %v896_v40 = vpack.c.bf16 %v283_v39, %v282_v38 }
  0x3e   :  { %927 = vst [vmem:[%s1378_s3 + $0xf0] sm:$0xff] %v891_v2  }
  0x3f   :  { %928 = vst [vmem:[%s1378_s3 + $0xf8] sm:$0xff] %v896_v40  }

// kernel: generator_forward.15
= control target key start
LH: loop header
LB: loop body
LE: loop exit
PB: predicated region body
PF: predicated region fallthrough
CT: control target
= control target key end

     0   :  { %s1659_s12 = smov 0   ;;  %s1661_s13 = smov 0   ;;  %s2028_s0 = inlined_call_operand.vmem [shape: bf16[4,512,64], index: 0, kind: input, shape index: {}]   ;;  %s2029_s1 = inlined_call_operand.vmem [shape: bf16[4,64,128], index: 1, kind: input, shape index: {}]   ;;  %s2030_s2 = inlined_call_operand.vmem [shape: f32[4,512,128], index: 2, kind: output, shape index: {0}]   ;;  %s2031_s3 = inlined_call_operand.vmem [shape: f32[4,2,128], index: 3, kind: output, shape index: {1}]  }
   0x1   :  { %s1663_s14 = smov 0  }
   0x2 LB: > { %s33_s15 = sadd.s32 1, %s1633_s13  ;;  %p1358_p0 = scmp.ge.s32.totalorder %s1637_s14, 1  ;;  %s1637_s14 = sphi %s1663_s14, %s14_s14   ;;  %s1633_s13 = sphi %s1661_s13, %s2033_s13   ;;  %s1629_s12 = sphi %s1659_s12, %s2032_s12  }
   0x3   : > { %p35_p1 = scmp.ge.s32.totalorder %s33_s15, 4  ;;  %p189_p2 = scmp.lt.s32.totalorder %s1637_s14, 5 }
   0x5   : > { %s2035_s15 = smov (%p35_p1, %s33_s15), 0  ;;  %p190_p3 = pnand %p1358_p0, %p189_p2 }
   0x6   : > { %p241_p4 = scmp.lt.s32.totalorder (!%p190_p3), %s1629_s12, 3  ;;  %vm537_vm0 = vcmask (!%p190_p3), 523264   ;;  %vm1189_vm1 = vcmask (!%p190_p3), 1040384  }
   0x7   : > { %193 = sbr.rel (%p190_p3) target bundleno = 391 (0x187), region = 28 }
   0xe   : > { %s2037_s12 = smov (!%p241_p4, %s1629_s12), 3 }
   0xf   : > { %s1436_s16 = sshll.u32 %s2037_s12, 8  ;;  %s1437_s17 = sshll.u32 %s2037_s12, 5 }
  0x10   : > { %s257_s20 = scalar_lea.vmem %s2029_s1, %s1437_s17  ;;  %s1687_s23 = scalar_lea.vmem %s2028_s0, %s1436_s16 }
  0x11   : > { %v1579_v0 = vld [vmem:[%s257_s20] sm:$0xff]   ;;  %v1580_v1 = vld [vmem:[%s257_s20 + $0x8] sm:$0xff]   ;;  %v1581_v2 = vld [vmem:[%s257_s20 + $0x10] sm:$0xff]   ;;  %s1438_s24 = sshll.u32 %s2037_s12, 9  ;;  %s1365_s28 = sshll.u32 %s2037_s12, 1 }
  0x12   : > { %1475 = vmatprep.subr.bf16.mxu0 %v1579_v0  ;;  %1547 = vmatprep.subr.bf16.mxu1 %v1579_v0  ;;  %v1583_v3 = vld [vmem:[%s1687_s23] sm:$0xff]   ;;  %v1582_v4 = vld [vmem:[%s257_s20 + $0x18] sm:$0xff]   ;;  %v1584_v5 = vld [vmem:[%s1687_s23 + $0x8] sm:$0xff]   ;;  %s1757_s27 = scalar_lea.vmem %s2030_s2, %s1438_s24  ;;  %s278_s4 = scalar_lea.vmem %s2031_s3, %s1365_s28 }
  0x13   : > { %1476 = vmatpush3.bf16.msra.mxu0 %v1579_v0  ;;  %1551 = vmatpush3.bf16.msra.mxu1 %v1579_v0  ;;  %v1585_v6 = vld [vmem:[%s1687_s23 + $0x10] sm:$0xff]   ;;  %v1586_v7 = vld [vmem:[%s1687_s23 + $0x18] sm:$0xff]   ;;  %v1599_v8 = vld [vmem:[%s1687_s23 + $0x80] sm:$0xff]  }
  0x14   : > { %1477 = vmatprep.subr.bf16.mxu0 %v1580_v1  ;;  %1548 = vmatprep.subr.bf16.mxu1 %v1580_v1  ;;  %v1600_v9 = vld [vmem:[%s1687_s23 + $0x88] sm:$0xff]   ;;  %v1601_v10 = vld [vmem:[%s1687_s23 + $0x90] sm:$0xff]   ;;  %v1587_v11 = vld [vmem:[%s1687_s23 + $0x20] sm:$0xff]  }
  0x15   : > { %1483 = vmatprep.mubr.msk.bf16.mxu0 %vm537_vm0, %v1583_v3  ;;  %1515 = vmatprep.mubr.msk.bf16.mxu1 %vm537_vm0, %v1599_v8  ;;  %v1602_v12 = vld [vmem:[%s1687_s23 + $0x98] sm:$0xff]   ;;  %v1603_v13 = vld [vmem:[%s1687_s23 + $0xa0] sm:$0xff]   ;;  %v1588_v14 = vld [vmem:[%s1687_s23 + $0x28] sm:$0xff]  }
  0x16   : > { %v1589_v15 = vld [vmem:[%s1687_s23 + $0x30] sm:$0xff]   ;;  %v1604_v16 = vld [vmem:[%s1687_s23 + $0xa8] sm:$0xff]   ;;  %v1590_v18 = vld [vmem:[%s1687_s23 + $0x38] sm:$0xff]  }
  0x17   : > { %1478 = vmatpush3.bf16.msra.mxu0 %v1580_v1  ;;  %1552 = vmatpush3.bf16.msra.mxu1 %v1580_v1  ;;  %v1605_v17 = vld [vmem:[%s1687_s23 + $0xb0] sm:$0xff]   ;;  %v1591_v19 = vld [vmem:[%s1687_s23 + $0x40] sm:$0xff]   ;;  %v1606_v20 = vld [vmem:[%s1687_s23 + $0xb8] sm:$0xff]  }
  0x18   : > { %1479 = vmatprep.subr.bf16.mxu0 %v1581_v2  ;;  %1549 = vmatprep.subr.bf16.mxu1 %v1581_v2  ;;  %v1607_v21 = vld [vmem:[%s1687_s23 + $0xc0] sm:$0xff]   ;;  %v1592_v22 = vld [vmem:[%s1687_s23 + $0x48] sm:$0xff]   ;;  %v1593_v23 = vld [vmem:[%s1687_s23 + $0x50] sm:$0xff]  }
  0x19   : > { %v1608_v24 = vld [vmem:[%s1687_s23 + $0xc8] sm:$0xff]   ;;  %v1609_v25 = vld [vmem:[%s1687_s23 + $0xd0] sm:$0xff]   ;;  %v1594_v26 = vld [vmem:[%s1687_s23 + $0x58] sm:$0xff]  }
  0x1a   : > { %v1595_v27 = vld [vmem:[%s1687_s23 + $0x60] sm:$0xff]   ;;  %v1610_v28 = vld [vmem:[%s1687_s23 + $0xd8] sm:$0xff]   ;;  %v1596_v30 = vld [vmem:[%s1687_s23 + $0x68] sm:$0xff]  }
  0x1b   : > { %1480 = vmatpush3.bf16.msra.mxu0 %v1581_v2  ;;  %1553 = vmatpush3.bf16.msra.mxu1 %v1581_v2  ;;  %v1611_v29 = vld [vmem:[%s1687_s23 + $0xe0] sm:$0xff]   ;;  %v1597_v31 = vld [vmem:[%s1687_s23 + $0x70] sm:$0xff]   ;;  %v1612_v32 = vld [vmem:[%s1687_s23 + $0xe8] sm:$0xff]  }
  0x1c   : > { %1481 = vmatprep.subr.bf16.mxu0 %v1582_v4  ;;  %1550 = vmatprep.subr.bf16.mxu1 %v1582_v4  ;;  %v1613_v33 = vld [vmem:[%s1687_s23 + $0xf0] sm:$0xff]   ;;  %v1598_v34 = vld [vmem:[%s1687_s23 + $0x78] sm:$0xff]  }
  0x1d   : > { %v1614_v35 = vld [vmem:[%s1687_s23 + $0xf8] sm:$0xff]  }
  0x1f   : > { %1482 = vmatpush3.bf16.msra.mxu0 %v1582_v4  ;;  %1554 = vmatpush3.bf16.msra.mxu1 %v1582_v4 }
  0x22   : > { %1484 = vmatmul.mubr.msk.bf16.vlgmr.msra.gmra.mrb[0].mxu0 %vm537_vm0, %v1584_v5  ;;  %1516 = vmatmul.mubr.msk.bf16.vlgmr.msra.gmra.mrb[0].mxu1 %vm537_vm0, %v1600_v9 }
  0x23   : > { %1487 = vmatprep.mubr.msk.bf16.mxu0 %vm537_vm0, %v1585_v6  ;;  %1519 = vmatprep.mubr.msk.bf16.mxu1 %vm537_vm0, %v1601_v10 }
  0x2a   : > { %1488 = vmatmul.mubr.msk.bf16.gmra.mrb[4].mxu0 %vm537_vm0, %v1586_v7  ;;  %1520 = vmatmul.mubr.msk.bf16.gmra.mrb[4].mxu1 %vm537_vm0, %v1602_v12 }
  0x2b   : > { %1491 = vmatprep.mubr.msk.bf16.mxu0 %vm537_vm0, %v1587_v11  ;;  %1523 = vmatprep.mubr.msk.bf16.mxu1 %vm537_vm0, %v1603_v13 }
  0x32   : > { %1492 = vmatmul.mubr.msk.bf16.gmra.mrb[8].mxu0 %vm537_vm0, %v1588_v14  ;;  %1524 = vmatmul.mubr.msk.bf16.gmra.mrb[8].mxu1 %vm537_vm0, %v1604_v16 }
  0x33   : > { %1495 = vmatprep.mubr.msk.bf16.mxu0 %vm537_vm0, %v1589_v15  ;;  %1527 = vmatprep.mubr.msk.bf16.mxu1 %vm537_vm0, %v1605_v17 }
  0x3a   : > { %1496 = vmatmul.mubr.msk.bf16.gmra.mrb[12].mxu0 %vm537_vm0, %v1590_v18  ;;  %1528 = vmatmul.mubr.msk.bf16.gmra.mrb[12].mxu1 %vm537_vm0, %v1606_v20 }
  0x3b   : > { %1499 = vmatprep.mubr.msk.bf16.mxu0 %vm537_vm0, %v1591_v19  ;;  %1531 = vmatprep.mubr.msk.bf16.mxu1 %vm537_vm0, %v1607_v21 }
  0x42   : > { %1500 = vmatmul.mubr.msk.bf16.gmra.mrb[16].mxu0 %vm537_vm0, %v1592_v22  ;;  %1532 = vmatmul.mubr.msk.bf16.gmra.mrb[16].mxu1 %vm537_vm0, %v1608_v24 }
  0x43   : > { %1503 = vmatprep.mubr.msk.bf16.mxu0 %vm537_vm0, %v1593_v23  ;;  %1535 = vmatprep.mubr.msk.bf16.mxu1 %vm537_vm0, %v1609_v25 }
  0x4a   : > { %1504 = vmatmul.mubr.msk.bf16.gmra.mrb[20].mxu0 %vm537_vm0, %v1594_v26  ;;  %1536 = vmatmul.mubr.msk.bf16.gmra.mrb[20].mxu1 %vm537_vm0, %v1610_v28 }
  0x4b   : > { %1507 = vmatprep.mubr.msk.bf16.mxu0 %vm537_vm0, %v1595_v27  ;;  %1539 = vmatprep.mubr.msk.bf16.mxu1 %vm537_vm0, %v1611_v29 }
  0x52   : > { %1508 = vmatmul.mubr.msk.bf16.gmra.mrb[24].mxu0 %vm537_vm0, %v1596_v30  ;;  %1540 = vmatmul.mubr.msk.bf16.gmra.mrb[24].mxu1 %vm537_vm0, %v1612_v32 }
  0x53   : > { %1511 = vmatprep.mubr.msk.bf16.mxu0 %vm537_vm0, %v1597_v31  ;;  %1543 = vmatprep.mubr.msk.bf16.mxu1 %vm537_vm0, %v1613_v33 }
  0x5a   : > { %1512 = vmatmul.mubr.msk.bf16.gmra.mrb[28].mxu0 %vm537_vm0, %v1598_v34  ;;  %1544 = vmatmul.mubr.msk.bf16.gmra.mrb[28].mxu1 %vm537_vm0, %v1614_v35 }
  0xf5   : > { %v1485_v36 = vpop.f32.mrb[0].mxu0  ;;  %v1763_v43 = vpop.f32.mrb[0].mxu1 }
  0xf6   : > { %925 = vst [vmem:[%s1757_s27 + $0x10] sm:$0xff] %v1485_v36  ;;  %v668_v37 = vpop.f32.mrb[1].mxu0  ;;  %v1058_v44 = vmul.f32 %v1485_v36, %v1485_v36  ;;  %957 = vst [vmem:[%s1757_s27 + $0x110] sm:$0xff] %v1763_v43  ;;  %v1767_v47 = vpop.f32.mrb[1].mxu1 }
  0xf7   : > { %923 = vst [vmem:[%s1757_s27] sm:$0xff] %v668_v37  ;;  %v1486_v38 = vpop.f32.mrb[2].mxu0  ;;  %v1056_v40 = vmul.f32 %v668_v37, %v668_v37  ;;  %955 = vst [vmem:[%s1757_s27 + $0x100] sm:$0xff] %v1767_v47  ;;  %v1771_v48 = vpop.f32.mrb[2].mxu1 }
  0xf8   : > { %926 = vst [vmem:[%s1757_s27 + $0x18] sm:$0xff] %v1486_v38  ;;  %v671_v39 = vpop.f32.mrb[3].mxu0  ;;  %v1059_v49 = vmul.f32 %v1486_v38, %v1486_v38  ;;  %958 = vst [vmem:[%s1757_s27 + $0x118] sm:$0xff] %v1771_v48  ;;  %v1775_v53 = vpop.f32.mrb[3].mxu1 }
  0xf9   : > { %924 = vst [vmem:[%s1757_s27 + $0x8] sm:$0xff] %v671_v39  ;;  %v987_v41 = vadd.f32 %v671_v39, %v668_v37  ;;  %v1057_v42 = vmul.f32 %v671_v39, %v671_v39  ;;  %956 = vst [vmem:[%s1757_s27 + $0x108] sm:$0xff] %v1775_v53 }
  0xfb   : > { %v988_v45 = vadd.f32 %v1485_v36, %v987_v41  ;;  %v1120_v46 = vadd.f32 %v1057_v42, %v1056_v40 }
  0xfd   : > { %v1121_v50 = vadd.f32 %v1120_v46, %v1058_v44  ;;  %v1489_v51 = vpop.f32.mrb[4].mxu0  ;;  %v989_v52 = vadd.f32 %v1486_v38, %v988_v45  ;;  %v1783_v63 = vpop.f32.mrb[4].mxu1 }
  0xfe   : > { %929 = vst [vmem:[%s1757_s27 + $0x30] sm:$0xff] %v1489_v51  ;;  %v684_v54 = vpop.f32.mrb[5].mxu0  ;;  %v1062_v0 = vmul.f32 %v1489_v51, %v1489_v51  ;;  %961 = vst [vmem:[%s1757_s27 + $0x130] sm:$0xff] %v1783_v63  ;;  %v1787_v3 = vpop.f32.mrb[5].mxu1 }
  0xff   : > { %927 = vst [vmem:[%s1757_s27 + $0x20] sm:$0xff] %v684_v54  ;;  %v990_v55 = vadd.f32 %v989_v52, %v684_v54  ;;  %v1060_v56 = vmul.f32 %v684_v54, %v684_v54  ;;  %v1122_v57 = vadd.f32 %v1121_v50, %v1059_v49  ;;  %v1490_v58 = vpop.f32.mrb[6].mxu0  ;;  %959 = vst [vmem:[%s1757_s27 + $0x120] sm:$0xff] %v1787_v3  ;;  %v1791_v4 = vpop.f32.mrb[6].mxu1 }
 0x100   : > { %930 = vst [vmem:[%s1757_s27 + $0x38] sm:$0xff] %v1490_v58  ;;  %v687_v59 = vpop.f32.mrb[7].mxu0  ;;  %v1063_v5 = vmul.f32 %v1490_v58, %v1490_v58  ;;  %962 = vst [vmem:[%s1757_s27 + $0x138] sm:$0xff] %v1791_v4  ;;  %v1795_v9 = vpop.f32.mrb[7].mxu1 }
 0x101   : > { %v1123_v60 = vadd.f32 %v1122_v57, %v1060_v56  ;;  %928 = vst [vmem:[%s1757_s27 + $0x28] sm:$0xff] %v687_v59  ;;  %v991_v61 = vadd.f32 %v990_v55, %v687_v59  ;;  %v1061_v62 = vmul.f32 %v687_v59, %v687_v59  ;;  %960 = vst [vmem:[%s1757_s27 + $0x128] sm:$0xff] %v1795_v9 }
 0x103   : > { %v992_v1 = vadd.f32 %v1489_v51, %v991_v61  ;;  %v1124_v2 = vadd.f32 %v1123_v60, %v1061_v62 }
 0x105   : > { %v1125_v6 = vadd.f32 %v1124_v2, %v1062_v0  ;;  %v1493_v7 = vpop.f32.mrb[8].mxu0  ;;  %v993_v8 = vadd.f32 %v1490_v58, %v992_v1  ;;  %v1803_v19 = vpop.f32.mrb[8].mxu1 }
 0x106   : > { %933 = vst [vmem:[%s1757_s27 + $0x50] sm:$0xff] %v1493_v7  ;;  %v700_v10 = vpop.f32.mrb[9].mxu0  ;;  %v1066_v20 = vmul.f32 %v1493_v7, %v1493_v7  ;;  %965 = vst [vmem:[%s1757_s27 + $0x150] sm:$0xff] %v1803_v19  ;;  %v1807_v23 = vpop.f32.mrb[9].mxu1 }
 0x107   : > { %931 = vst [vmem:[%s1757_s27 + $0x40] sm:$0xff] %v700_v10  ;;  %v994_v11 = vadd.f32 %v993_v8, %v700_v10  ;;  %v1064_v12 = vmul.f32 %v700_v10, %v700_v10  ;;  %v1126_v13 = vadd.f32 %v1125_v6, %v1063_v5  ;;  %v1494_v14 = vpop.f32.mrb[10].mxu0  ;;  %963 = vst [vmem:[%s1757_s27 + $0x140] sm:$0xff] %v1807_v23  ;;  %v1811_v24 = vpop.f32.mrb[10].mxu1 }
 0x108   : > { %934 = vst [vmem:[%s1757_s27 + $0x58] sm:$0xff] %v1494_v14  ;;  %v703_v15 = vpop.f32.mrb[11].mxu0  ;;  %v1067_v25 = vmul.f32 %v1494_v14, %v1494_v14  ;;  %966 = vst [vmem:[%s1757_s27 + $0x158] sm:$0xff] %v1811_v24  ;;  %v1815_v29 = vpop.f32.mrb[11].mxu1 }
 0x109   : > { %v1127_v16 = vadd.f32 %v1126_v13, %v1064_v12  ;;  %932 = vst [vmem:[%s1757_s27 + $0x48] sm:$0xff] %v703_v15  ;;  %v995_v17 = vadd.f32 %v994_v11, %v703_v15  ;;  %v1065_v18 = vmul.f32 %v703_v15, %v703_v15  ;;  %964 = vst [vmem:[%s1757_s27 + $0x148] sm:$0xff] %v1815_v29 }
 0x10b   : > { %v996_v21 = vadd.f32 %v1493_v7, %v995_v17  ;;  %v1128_v22 = vadd.f32 %v1127_v16, %v1065_v18 }
 0x10d   : > { %v1129_v26 = vadd.f32 %v1128_v22, %v1066_v20  ;;  %v1497_v27 = vpop.f32.mrb[12].mxu0  ;;  %v997_v28 = vadd.f32 %v1494_v14, %v996_v21  ;;  %v1823_v39 = vpop.f32.mrb[12].mxu1 }
 0x10e   : > { %937 = vst [vmem:[%s1757_s27 + $0x70] sm:$0xff] %v1497_v27  ;;  %v716_v30 = vpop.f32.mrb[13].mxu0  ;;  %v1070_v40 = vmul.f32 %v1497_v27, %v1497_v27  ;;  %969 = vst [vmem:[%s1757_s27 + $0x170] sm:$0xff] %v1823_v39  ;;  %v1827_v44 = vpop.f32.mrb[13].mxu1 }
 0x10f   : > { %935 = vst [vmem:[%s1757_s27 + $0x60] sm:$0xff] %v716_v30  ;;  %v998_v31 = vadd.f32 %v997_v28, %v716_v30  ;;  %v1068_v32 = vmul.f32 %v716_v30, %v716_v30  ;;  %v1130_v33 = vadd.f32 %v1129_v26, %v1067_v25  ;;  %v1498_v34 = vpop.f32.mrb[14].mxu0  ;;  %967 = vst [vmem:[%s1757_s27 + $0x160] sm:$0xff] %v1827_v44  ;;  %v1831_v45 = vpop.f32.mrb[14].mxu1 }
 0x110   : > { %938 = vst [vmem:[%s1757_s27 + $0x78] sm:$0xff] %v1498_v34  ;;  %v719_v35 = vpop.f32.mrb[15].mxu0  ;;  %v1071_v46 = vmul.f32 %v1498_v34, %v1498_v34  ;;  %970 = vst [vmem:[%s1757_s27 + $0x178] sm:$0xff] %v1831_v45  ;;  %v1835_v52 = vpop.f32.mrb[15].mxu1 }
 0x111   : > { %v1131_v36 = vadd.f32 %v1130_v33, %v1068_v32  ;;  %936 = vst [vmem:[%s1757_s27 + $0x68] sm:$0xff] %v719_v35  ;;  %v999_v37 = vadd.f32 %v998_v31, %v719_v35  ;;  %v1069_v38 = vmul.f32 %v719_v35, %v719_v35  ;;  %968 = vst [vmem:[%s1757_s27 + $0x168] sm:$0xff] %v1835_v52 }
 0x113   : > { %v1000_v41 = vadd.f32 %v1497_v27, %v999_v37  ;;  %v1132_v42 = vadd.f32 %v1131_v36, %v1069_v38 }
 0x115   : > { %v1133_v49 = vadd.f32 %v1132_v42, %v1070_v40  ;;  %v1501_v50 = vpop.f32.mrb[16].mxu0  ;;  %v1001_v51 = vadd.f32 %v1498_v34, %v1000_v41  ;;  %v1843_v0 = vpop.f32.mrb[16].mxu1 }
 0x116   : > { %941 = vst [vmem:[%s1757_s27 + $0x90] sm:$0xff] %v1501_v50  ;;  %v732_v54 = vpop.f32.mrb[17].mxu0  ;;  %v1074_v1 = vmul.f32 %v1501_v50, %v1501_v50  ;;  %973 = vst [vmem:[%s1757_s27 + $0x190] sm:$0xff] %v1843_v0  ;;  %v1847_v6 = vpop.f32.mrb[17].mxu1 }
 0x117   : > { %939 = vst [vmem:[%s1757_s27 + $0x80] sm:$0xff] %v732_v54  ;;  %v1002_v55 = vadd.f32 %v1001_v51, %v732_v54  ;;  %v1072_v56 = vmul.f32 %v732_v54, %v732_v54  ;;  %v1134_v57 = vadd.f32 %v1133_v49, %v1071_v46  ;;  %v1502_v58 = vpop.f32.mrb[18].mxu0  ;;  %971 = vst [vmem:[%s1757_s27 + $0x180] sm:$0xff] %v1847_v6  ;;  %v1851_v7 = vpop.f32.mrb[18].mxu1 }
 0x118   : > { %942 = vst [vmem:[%s1757_s27 + $0x98] sm:$0xff] %v1502_v58  ;;  %v735_v59 = vpop.f32.mrb[19].mxu0  ;;  %v1075_v8 = vmul.f32 %v1502_v58, %v1502_v58  ;;  %974 = vst [vmem:[%s1757_s27 + $0x198] sm:$0xff] %v1851_v7  ;;  %v1855_v13 = vpop.f32.mrb[19].mxu1 }
 0x119   : > { %v1135_v60 = vadd.f32 %v1134_v57, %v1072_v56  ;;  %940 = vst [vmem:[%s1757_s27 + $0x88] sm:$0xff] %v735_v59  ;;  %v1003_v61 = vadd.f32 %v1002_v55, %v735_v59  ;;  %v1073_v62 = vmul.f32 %v735_v59, %v735_v59  ;;  %972 = vst [vmem:[%s1757_s27 + $0x188] sm:$0xff] %v1855_v13 }
 0x11b   : > { %v1004_v2 = vadd.f32 %v1501_v50, %v1003_v61  ;;  %v1136_v5 = vadd.f32 %v1135_v60, %v1073_v62 }
 0x11d   : > { %v1137_v10 = vadd.f32 %v1136_v5, %v1074_v1  ;;  %v1505_v11 = vpop.f32.mrb[20].mxu0  ;;  %v1005_v12 = vadd.f32 %v1502_v58, %v1004_v2  ;;  %v1863_v26 = vpop.f32.mrb[20].mxu1 }
 0x11e   : > { %945 = vst [vmem:[%s1757_s27 + $0xb0] sm:$0xff] %v1505_v11  ;;  %v748_v14 = vpop.f32.mrb[21].mxu0  ;;  %v1078_v27 = vmul.f32 %v1505_v11, %v1505_v11  ;;  %977 = vst [vmem:[%s1757_s27 + $0x1b0] sm:$0xff] %v1863_v26  ;;  %v1867_v31 = vpop.f32.mrb[21].mxu1 }
 0x11f   : > { %943 = vst [vmem:[%s1757_s27 + $0xa0] sm:$0xff] %v748_v14  ;;  %v1006_v15 = vadd.f32 %v1005_v12, %v748_v14  ;;  %v1076_v16 = vmul.f32 %v748_v14, %v748_v14  ;;  %v1138_v17 = vadd.f32 %v1137_v10, %v1075_v8  ;;  %v1506_v18 = vpop.f32.mrb[22].mxu0  ;;  %975 = vst [vmem:[%s1757_s27 + $0x1a0] sm:$0xff] %v1867_v31  ;;  %v1871_v32 = vpop.f32.mrb[22].mxu1 }
 0x120   : > { %946 = vst [vmem:[%s1757_s27 + $0xb8] sm:$0xff] %v1506_v18  ;;  %v751_v20 = vpop.f32.mrb[23].mxu0  ;;  %v1079_v33 = vmul.f32 %v1506_v18, %v1506_v18  ;;  %978 = vst [vmem:[%s1757_s27 + $0x1b8] sm:$0xff] %v1871_v32  ;;  %v1875_v37 = vpop.f32.mrb[23].mxu1 }
 0x121   : > { %v1139_v21 = vadd.f32 %v1138_v17, %v1076_v16  ;;  %944 = vst [vmem:[%s1757_s27 + $0xa8] sm:$0xff] %v751_v20  ;;  %v1007_v22 = vadd.f32 %v1006_v15, %v751_v20  ;;  %v1077_v25 = vmul.f32 %v751_v20, %v751_v20  ;;  %976 = vst [vmem:[%s1757_s27 + $0x1a8] sm:$0xff] %v1875_v37 }
 0x123   : > { %v1008_v28 = vadd.f32 %v1505_v11, %v1007_v22  ;;  %v1140_v30 = vadd.f32 %v1139_v21, %v1077_v25 }
 0x125   : > { %v1141_v34 = vadd.f32 %v1140_v30, %v1078_v27  ;;  %v1509_v35 = vpop.f32.mrb[24].mxu0  ;;  %v1009_v36 = vadd.f32 %v1506_v18, %v1008_v28  ;;  %v1883_v55 = vpop.f32.mrb[24].mxu1 }
 0x126   : > { %949 = vst [vmem:[%s1757_s27 + $0xd0] sm:$0xff] %v1509_v35  ;;  %v764_v38 = vpop.f32.mrb[25].mxu0  ;;  %v1082_v56 = vmul.f32 %v1509_v35, %v1509_v35  ;;  %981 = vst [vmem:[%s1757_s27 + $0x1d0] sm:$0xff] %v1883_v55  ;;  %v1887_v59 = vpop.f32.mrb[25].mxu1 }
 0x127   : > { %947 = vst [vmem:[%s1757_s27 + $0xc0] sm:$0xff] %v764_v38  ;;  %v1010_v40 = vadd.f32 %v1009_v36, %v764_v38  ;;  %v1080_v41 = vmul.f32 %v764_v38, %v764_v38  ;;  %v1142_v42 = vadd.f32 %v1141_v34, %v1079_v33  ;;  %v1510_v46 = vpop.f32.mrb[26].mxu0  ;;  %979 = vst [vmem:[%s1757_s27 + $0x1c0] sm:$0xff] %v1887_v59  ;;  %v1891_v60 = vpop.f32.mrb[26].mxu1 }
 0x128   : > { %950 = vst [vmem:[%s1757_s27 + $0xd8] sm:$0xff] %v1510_v46  ;;  %v767_v49 = vpop.f32.mrb[27].mxu0  ;;  %v1083_v61 = vmul.f32 %v1510_v46, %v1510_v46  ;;  %982 = vst [vmem:[%s1757_s27 + $0x1d8] sm:$0xff] %v1891_v60  ;;  %v1895_v5 = vpop.f32.mrb[27].mxu1 }
 0x129   : > { %v1143_v50 = vadd.f32 %v1142_v42, %v1080_v41  ;;  %948 = vst [vmem:[%s1757_s27 + $0xc8] sm:$0xff] %v767_v49  ;;  %v1011_v51 = vadd.f32 %v1010_v40, %v767_v49  ;;  %v1081_v54 = vmul.f32 %v767_v49, %v767_v49  ;;  %980 = vst [vmem:[%s1757_s27 + $0x1c8] sm:$0xff] %v1895_v5 }
 0x12a   : > { %v1090_v49 = vmul.f32 %v1763_v43, %v1763_v43 }
 0x12b   : > { %v1012_v57 = vadd.f32 %v1509_v35, %v1011_v51  ;;  %v1144_v58 = vadd.f32 %v1143_v50, %v1081_v54  ;;  %v1088_v35 = vmul.f32 %v1767_v47, %v1767_v47  ;;  %v1091_v54 = vmul.f32 %v1771_v48, %v1771_v48 }
 0x12d   : > { %v1145_v62 = vadd.f32 %v1144_v58, %v1082_v56  ;;  %v1513_v1 = vpop.f32.mrb[28].mxu0  ;;  %v1013_v2 = vadd.f32 %v1510_v46, %v1012_v57  ;;  %v1903_v20 = vpop.f32.mrb[28].mxu1  ;;  %v1089_v46 = vmul.f32 %v1775_v53, %v1775_v53 }
 0x12e   : > { %953 = vst [vmem:[%s1757_s27 + $0xf0] sm:$0xff] %v1513_v1  ;;  %v780_v8 = vpop.f32.mrb[29].mxu0  ;;  %v1086_v21 = vmul.f32 %v1513_v1, %v1513_v1  ;;  %985 = vst [vmem:[%s1757_s27 + $0x1f0] sm:$0xff] %v1903_v20  ;;  %v1907_v27 = vpop.f32.mrb[29].mxu1 }
 0x12f   : > { %951 = vst [vmem:[%s1757_s27 + $0xe0] sm:$0xff] %v780_v8  ;;  %v1014_v10 = vadd.f32 %v1013_v2, %v780_v8  ;;  %v1084_v11 = vmul.f32 %v780_v8, %v780_v8  ;;  %v1146_v12 = vadd.f32 %v1145_v62, %v1083_v61  ;;  %v1514_v14 = vpop.f32.mrb[30].mxu0  ;;  %983 = vst [vmem:[%s1757_s27 + $0x1e0] sm:$0xff] %v1907_v27  ;;  %v1911_v28 = vpop.f32.mrb[30].mxu1 }
 0x130   : > { %954 = vst [vmem:[%s1757_s27 + $0xf8] sm:$0xff] %v1514_v14  ;;  %v783_v15 = vpop.f32.mrb[31].mxu0  ;;  %v1087_v30 = vmul.f32 %v1514_v14, %v1514_v14  ;;  %986 = vst [vmem:[%s1757_s27 + $0x1f8] sm:$0xff] %v1911_v28  ;;  %v1917_v36 = vpop.f32.mrb[31].mxu1 }
 0x131   : > { %v1147_v16 = vadd.f32 %v1146_v12, %v1084_v11  ;;  %952 = vst [vmem:[%s1757_s27 + $0xe8] sm:$0xff] %v783_v15  ;;  %v1015_v17 = vadd.f32 %v1014_v10, %v783_v15  ;;  %v1085_v18 = vmul.f32 %v783_v15, %v783_v15  ;;  %984 = vst [vmem:[%s1757_s27 + $0x1e8] sm:$0xff] %v1917_v36 }
 0x133   : > { %v1016_v22 = vadd.f32 %v1513_v1, %v1015_v17  ;;  %v1148_v25 = vadd.f32 %v1147_v16, %v1085_v18  ;;  %v1093_v1 = vmul.f32 %v1795_v9, %v1795_v9  ;;  %v1097_v16 = vmul.f32 %v1815_v29, %v1815_v29 }
 0x135   : > { %v1149_v33 = vadd.f32 %v1148_v25, %v1086_v21  ;;  %v1017_v34 = vadd.f32 %v1514_v14, %v1016_v22 }
 0x137   : > { %v1018_v38 = vadd.f32 %v1017_v34, %v1767_v47  ;;  %v1150_v40 = vadd.f32 %v1149_v33, %v1087_v30  ;;  %v1092_v47 = vmul.f32 %v1787_v3, %v1787_v3  ;;  %v1101_v34 = vmul.f32 %v1835_v52, %v1835_v52 }
 0x139   : > { %v1151_v41 = vadd.f32 %v1150_v40, %v1088_v35  ;;  %v1019_v42 = vadd.f32 %v1018_v38, %v1775_v53 }
 0x13b   : > { %v1020_v50 = vadd.f32 %v1763_v43, %v1019_v42  ;;  %v1152_v51 = vadd.f32 %v1151_v41, %v1089_v46  ;;  %v1094_v43 = vmul.f32 %v1783_v63, %v1783_v63 }
 0x13d   : > { %v1153_v56 = vadd.f32 %v1152_v51, %v1090_v49  ;;  %v1021_v57 = vadd.f32 %v1771_v48, %v1020_v50  ;;  %v1095_v48 = vmul.f32 %v1791_v4, %v1791_v4  ;;  %v1105_v50 = vmul.f32 %v1855_v13, %v1855_v13 }
 0x13f   : > { %v1022_v58 = vadd.f32 %v1021_v57, %v1787_v3  ;;  %v1154_v61 = vadd.f32 %v1153_v56, %v1091_v54  ;;  %v1096_v3 = vmul.f32 %v1807_v23, %v1807_v23 }
 0x141   : > { %v1155_v62 = vadd.f32 %v1154_v61, %v1092_v47  ;;  %v1023_v53 = vadd.f32 %v1022_v58, %v1795_v9 }
 0x143   : > { %v1024_v2 = vadd.f32 %v1783_v63, %v1023_v53  ;;  %v1156_v8 = vadd.f32 %v1155_v62, %v1093_v1  ;;  %v1098_v63 = vmul.f32 %v1803_v19, %v1803_v19  ;;  %v1109_v62 = vmul.f32 %v1875_v37, %v1875_v37 }
 0x145   : > { %v1157_v10 = vadd.f32 %v1156_v8, %v1094_v43  ;;  %v1025_v11 = vadd.f32 %v1791_v4, %v1024_v2  ;;  %v1099_v4 = vmul.f32 %v1811_v24, %v1811_v24 }
 0x147   : > { %v1026_v12 = vadd.f32 %v1025_v11, %v1807_v23  ;;  %v1158_v14 = vadd.f32 %v1157_v10, %v1095_v48  ;;  %v1100_v23 = vmul.f32 %v1827_v44, %v1827_v44  ;;  %v1113_v11 = vmul.f32 %v1895_v5, %v1895_v5 }
 0x149   : > { %v1159_v15 = vadd.f32 %v1158_v14, %v1096_v3  ;;  %v1027_v9 = vadd.f32 %v1026_v12, %v1815_v29 }
 0x14b   : > { %v1028_v17 = vadd.f32 %v1803_v19, %v1027_v9  ;;  %v1160_v18 = vadd.f32 %v1159_v15, %v1097_v16  ;;  %v1102_v19 = vmul.f32 %v1823_v39, %v1823_v39 }
 0x14d   : > { %v1161_v21 = vadd.f32 %v1160_v18, %v1098_v63  ;;  %v1029_v22 = vadd.f32 %v1811_v24, %v1028_v17  ;;  %v1103_v24 = vmul.f32 %v1831_v45, %v1831_v45  ;;  %v1117_v17 = vmul.f32 %v1917_v36, %v1917_v36 }
 0x14f   : > { %v1030_v25 = vadd.f32 %v1029_v22, %v1827_v44  ;;  %v1162_v30 = vadd.f32 %v1161_v21, %v1099_v4  ;;  %v1104_v44 = vmul.f32 %v1847_v6, %v1847_v6 }
 0x151   : > { %v1163_v33 = vadd.f32 %v1162_v30, %v1100_v23  ;;  %v1031_v29 = vadd.f32 %v1030_v25, %v1835_v52 }
 0x153   : > { %v1032_v35 = vadd.f32 %v1823_v39, %v1031_v29  ;;  %v1164_v38 = vadd.f32 %v1163_v33, %v1101_v34  ;;  %v1106_v39 = vmul.f32 %v1843_v0, %v1843_v0 }
 0x155   : > { %v1165_v40 = vadd.f32 %v1164_v38, %v1102_v19  ;;  %v1033_v41 = vadd.f32 %v1831_v45, %v1032_v35  ;;  %v1107_v45 = vmul.f32 %v1851_v7, %v1851_v7 }
 0x157   : > { %v1034_v42 = vadd.f32 %v1033_v41, %v1847_v6  ;;  %v1166_v46 = vadd.f32 %v1165_v40, %v1103_v24  ;;  %v1108_v6 = vmul.f32 %v1867_v31, %v1867_v31 }
 0x159   : > { %v1167_v49 = vadd.f32 %v1166_v46, %v1104_v44  ;;  %v1035_v52 = vadd.f32 %v1034_v42, %v1855_v13 }
 0x15b   : > { %v1036_v51 = vadd.f32 %v1843_v0, %v1035_v52  ;;  %v1168_v54 = vadd.f32 %v1167_v49, %v1105_v50  ;;  %v1110_v0 = vmul.f32 %v1863_v26, %v1863_v26 }
 0x15d   : > { %v1169_v56 = vadd.f32 %v1168_v54, %v1106_v39  ;;  %v1037_v57 = vadd.f32 %v1851_v7, %v1036_v51  ;;  %v1111_v7 = vmul.f32 %v1871_v32, %v1871_v32 }
 0x15f   : > { %v1038_v47 = vadd.f32 %v1037_v57, %v1867_v31  ;;  %v1170_v58 = vadd.f32 %v1169_v56, %v1107_v45  ;;  %v1112_v31 = vmul.f32 %v1887_v59, %v1887_v59 }
 0x161   : > { %v1171_v61 = vadd.f32 %v1170_v58, %v1108_v6  ;;  %v1039_v13 = vadd.f32 %v1038_v47, %v1875_v37 }
 0x163   : > { %v1040_v53 = vadd.f32 %v1863_v26, %v1039_v13  ;;  %v1172_v1 = vadd.f32 %v1171_v61, %v1109_v62  ;;  %v1114_v26 = vmul.f32 %v1883_v55, %v1883_v55 }
 0x165   : > { %v1173_v43 = vadd.f32 %v1172_v1, %v1110_v0  ;;  %v1041_v2 = vadd.f32 %v1871_v32, %v1040_v53  ;;  %v1115_v32 = vmul.f32 %v1891_v60, %v1891_v60 }
 0x167   : > { %v1042_v8 = vadd.f32 %v1041_v2, %v1887_v59  ;;  %v1174_v48 = vadd.f32 %v1173_v43, %v1111_v7  ;;  %v1116_v59 = vmul.f32 %v1907_v27, %v1907_v27 }
 0x169   : > { %v1175_v10 = vadd.f32 %v1174_v48, %v1112_v31  ;;  %v1043_v37 = vadd.f32 %v1042_v8, %v1895_v5 }
 0x16b   : > { %v1044_v3 = vadd.f32 %v1883_v55, %v1043_v37  ;;  %v1176_v12 = vadd.f32 %v1175_v10, %v1113_v11  ;;  %v1118_v55 = vmul.f32 %v1903_v20, %v1903_v20 }
 0x16d   : > { %v1177_v14 = vadd.f32 %v1176_v12, %v1114_v26  ;;  %v1045_v15 = vadd.f32 %v1891_v60, %v1044_v3  ;;  %v1119_v60 = vmul.f32 %v1911_v28, %v1911_v28 }
 0x16f   : > { %v1046_v9 = vadd.f32 %v1045_v15, %v1907_v27  ;;  %v1178_v16 = vadd.f32 %v1177_v14, %v1115_v32 }
 0x171   : > { %v1179_v63 = vadd.f32 %v1178_v16, %v1116_v59  ;;  %v1047_v5 = vadd.f32 %v1046_v9, %v1917_v36 }
 0x173   : > { %v1048_v18 = vadd.f32 %v1903_v20, %v1047_v5  ;;  %v1180_v4 = vadd.f32 %v1179_v63, %v1117_v17 }
 0x175   : > { %v1049_v21 = vadd.f32 %v1911_v28, %v1048_v18  ;;  %v1181_v27 = vadd.f32 %v1180_v4, %v1118_v55 }
 0x177   : > { %v1050_v22 = vrot.slane %v1049_v21, 4  ;;  %v1182_v23 = vadd.f32 %v1181_v27, %v1119_v60 }
 0x179   : > { %v1051_v25 = vadd.f32 %v1050_v22, %v1049_v21  ;;  %v1183_v30 = vrot.slane %v1182_v23, 4 }
 0x17b   : > { %v1052_v33 = vrot.slane %v1051_v25, 2  ;;  %v1184_v29 = vadd.f32 %v1183_v30, %v1182_v23 }
 0x17d   : > { %v1053_v36 = vadd.f32 %v1052_v33, %v1051_v25  ;;  %v1185_v34 = vrot.slane %v1184_v29, 2 }
 0x17f   : > { %v1054_v19 = vrot.slane %v1053_v36, 1  ;;  %v1186_v35 = vadd.f32 %v1185_v34, %v1184_v29 }
 0x181   : > { %v1187_v38 = vrot.slane %v1186_v35, 1  ;;  %v1055_v20 = vadd.f32 %v1054_v19, %v1053_v36 }
 0x183   : > { %v1188_v28 = vadd.f32 %v1187_v38, %v1186_v35 }
 0x185   : > { %v1190_v24 = vsel %vm1189_vm1, %v1055_v20, %v1188_v28 }
 0x186   : > { %1191 = vst [vmem:[%s278_s4] sm:$0x3] %v1190_v24 }
 0x187 PF: > { %s14_s14 = sadd.s32 1, %s1637_s14   ;;  %s2032_s12 = smov %s1633_s13 }
 0x188   : > { %p11_p5 = scmp.ge.s32.totalorder %s14_s14, 6   ;;  %s2033_s13 = smov %s2035_s15 }
 0x18a   :  { %13 = sbr.rel (!%p11_p5) target bundleno = 2 (0x2), region = 73 }

// kernel: generator_forward.16
= control target key start
LH: loop header
LB: loop body
LE: loop exit
PB: predicated region body
PF: predicated region fallthrough
CT: control target
= control target key end

     0   :  { %s5335_s0 = inlined_call_operand.vmem [shape: f32[2048,128], index: 0, kind: input, shape index: {}]   ;;  %s5336_s1 = inlined_call_operand.vmem [shape: f32[1,128], index: 1, kind: input, shape index: {}]   ;;  %s5337_s2 = inlined_call_operand.vmem [shape: f32[1,128], index: 2, kind: input, shape index: {}]   ;;  %s5338_s3 = inlined_call_operand.vmem [shape: bf16[2048,128], index: 3, kind: output, shape index: {}]  }
   0x1   :  { %v14_v0 = vld [vmem:[%s5335_s0] sm:$0xff]  ;;  %v15_v1 = vld [vmem:[%s5335_s0 + $0x8] sm:$0xff]  ;;  %v16_v6 = vld [vmem:[%s5335_s0 + $0x10] sm:$0xff] }
   0x2   :  { %v3650_v2 = vld [vmem:[%s5336_s1] ss:$0 sm:$0xff]  ;;  %v17_v7 = vld [vmem:[%s5335_s0 + $0x18] sm:$0xff]  ;;  %v19_v11 = vld [vmem:[%s5335_s0 + $0x28] sm:$0xff] }
   0x3   :  { %v277_v3 = vmul.f32 %v3650_v2, %v14_v0  ;;  %v278_v4 = vmul.f32 %v3650_v2, %v15_v1  ;;  %v3657_v5 = vld [vmem:[%s5337_s2] ss:$0 sm:$0xff]  ;;  %v279_v8 = vmul.f32 %v3650_v2, %v16_v6  ;;  %v280_v9 = vmul.f32 %v3650_v2, %v17_v7  ;;  %v20_v12 = vld [vmem:[%s5335_s0 + $0x30] sm:$0xff]  ;;  %v21_v17 = vld [vmem:[%s5335_s0 + $0x38] sm:$0xff] }
   0x4   :  { %v18_v10 = vld [vmem:[%s5335_s0 + $0x20] sm:$0xff]  ;;  %v282_v16 = vmul.f32 %v3650_v2, %v19_v11  ;;  %v283_v20 = vmul.f32 %v3650_v2, %v20_v12  ;;  %v284_v21 = vmul.f32 %v3650_v2, %v21_v17  ;;  %v23_v27 = vld [vmem:[%s5335_s0 + $0x48] sm:$0xff]  ;;  %v24_v32 = vld [vmem:[%s5335_s0 + $0x50] sm:$0xff] }
   0x5   :  { %v540_v13 = vadd.f32 %v3657_v5, %v277_v3  ;;  %v541_v14 = vadd.f32 %v3657_v5, %v278_v4  ;;  %v281_v15 = vmul.f32 %v3650_v2, %v18_v10  ;;  %v542_v18 = vadd.f32 %v3657_v5, %v279_v8  ;;  %v22_v22 = vld [vmem:[%s5335_s0 + $0x40] sm:$0xff]  ;;  %v25_v33 = vld [vmem:[%s5335_s0 + $0x58] sm:$0xff]  ;;  %v27_v39 = vld [vmem:[%s5335_s0 + $0x68] sm:$0xff] }
   0x6   :  { %v543_v19 = vadd.f32 %v3657_v5, %v280_v9  ;;  %v545_v26 = vadd.f32 %v3657_v5, %v282_v16  ;;  %v546_v30 = vadd.f32 %v3657_v5, %v283_v20  ;;  %v547_v31 = vadd.f32 %v3657_v5, %v284_v21  ;;  %v26_v38 = vld [vmem:[%s5335_s0 + $0x60] sm:$0xff]  ;;  %v28_v44 = vld [vmem:[%s5335_s0 + $0x70] sm:$0xff]  ;;  %v29_v49 = vld [vmem:[%s5335_s0 + $0x78] sm:$0xff] }
   0x7   :  { %v796_v23 = vmax.f32 %v540_v13, 0.0  ;;  %v797_v24 = vmax.f32 %v541_v14, 0.0  ;;  %v544_v25 = vadd.f32 %v3657_v5, %v281_v15  ;;  %v798_v28 = vmax.f32 %v542_v18, 0.0  ;;  %v30_v54 = vld [vmem:[%s5335_s0 + $0x80] sm:$0xff]  ;;  %v31_v63 = vld [vmem:[%s5335_s0 + $0x88] sm:$0xff]  ;;  %v32_v6 = vld [vmem:[%s5335_s0 + $0x90] sm:$0xff] }
   0x8   :  { %v799_v29 = vmax.f32 %v543_v19, 0.0  ;;  %v801_v36 = vmax.f32 %v545_v26, 0.0  ;;  %v285_v37 = vmul.f32 %v3650_v2, %v22_v22  ;;  %v802_v41 = vmax.f32 %v546_v30, 0.0  ;;  %v33_v7 = vld [vmem:[%s5335_s0 + $0x98] sm:$0xff]  ;;  %v34_v12 = vld [vmem:[%s5335_s0 + $0xa0] sm:$0xff]  ;;  %v35_v13 = vld [vmem:[%s5335_s0 + $0xa8] sm:$0xff] }
   0x9   :  { %v2853_v34 = vpack.c.bf16 %v797_v24, %v796_v23  ;;  %v800_v35 = vmax.f32 %v544_v25, 0.0  ;;  %v803_v42 = vmax.f32 %v547_v31, 0.0  ;;  %v286_v43 = vmul.f32 %v3650_v2, %v23_v27  ;;  %v36_v18 = vld [vmem:[%s5335_s0 + $0xb0] sm:$0xff]  ;;  %v37_v23 = vld [vmem:[%s5335_s0 + $0xb8] sm:$0xff] }
   0xa   :  { %v2858_v40 = vpack.c.bf16 %v799_v29, %v798_v28  ;;  %v548_v46 = vadd.f32 %v3657_v5, %v285_v37  ;;  %v287_v47 = vmul.f32 %v3650_v2, %v24_v32  ;;  %v288_v48 = vmul.f32 %v3650_v2, %v25_v33  ;;  %v38_v28 = vld [vmem:[%s5335_s0 + $0xc0] sm:$0xff]  ;;  %v39_v37 = vld [vmem:[%s5335_s0 + $0xc8] sm:$0xff] }
   0xb   :  { %2854 = vst [vmem:[%s5338_s3] sm:$0xff] %v2853_v34   ;;  %v2863_v45 = vpack.c.bf16 %v801_v36, %v800_v35  ;;  %v2868_v50 = vpack.c.bf16 %v803_v42, %v802_v41  ;;  %v549_v51 = vadd.f32 %v3657_v5, %v286_v43  ;;  %v289_v52 = vmul.f32 %v3650_v2, %v26_v38  ;;  %v40_v42 = vld [vmem:[%s5335_s0 + $0xd0] sm:$0xff]  ;;  %v41_v43 = vld [vmem:[%s5335_s0 + $0xd8] sm:$0xff] }
   0xc   :  { %3490 = vst [vmem:[%s5338_s3 + $0x8] sm:$0xff] %v2858_v40   ;;  %v290_v53 = vmul.f32 %v3650_v2, %v27_v39  ;;  %v804_v55 = vmax.f32 %v548_v46, 0.0  ;;  %v550_v56 = vadd.f32 %v3657_v5, %v287_v47  ;;  %v551_v57 = vadd.f32 %v3657_v5, %v288_v48  ;;  %v42_v48 = vld [vmem:[%s5335_s0 + $0xe0] sm:$0xff] }
   0xd   :  { %3491 = vst [vmem:[%s5338_s3 + $0x10] sm:$0xff] %v2863_v45   ;;  %v291_v58 = vmul.f32 %v3650_v2, %v28_v44  ;;  %3492 = vst [vmem:[%s5338_s3 + $0x18] sm:$0xff] %v2868_v50   ;;  %v805_v59 = vmax.f32 %v549_v51, 0.0  ;;  %v552_v60 = vadd.f32 %v3657_v5, %v289_v52  ;;  %v292_v62 = vmul.f32 %v3650_v2, %v29_v49  ;;  %v43_v49 = vld [vmem:[%s5335_s0 + $0xe8] sm:$0xff] }
   0xe   :  { %v553_v61 = vadd.f32 %v3657_v5, %v290_v53  ;;  %v806_v0 = vmax.f32 %v550_v56, 0.0  ;;  %v807_v1 = vmax.f32 %v551_v57, 0.0  ;;  %v293_v4 = vmul.f32 %v3650_v2, %v30_v54  ;;  %v44_v54 = vld [vmem:[%s5335_s0 + $0xf0] sm:$0xff] }
   0xf   :  { %v554_v3 = vadd.f32 %v3657_v5, %v291_v58  ;;  %v2873_v8 = vpack.c.bf16 %v805_v59, %v804_v55  ;;  %v808_v9 = vmax.f32 %v552_v60, 0.0  ;;  %v555_v11 = vadd.f32 %v3657_v5, %v292_v62  ;;  %v45_v59 = vld [vmem:[%s5335_s0 + $0xf8] sm:$0xff] }
  0x10   :  { %v809_v10 = vmax.f32 %v553_v61, 0.0  ;;  %v2878_v14 = vpack.c.bf16 %v807_v1, %v806_v0  ;;  %v294_v16 = vmul.f32 %v3650_v2, %v31_v63  ;;  %v556_v17 = vadd.f32 %v3657_v5, %v293_v4  ;;  %v46_v0 = vld [vmem:[%s5335_s0 + $0x100] sm:$0xff] }
  0x11   :  { %v810_v15 = vmax.f32 %v554_v3, 0.0  ;;  %3493 = vst [vmem:[%s5338_s3 + $0x20] sm:$0xff] %v2873_v8   ;;  %v811_v20 = vmax.f32 %v555_v11, 0.0  ;;  %v295_v21 = vmul.f32 %v3650_v2, %v32_v6  ;;  %v296_v22 = vmul.f32 %v3650_v2, %v33_v7  ;;  %v47_v11 = vld [vmem:[%s5335_s0 + $0x108] sm:$0xff] }
  0x12   :  { %v2883_v19 = vpack.c.bf16 %v809_v10, %v808_v9  ;;  %3494 = vst [vmem:[%s5338_s3 + $0x28] sm:$0xff] %v2878_v14   ;;  %v557_v24 = vadd.f32 %v3657_v5, %v294_v16  ;;  %v812_v25 = vmax.f32 %v556_v17, 0.0  ;;  %v297_v26 = vmul.f32 %v3650_v2, %v34_v12  ;;  %v48_v16 = vld [vmem:[%s5335_s0 + $0x110] sm:$0xff]  ;;  %v49_v17 = vld [vmem:[%s5335_s0 + $0x118] sm:$0xff] }
  0x13   :  { %v298_v27 = vmul.f32 %v3650_v2, %v35_v13  ;;  %v2888_v29 = vpack.c.bf16 %v811_v20, %v810_v15  ;;  %v558_v30 = vadd.f32 %v3657_v5, %v295_v21  ;;  %v559_v31 = vadd.f32 %v3657_v5, %v296_v22  ;;  %v50_v22 = vld [vmem:[%s5335_s0 + $0x120] sm:$0xff] }
  0x14   :  { %3495 = vst [vmem:[%s5338_s3 + $0x30] sm:$0xff] %v2883_v19   ;;  %v299_v32 = vmul.f32 %v3650_v2, %v36_v18  ;;  %v813_v33 = vmax.f32 %v557_v24, 0.0  ;;  %v560_v34 = vadd.f32 %v3657_v5, %v297_v26  ;;  %v300_v36 = vmul.f32 %v3650_v2, %v37_v23  ;;  %v51_v23 = vld [vmem:[%s5335_s0 + $0x128] sm:$0xff] }
  0x15   :  { %v561_v35 = vadd.f32 %v3657_v5, %v298_v27  ;;  %3496 = vst [vmem:[%s5338_s3 + $0x38] sm:$0xff] %v2888_v29   ;;  %v814_v38 = vmax.f32 %v558_v30, 0.0  ;;  %v815_v39 = vmax.f32 %v559_v31, 0.0  ;;  %v301_v41 = vmul.f32 %v3650_v2, %v38_v28  ;;  %v52_v28 = vld [vmem:[%s5335_s0 + $0x130] sm:$0xff] }
  0x16   :  { %v562_v40 = vadd.f32 %v3657_v5, %v299_v32  ;;  %v2893_v44 = vpack.c.bf16 %v813_v33, %v812_v25  ;;  %v816_v45 = vmax.f32 %v560_v34, 0.0  ;;  %v563_v47 = vadd.f32 %v3657_v5, %v300_v36  ;;  %v53_v33 = vld [vmem:[%s5335_s0 + $0x138] sm:$0xff] }
  0x17   :  { %v817_v46 = vmax.f32 %v561_v35, 0.0  ;;  %v2898_v50 = vpack.c.bf16 %v815_v39, %v814_v38  ;;  %v302_v52 = vmul.f32 %v3650_v2, %v39_v37  ;;  %v564_v53 = vadd.f32 %v3657_v5, %v301_v41  ;;  %v54_v38 = vld [vmem:[%s5335_s0 + $0x140] sm:$0xff] }
  0x18   :  { %v818_v51 = vmax.f32 %v562_v40, 0.0  ;;  %3497 = vst [vmem:[%s5338_s3 + $0x40] sm:$0xff] %v2893_v44   ;;  %v819_v56 = vmax.f32 %v563_v47, 0.0  ;;  %v303_v57 = vmul.f32 %v3650_v2, %v40_v42  ;;  %v304_v58 = vmul.f32 %v3650_v2, %v41_v43  ;;  %v55_v47 = vld [vmem:[%s5335_s0 + $0x148] sm:$0xff] }
  0x19   :  { %v2903_v55 = vpack.c.bf16 %v817_v46, %v816_v45  ;;  %3498 = vst [vmem:[%s5338_s3 + $0x48] sm:$0xff] %v2898_v50   ;;  %v565_v60 = vadd.f32 %v3657_v5, %v302_v52  ;;  %v820_v61 = vmax.f32 %v564_v53, 0.0  ;;  %v305_v62 = vmul.f32 %v3650_v2, %v42_v48  ;;  %v56_v52 = vld [vmem:[%s5335_s0 + $0x150] sm:$0xff]  ;;  %v57_v53 = vld [vmem:[%s5335_s0 + $0x158] sm:$0xff] }
  0x1a   :  { %v306_v63 = vmul.f32 %v3650_v2, %v43_v49  ;;  %v2908_v1 = vpack.c.bf16 %v819_v56, %v818_v51  ;;  %v566_v3 = vadd.f32 %v3657_v5, %v303_v57  ;;  %v567_v4 = vadd.f32 %v3657_v5, %v304_v58  ;;  %v58_v58 = vld [vmem:[%s5335_s0 + $0x160] sm:$0xff] }
  0x1b   :  { %3499 = vst [vmem:[%s5338_s3 + $0x50] sm:$0xff] %v2903_v55   ;;  %v307_v6 = vmul.f32 %v3650_v2, %v44_v54  ;;  %v821_v7 = vmax.f32 %v565_v60, 0.0  ;;  %v568_v8 = vadd.f32 %v3657_v5, %v305_v62  ;;  %v308_v10 = vmul.f32 %v3650_v2, %v45_v59  ;;  %v59_v59 = vld [vmem:[%s5335_s0 + $0x168] sm:$0xff] }
  0x1c   :  { %v569_v9 = vadd.f32 %v3657_v5, %v306_v63  ;;  %3500 = vst [vmem:[%s5338_s3 + $0x58] sm:$0xff] %v2908_v1   ;;  %v822_v12 = vmax.f32 %v566_v3, 0.0  ;;  %v823_v13 = vmax.f32 %v567_v4, 0.0  ;;  %v309_v15 = vmul.f32 %v3650_v2, %v46_v0  ;;  %v60_v0 = vld [vmem:[%s5335_s0 + $0x170] sm:$0xff] }
  0x1d   :  { %v570_v14 = vadd.f32 %v3657_v5, %v307_v6  ;;  %v2913_v18 = vpack.c.bf16 %v821_v7, %v820_v61  ;;  %v824_v19 = vmax.f32 %v568_v8, 0.0  ;;  %v571_v21 = vadd.f32 %v3657_v5, %v308_v10  ;;  %v61_v7 = vld [vmem:[%s5335_s0 + $0x178] sm:$0xff] }
  0x1e   :  { %v825_v20 = vmax.f32 %v569_v9, 0.0  ;;  %v2918_v24 = vpack.c.bf16 %v823_v13, %v822_v12  ;;  %v310_v26 = vmul.f32 %v3650_v2, %v47_v11  ;;  %v572_v27 = vadd.f32 %v3657_v5, %v309_v15  ;;  %v62_v12 = vld [vmem:[%s5335_s0 + $0x180] sm:$0xff] }
  0x1f   :  { %v826_v25 = vmax.f32 %v570_v14, 0.0  ;;  %3501 = vst [vmem:[%s5338_s3 + $0x60] sm:$0xff] %v2913_v18   ;;  %v827_v30 = vmax.f32 %v571_v21, 0.0  ;;  %v311_v31 = vmul.f32 %v3650_v2, %v48_v16  ;;  %v312_v32 = vmul.f32 %v3650_v2, %v49_v17  ;;  %v63_v21 = vld [vmem:[%s5335_s0 + $0x188] sm:$0xff] }
  0x20   :  { %v2923_v29 = vpack.c.bf16 %v825_v20, %v824_v19  ;;  %3502 = vst [vmem:[%s5338_s3 + $0x68] sm:$0xff] %v2918_v24   ;;  %v573_v34 = vadd.f32 %v3657_v5, %v310_v26  ;;  %v828_v35 = vmax.f32 %v572_v27, 0.0  ;;  %v313_v36 = vmul.f32 %v3650_v2, %v50_v22  ;;  %v64_v26 = vld [vmem:[%s5335_s0 + $0x190] sm:$0xff]  ;;  %v65_v27 = vld [vmem:[%s5335_s0 + $0x198] sm:$0xff] }
  0x21   :  { %v314_v37 = vmul.f32 %v3650_v2, %v51_v23  ;;  %v2928_v39 = vpack.c.bf16 %v827_v30, %v826_v25  ;;  %v574_v40 = vadd.f32 %v3657_v5, %v311_v31  ;;  %v575_v41 = vadd.f32 %v3657_v5, %v312_v32  ;;  %v66_v32 = vld [vmem:[%s5335_s0 + $0x1a0] sm:$0xff] }
  0x22   :  { %3503 = vst [vmem:[%s5338_s3 + $0x70] sm:$0xff] %v2923_v29   ;;  %v315_v42 = vmul.f32 %v3650_v2, %v52_v28  ;;  %v829_v43 = vmax.f32 %v573_v34, 0.0  ;;  %v576_v44 = vadd.f32 %v3657_v5, %v313_v36  ;;  %v316_v46 = vmul.f32 %v3650_v2, %v53_v33  ;;  %v67_v33 = vld [vmem:[%s5335_s0 + $0x1a8] sm:$0xff] }
  0x23   :  { %v577_v45 = vadd.f32 %v3657_v5, %v314_v37  ;;  %3504 = vst [vmem:[%s5338_s3 + $0x78] sm:$0xff] %v2928_v39   ;;  %v830_v48 = vmax.f32 %v574_v40, 0.0  ;;  %v831_v49 = vmax.f32 %v575_v41, 0.0  ;;  %v317_v51 = vmul.f32 %v3650_v2, %v54_v38  ;;  %v68_v38 = vld [vmem:[%s5335_s0 + $0x1b0] sm:$0xff] }
  0x24   :  { %v578_v50 = vadd.f32 %v3657_v5, %v315_v42  ;;  %v2933_v54 = vpack.c.bf16 %v829_v43, %v828_v35  ;;  %v832_v55 = vmax.f32 %v576_v44, 0.0  ;;  %v579_v57 = vadd.f32 %v3657_v5, %v316_v46  ;;  %v69_v43 = vld [vmem:[%s5335_s0 + $0x1b8] sm:$0xff] }
  0x25   :  { %v833_v56 = vmax.f32 %v577_v45, 0.0  ;;  %v2938_v60 = vpack.c.bf16 %v831_v49, %v830_v48  ;;  %v318_v62 = vmul.f32 %v3650_v2, %v55_v47  ;;  %v580_v63 = vadd.f32 %v3657_v5, %v317_v51  ;;  %v70_v48 = vld [vmem:[%s5335_s0 + $0x1c0] sm:$0xff] }
  0x26   :  { %v834_v61 = vmax.f32 %v578_v50, 0.0  ;;  %3505 = vst [vmem:[%s5338_s3 + $0x80] sm:$0xff] %v2933_v54   ;;  %v835_v3 = vmax.f32 %v579_v57, 0.0  ;;  %v319_v4 = vmul.f32 %v3650_v2, %v56_v52  ;;  %v320_v6 = vmul.f32 %v3650_v2, %v57_v53  ;;  %v71_v57 = vld [vmem:[%s5335_s0 + $0x1c8] sm:$0xff] }
  0x27   :  { %v2943_v1 = vpack.c.bf16 %v833_v56, %v832_v55  ;;  %3506 = vst [vmem:[%s5338_s3 + $0x88] sm:$0xff] %v2938_v60   ;;  %v581_v8 = vadd.f32 %v3657_v5, %v318_v62  ;;  %v836_v9 = vmax.f32 %v580_v63, 0.0  ;;  %v321_v10 = vmul.f32 %v3650_v2, %v58_v58  ;;  %v72_v62 = vld [vmem:[%s5335_s0 + $0x1d0] sm:$0xff]  ;;  %v73_v63 = vld [vmem:[%s5335_s0 + $0x1d8] sm:$0xff] }
  0x28   :  { %v322_v11 = vmul.f32 %v3650_v2, %v59_v59  ;;  %v2948_v13 = vpack.c.bf16 %v835_v3, %v834_v61  ;;  %v582_v14 = vadd.f32 %v3657_v5, %v319_v4  ;;  %v583_v15 = vadd.f32 %v3657_v5, %v320_v6  ;;  %v74_v6 = vld [vmem:[%s5335_s0 + $0x1e0] sm:$0xff] }
  0x29   :  { %3507 = vst [vmem:[%s5338_s3 + $0x90] sm:$0xff] %v2943_v1   ;;  %v323_v16 = vmul.f32 %v3650_v2, %v60_v0  ;;  %v837_v17 = vmax.f32 %v581_v8, 0.0  ;;  %v584_v18 = vadd.f32 %v3657_v5, %v321_v10  ;;  %v324_v20 = vmul.f32 %v3650_v2, %v61_v7  ;;  %v75_v7 = vld [vmem:[%s5335_s0 + $0x1e8] sm:$0xff] }
  0x2a   :  { %v585_v19 = vadd.f32 %v3657_v5, %v322_v11  ;;  %3508 = vst [vmem:[%s5338_s3 + $0x98] sm:$0xff] %v2948_v13   ;;  %v838_v22 = vmax.f32 %v582_v14, 0.0  ;;  %v839_v23 = vmax.f32 %v583_v15, 0.0  ;;  %v325_v25 = vmul.f32 %v3650_v2, %v62_v12  ;;  %v76_v12 = vld [vmem:[%s5335_s0 + $0x1f0] sm:$0xff] }
  0x2b   :  { %v586_v24 = vadd.f32 %v3657_v5, %v323_v16  ;;  %v2953_v28 = vpack.c.bf16 %v837_v17, %v836_v9  ;;  %v840_v29 = vmax.f32 %v584_v18, 0.0  ;;  %v587_v31 = vadd.f32 %v3657_v5, %v324_v20  ;;  %v77_v17 = vld [vmem:[%s5335_s0 + $0x1f8] sm:$0xff] }
  0x2c   :  { %v841_v30 = vmax.f32 %v585_v19, 0.0  ;;  %v2958_v34 = vpack.c.bf16 %v839_v23, %v838_v22  ;;  %v326_v36 = vmul.f32 %v3650_v2, %v63_v21  ;;  %v588_v37 = vadd.f32 %v3657_v5, %v325_v25  ;;  %v78_v22 = vld [vmem:[%s5335_s0 + $0x200] sm:$0xff] }
  0x2d   :  { %v842_v35 = vmax.f32 %v586_v24, 0.0  ;;  %3509 = vst [vmem:[%s5338_s3 + $0xa0] sm:$0xff] %v2953_v28   ;;  %v843_v40 = vmax.f32 %v587_v31, 0.0  ;;  %v327_v41 = vmul.f32 %v3650_v2, %v64_v26  ;;  %v328_v42 = vmul.f32 %v3650_v2, %v65_v27  ;;  %v79_v31 = vld [vmem:[%s5335_s0 + $0x208] sm:$0xff] }
  0x2e   :  { %v2963_v39 = vpack.c.bf16 %v841_v30, %v840_v29  ;;  %3510 = vst [vmem:[%s5338_s3 + $0xa8] sm:$0xff] %v2958_v34   ;;  %v589_v44 = vadd.f32 %v3657_v5, %v326_v36  ;;  %v844_v45 = vmax.f32 %v588_v37, 0.0  ;;  %v329_v46 = vmul.f32 %v3650_v2, %v66_v32  ;;  %v80_v36 = vld [vmem:[%s5335_s0 + $0x210] sm:$0xff]  ;;  %v81_v37 = vld [vmem:[%s5335_s0 + $0x218] sm:$0xff] }
  0x2f   :  { %v330_v47 = vmul.f32 %v3650_v2, %v67_v33  ;;  %v2968_v49 = vpack.c.bf16 %v843_v40, %v842_v35  ;;  %v590_v50 = vadd.f32 %v3657_v5, %v327_v41  ;;  %v591_v51 = vadd.f32 %v3657_v5, %v328_v42  ;;  %v82_v42 = vld [vmem:[%s5335_s0 + $0x220] sm:$0xff] }
  0x30   :  { %3511 = vst [vmem:[%s5338_s3 + $0xb0] sm:$0xff] %v2963_v39   ;;  %v331_v52 = vmul.f32 %v3650_v2, %v68_v38  ;;  %v845_v53 = vmax.f32 %v589_v44, 0.0  ;;  %v592_v54 = vadd.f32 %v3657_v5, %v329_v46  ;;  %v332_v56 = vmul.f32 %v3650_v2, %v69_v43  ;;  %v83_v43 = vld [vmem:[%s5335_s0 + $0x228] sm:$0xff] }
  0x31   :  { %v593_v55 = vadd.f32 %v3657_v5, %v330_v47  ;;  %3512 = vst [vmem:[%s5338_s3 + $0xb8] sm:$0xff] %v2968_v49   ;;  %v846_v58 = vmax.f32 %v590_v50, 0.0  ;;  %v847_v59 = vmax.f32 %v591_v51, 0.0  ;;  %v333_v61 = vmul.f32 %v3650_v2, %v70_v48  ;;  %v84_v48 = vld [vmem:[%s5335_s0 + $0x230] sm:$0xff] }
  0x32   :  { %v594_v60 = vadd.f32 %v3657_v5, %v331_v52  ;;  %v2973_v0 = vpack.c.bf16 %v845_v53, %v844_v45  ;;  %v848_v1 = vmax.f32 %v592_v54, 0.0  ;;  %v595_v4 = vadd.f32 %v3657_v5, %v332_v56  ;;  %v85_v53 = vld [vmem:[%s5335_s0 + $0x238] sm:$0xff] }
  0x33   :  { %v849_v3 = vmax.f32 %v593_v55, 0.0  ;;  %v2978_v8 = vpack.c.bf16 %v847_v59, %v846_v58  ;;  %v334_v10 = vmul.f32 %v3650_v2, %v71_v57  ;;  %v596_v11 = vadd.f32 %v3657_v5, %v333_v61  ;;  %v86_v58 = vld [vmem:[%s5335_s0 + $0x240] sm:$0xff] }
  0x34   :  { %v850_v9 = vmax.f32 %v594_v60, 0.0  ;;  %3513 = vst [vmem:[%s5338_s3 + $0xc0] sm:$0xff] %v2973_v0   ;;  %v851_v14 = vmax.f32 %v595_v4, 0.0  ;;  %v335_v15 = vmul.f32 %v3650_v2, %v72_v62  ;;  %v336_v16 = vmul.f32 %v3650_v2, %v73_v63  ;;  %v87_v4 = vld [vmem:[%s5335_s0 + $0x248] sm:$0xff] }
  0x35   :  { %v2983_v13 = vpack.c.bf16 %v849_v3, %v848_v1  ;;  %3514 = vst [vmem:[%s5338_s3 + $0xc8] sm:$0xff] %v2978_v8   ;;  %v597_v18 = vadd.f32 %v3657_v5, %v334_v10  ;;  %v852_v19 = vmax.f32 %v596_v11, 0.0  ;;  %v337_v20 = vmul.f32 %v3650_v2, %v74_v6  ;;  %v88_v10 = vld [vmem:[%s5335_s0 + $0x250] sm:$0xff]  ;;  %v89_v11 = vld [vmem:[%s5335_s0 + $0x258] sm:$0xff] }
  0x36   :  { %v338_v21 = vmul.f32 %v3650_v2, %v75_v7  ;;  %v2988_v23 = vpack.c.bf16 %v851_v14, %v850_v9  ;;  %v598_v24 = vadd.f32 %v3657_v5, %v335_v15  ;;  %v599_v25 = vadd.f32 %v3657_v5, %v336_v16  ;;  %v90_v16 = vld [vmem:[%s5335_s0 + $0x260] sm:$0xff] }
  0x37   :  { %3515 = vst [vmem:[%s5338_s3 + $0xd0] sm:$0xff] %v2983_v13   ;;  %v339_v26 = vmul.f32 %v3650_v2, %v76_v12  ;;  %v853_v27 = vmax.f32 %v597_v18, 0.0  ;;  %v600_v28 = vadd.f32 %v3657_v5, %v337_v20  ;;  %v340_v30 = vmul.f32 %v3650_v2, %v77_v17  ;;  %v91_v17 = vld [vmem:[%s5335_s0 + $0x268] sm:$0xff] }
  0x38   :  { %v601_v29 = vadd.f32 %v3657_v5, %v338_v21  ;;  %3516 = vst [vmem:[%s5338_s3 + $0xd8] sm:$0xff] %v2988_v23   ;;  %v854_v32 = vmax.f32 %v598_v24, 0.0  ;;  %v855_v33 = vmax.f32 %v599_v25, 0.0  ;;  %v341_v35 = vmul.f32 %v3650_v2, %v78_v22  ;;  %v92_v22 = vld [vmem:[%s5335_s0 + $0x270] sm:$0xff] }
  0x39   :  { %v602_v34 = vadd.f32 %v3657_v5, %v339_v26  ;;  %v2993_v38 = vpack.c.bf16 %v853_v27, %v852_v19  ;;  %v856_v39 = vmax.f32 %v600_v28, 0.0  ;;  %v603_v41 = vadd.f32 %v3657_v5, %v340_v30  ;;  %v93_v27 = vld [vmem:[%s5335_s0 + $0x278] sm:$0xff] }
  0x3a   :  { %v857_v40 = vmax.f32 %v601_v29, 0.0  ;;  %v2998_v44 = vpack.c.bf16 %v855_v33, %v854_v32  ;;  %v342_v46 = vmul.f32 %v3650_v2, %v79_v31  ;;  %v604_v47 = vadd.f32 %v3657_v5, %v341_v35  ;;  %v94_v32 = vld [vmem:[%s5335_s0 + $0x280] sm:$0xff] }
  0x3b   :  { %v858_v45 = vmax.f32 %v602_v34, 0.0  ;;  %3517 = vst [vmem:[%s5338_s3 + $0xe0] sm:$0xff] %v2993_v38   ;;  %v859_v50 = vmax.f32 %v603_v41, 0.0  ;;  %v343_v51 = vmul.f32 %v3650_v2, %v80_v36  ;;  %v344_v52 = vmul.f32 %v3650_v2, %v81_v37  ;;  %v95_v41 = vld [vmem:[%s5335_s0 + $0x288] sm:$0xff] }
  0x3c   :  { %v3003_v49 = vpack.c.bf16 %v857_v40, %v856_v39  ;;  %3518 = vst [vmem:[%s5338_s3 + $0xe8] sm:$0xff] %v2998_v44   ;;  %v605_v54 = vadd.f32 %v3657_v5, %v342_v46  ;;  %v860_v55 = vmax.f32 %v604_v47, 0.0  ;;  %v345_v56 = vmul.f32 %v3650_v2, %v82_v42  ;;  %v96_v46 = vld [vmem:[%s5335_s0 + $0x290] sm:$0xff]  ;;  %v97_v47 = vld [vmem:[%s5335_s0 + $0x298] sm:$0xff] }
  0x3d   :  { %v346_v57 = vmul.f32 %v3650_v2, %v83_v43  ;;  %v3008_v59 = vpack.c.bf16 %v859_v50, %v858_v45  ;;  %v606_v60 = vadd.f32 %v3657_v5, %v343_v51  ;;  %v607_v61 = vadd.f32 %v3657_v5, %v344_v52  ;;  %v98_v52 = vld [vmem:[%s5335_s0 + $0x2a0] sm:$0xff] }
  0x3e   :  { %3519 = vst [vmem:[%s5338_s3 + $0xf0] sm:$0xff] %v3003_v49   ;;  %v347_v62 = vmul.f32 %v3650_v2, %v84_v48  ;;  %v861_v63 = vmax.f32 %v605_v54, 0.0  ;;  %v608_v0 = vadd.f32 %v3657_v5, %v345_v56  ;;  %v348_v3 = vmul.f32 %v3650_v2, %v85_v53  ;;  %v99_v53 = vld [vmem:[%s5335_s0 + $0x2a8] sm:$0xff] }
  0x3f   :  { %v609_v1 = vadd.f32 %v3657_v5, %v346_v57  ;;  %3520 = vst [vmem:[%s5338_s3 + $0xf8] sm:$0xff] %v3008_v59   ;;  %v862_v6 = vmax.f32 %v606_v60, 0.0  ;;  %v863_v7 = vmax.f32 %v607_v61, 0.0  ;;  %v349_v9 = vmul.f32 %v3650_v2, %v86_v58  ;;  %v100_v58 = vld [vmem:[%s5335_s0 + $0x2b0] sm:$0xff] }
  0x40   :  { %v610_v8 = vadd.f32 %v3657_v5, %v347_v62  ;;  %v3013_v12 = vpack.c.bf16 %v861_v63, %v860_v55  ;;  %v864_v13 = vmax.f32 %v608_v0, 0.0  ;;  %v611_v15 = vadd.f32 %v3657_v5, %v348_v3  ;;  %v101_v63 = vld [vmem:[%s5335_s0 + $0x2b8] sm:$0xff] }
  0x41   :  { %v865_v14 = vmax.f32 %v609_v1, 0.0  ;;  %v3018_v18 = vpack.c.bf16 %v863_v7, %v862_v6  ;;  %v350_v20 = vmul.f32 %v3650_v2, %v87_v4  ;;  %v612_v21 = vadd.f32 %v3657_v5, %v349_v9  ;;  %v102_v6 = vld [vmem:[%s5335_s0 + $0x2c0] sm:$0xff] }
  0x42   :  { %v866_v19 = vmax.f32 %v610_v8, 0.0  ;;  %3521 = vst [vmem:[%s5338_s3 + $0x100] sm:$0xff] %v3013_v12   ;;  %v867_v24 = vmax.f32 %v611_v15, 0.0  ;;  %v351_v25 = vmul.f32 %v3650_v2, %v88_v10  ;;  %v352_v26 = vmul.f32 %v3650_v2, %v89_v11  ;;  %v103_v15 = vld [vmem:[%s5335_s0 + $0x2c8] sm:$0xff] }
  0x43   :  { %v3023_v23 = vpack.c.bf16 %v865_v14, %v864_v13  ;;  %3522 = vst [vmem:[%s5338_s3 + $0x108] sm:$0xff] %v3018_v18   ;;  %v613_v28 = vadd.f32 %v3657_v5, %v350_v20  ;;  %v868_v29 = vmax.f32 %v612_v21, 0.0  ;;  %v353_v30 = vmul.f32 %v3650_v2, %v90_v16  ;;  %v104_v20 = vld [vmem:[%s5335_s0 + $0x2d0] sm:$0xff]  ;;  %v105_v21 = vld [vmem:[%s5335_s0 + $0x2d8] sm:$0xff] }
  0x44   :  { %v354_v31 = vmul.f32 %v3650_v2, %v91_v17  ;;  %v3028_v33 = vpack.c.bf16 %v867_v24, %v866_v19  ;;  %v614_v34 = vadd.f32 %v3657_v5, %v351_v25  ;;  %v615_v35 = vadd.f32 %v3657_v5, %v352_v26  ;;  %v106_v26 = vld [vmem:[%s5335_s0 + $0x2e0] sm:$0xff] }
  0x45   :  { %3523 = vst [vmem:[%s5338_s3 + $0x110] sm:$0xff] %v3023_v23   ;;  %v355_v36 = vmul.f32 %v3650_v2, %v92_v22  ;;  %v869_v37 = vmax.f32 %v613_v28, 0.0  ;;  %v616_v38 = vadd.f32 %v3657_v5, %v353_v30  ;;  %v356_v40 = vmul.f32 %v3650_v2, %v93_v27  ;;  %v107_v27 = vld [vmem:[%s5335_s0 + $0x2e8] sm:$0xff] }
  0x46   :  { %v617_v39 = vadd.f32 %v3657_v5, %v354_v31  ;;  %3524 = vst [vmem:[%s5338_s3 + $0x118] sm:$0xff] %v3028_v33   ;;  %v870_v42 = vmax.f32 %v614_v34, 0.0  ;;  %v871_v43 = vmax.f32 %v615_v35, 0.0  ;;  %v357_v45 = vmul.f32 %v3650_v2, %v94_v32  ;;  %v108_v32 = vld [vmem:[%s5335_s0 + $0x2f0] sm:$0xff] }
  0x47   :  { %v618_v44 = vadd.f32 %v3657_v5, %v355_v36  ;;  %v3033_v48 = vpack.c.bf16 %v869_v37, %v868_v29  ;;  %v872_v49 = vmax.f32 %v616_v38, 0.0  ;;  %v619_v51 = vadd.f32 %v3657_v5, %v356_v40  ;;  %v109_v37 = vld [vmem:[%s5335_s0 + $0x2f8] sm:$0xff] }
  0x48   :  { %v873_v50 = vmax.f32 %v617_v39, 0.0  ;;  %v3038_v54 = vpack.c.bf16 %v871_v43, %v870_v42  ;;  %v358_v56 = vmul.f32 %v3650_v2, %v95_v41  ;;  %v620_v57 = vadd.f32 %v3657_v5, %v357_v45  ;;  %v110_v42 = vld [vmem:[%s5335_s0 + $0x300] sm:$0xff] }
  0x49   :  { %v874_v55 = vmax.f32 %v618_v44, 0.0  ;;  %3525 = vst [vmem:[%s5338_s3 + $0x120] sm:$0xff] %v3033_v48   ;;  %v875_v60 = vmax.f32 %v619_v51, 0.0  ;;  %v359_v61 = vmul.f32 %v3650_v2, %v96_v46  ;;  %v360_v62 = vmul.f32 %v3650_v2, %v97_v47  ;;  %v111_v51 = vld [vmem:[%s5335_s0 + $0x308] sm:$0xff] }
  0x4a   :  { %v3043_v59 = vpack.c.bf16 %v873_v50, %v872_v49  ;;  %3526 = vst [vmem:[%s5338_s3 + $0x128] sm:$0xff] %v3038_v54   ;;  %v621_v0 = vadd.f32 %v3657_v5, %v358_v56  ;;  %v876_v1 = vmax.f32 %v620_v57, 0.0  ;;  %v361_v3 = vmul.f32 %v3650_v2, %v98_v52  ;;  %v112_v56 = vld [vmem:[%s5335_s0 + $0x310] sm:$0xff]  ;;  %v113_v57 = vld [vmem:[%s5335_s0 + $0x318] sm:$0xff] }
  0x4b   :  { %v362_v4 = vmul.f32 %v3650_v2, %v99_v53  ;;  %v3048_v7 = vpack.c.bf16 %v875_v60, %v874_v55  ;;  %v622_v8 = vadd.f32 %v3657_v5, %v359_v61  ;;  %v623_v9 = vadd.f32 %v3657_v5, %v360_v62  ;;  %v114_v62 = vld [vmem:[%s5335_s0 + $0x320] sm:$0xff] }
  0x4c   :  { %3527 = vst [vmem:[%s5338_s3 + $0x130] sm:$0xff] %v3043_v59   ;;  %v363_v10 = vmul.f32 %v3650_v2, %v100_v58  ;;  %v877_v11 = vmax.f32 %v621_v0, 0.0  ;;  %v624_v12 = vadd.f32 %v3657_v5, %v361_v3  ;;  %v364_v14 = vmul.f32 %v3650_v2, %v101_v63  ;;  %v115_v63 = vld [vmem:[%s5335_s0 + $0x328] sm:$0xff] }
  0x4d   :  { %v625_v13 = vadd.f32 %v3657_v5, %v362_v4  ;;  %3528 = vst [vmem:[%s5338_s3 + $0x138] sm:$0xff] %v3048_v7   ;;  %v878_v16 = vmax.f32 %v622_v8, 0.0  ;;  %v879_v17 = vmax.f32 %v623_v9, 0.0  ;;  %v365_v19 = vmul.f32 %v3650_v2, %v102_v6  ;;  %v116_v6 = vld [vmem:[%s5335_s0 + $0x330] sm:$0xff] }
  0x4e   :  { %v626_v18 = vadd.f32 %v3657_v5, %v363_v10  ;;  %v3053_v22 = vpack.c.bf16 %v877_v11, %v876_v1  ;;  %v880_v23 = vmax.f32 %v624_v12, 0.0  ;;  %v627_v25 = vadd.f32 %v3657_v5, %v364_v14  ;;  %v117_v11 = vld [vmem:[%s5335_s0 + $0x338] sm:$0xff] }
  0x4f   :  { %v881_v24 = vmax.f32 %v625_v13, 0.0  ;;  %v3058_v28 = vpack.c.bf16 %v879_v17, %v878_v16  ;;  %v366_v30 = vmul.f32 %v3650_v2, %v103_v15  ;;  %v628_v31 = vadd.f32 %v3657_v5, %v365_v19  ;;  %v118_v16 = vld [vmem:[%s5335_s0 + $0x340] sm:$0xff] }
  0x50   :  { %v882_v29 = vmax.f32 %v626_v18, 0.0  ;;  %3529 = vst [vmem:[%s5338_s3 + $0x140] sm:$0xff] %v3053_v22   ;;  %v883_v34 = vmax.f32 %v627_v25, 0.0  ;;  %v367_v35 = vmul.f32 %v3650_v2, %v104_v20  ;;  %v368_v36 = vmul.f32 %v3650_v2, %v105_v21  ;;  %v119_v25 = vld [vmem:[%s5335_s0 + $0x348] sm:$0xff] }
  0x51   :  { %v3063_v33 = vpack.c.bf16 %v881_v24, %v880_v23  ;;  %3530 = vst [vmem:[%s5338_s3 + $0x148] sm:$0xff] %v3058_v28   ;;  %v629_v38 = vadd.f32 %v3657_v5, %v366_v30  ;;  %v884_v39 = vmax.f32 %v628_v31, 0.0  ;;  %v369_v40 = vmul.f32 %v3650_v2, %v106_v26  ;;  %v120_v30 = vld [vmem:[%s5335_s0 + $0x350] sm:$0xff]  ;;  %v121_v31 = vld [vmem:[%s5335_s0 + $0x358] sm:$0xff] }
  0x52   :  { %v370_v41 = vmul.f32 %v3650_v2, %v107_v27  ;;  %v3068_v43 = vpack.c.bf16 %v883_v34, %v882_v29  ;;  %v630_v44 = vadd.f32 %v3657_v5, %v367_v35  ;;  %v631_v45 = vadd.f32 %v3657_v5, %v368_v36  ;;  %v4330_v35 = vld [vmem:[%s5337_s2] ss:$0 sm:$0xff]  ;;  %v123_v36 = vld [vmem:[%s5335_s0 + $0x368] sm:$0xff] }
  0x53   :  { %3531 = vst [vmem:[%s5338_s3 + $0x150] sm:$0xff] %v3063_v33   ;;  %v371_v46 = vmul.f32 %v3650_v2, %v108_v32  ;;  %v885_v47 = vmax.f32 %v629_v38, 0.0  ;;  %v632_v48 = vadd.f32 %v3657_v5, %v369_v40  ;;  %v372_v50 = vmul.f32 %v3650_v2, %v109_v37 }
  0x54   :  { %v633_v49 = vadd.f32 %v3657_v5, %v370_v41  ;;  %3532 = vst [vmem:[%s5338_s3 + $0x158] sm:$0xff] %v3068_v43   ;;  %v886_v52 = vmax.f32 %v630_v44, 0.0  ;;  %v887_v53 = vmax.f32 %v631_v45, 0.0  ;;  %v373_v55 = vmul.f32 %v3650_v2, %v110_v42  ;;  %v124_v42 = vld [vmem:[%s5335_s0 + $0x370] sm:$0xff] }
  0x55   :  { %v634_v54 = vadd.f32 %v3657_v5, %v371_v46  ;;  %v3073_v58 = vpack.c.bf16 %v885_v47, %v884_v39  ;;  %v888_v59 = vmax.f32 %v632_v48, 0.0  ;;  %v635_v61 = vadd.f32 %v3657_v5, %v372_v50  ;;  %v4342_v39 = vld [vmem:[%s5336_s1] ss:$0 sm:$0xff]  ;;  %v125_v47 = vld [vmem:[%s5335_s0 + $0x378] sm:$0xff] }
  0x56   :  { %v889_v60 = vmax.f32 %v633_v49, 0.0  ;;  %v3078_v0 = vpack.c.bf16 %v887_v53, %v886_v52  ;;  %v374_v3 = vmul.f32 %v3650_v2, %v111_v51  ;;  %v636_v4 = vadd.f32 %v3657_v5, %v373_v55  ;;  %v126_v52 = vld [vmem:[%s5335_s0 + $0x380] sm:$0xff] }
  0x57   :  { %v890_v1 = vmax.f32 %v634_v54, 0.0  ;;  %3533 = vst [vmem:[%s5338_s3 + $0x160] sm:$0xff] %v3073_v58   ;;  %v891_v8 = vmax.f32 %v635_v61, 0.0  ;;  %v375_v9 = vmul.f32 %v3650_v2, %v112_v56  ;;  %v376_v10 = vmul.f32 %v3650_v2, %v113_v57  ;;  %v127_v61 = vld [vmem:[%s5335_s0 + $0x388] sm:$0xff] }
  0x58   :  { %v3083_v7 = vpack.c.bf16 %v889_v60, %v888_v59  ;;  %3534 = vst [vmem:[%s5338_s3 + $0x168] sm:$0xff] %v3078_v0   ;;  %v637_v12 = vadd.f32 %v3657_v5, %v374_v3  ;;  %v892_v13 = vmax.f32 %v636_v4, 0.0  ;;  %v377_v14 = vmul.f32 %v3650_v2, %v114_v62  ;;  %v128_v3 = vld [vmem:[%s5335_s0 + $0x390] sm:$0xff]  ;;  %v129_v4 = vld [vmem:[%s5335_s0 + $0x398] sm:$0xff] }
  0x59   :  { %v378_v15 = vmul.f32 %v3650_v2, %v115_v63  ;;  %v3088_v17 = vpack.c.bf16 %v891_v8, %v890_v1  ;;  %v638_v18 = vadd.f32 %v3657_v5, %v375_v9  ;;  %v639_v19 = vadd.f32 %v3657_v5, %v376_v10  ;;  %v130_v10 = vld [vmem:[%s5335_s0 + $0x3a0] sm:$0xff] }
  0x5a   :  { %3535 = vst [vmem:[%s5338_s3 + $0x170] sm:$0xff] %v3083_v7   ;;  %v379_v20 = vmul.f32 %v3650_v2, %v116_v6  ;;  %v893_v21 = vmax.f32 %v637_v12, 0.0  ;;  %v640_v22 = vadd.f32 %v3657_v5, %v377_v14  ;;  %v380_v24 = vmul.f32 %v3650_v2, %v117_v11  ;;  %v131_v11 = vld [vmem:[%s5335_s0 + $0x3a8] sm:$0xff] }
  0x5b   :  { %v641_v23 = vadd.f32 %v3657_v5, %v378_v15  ;;  %3536 = vst [vmem:[%s5338_s3 + $0x178] sm:$0xff] %v3088_v17   ;;  %v894_v26 = vmax.f32 %v638_v18, 0.0  ;;  %v895_v27 = vmax.f32 %v639_v19, 0.0  ;;  %v381_v29 = vmul.f32 %v3650_v2, %v118_v16  ;;  %v122_v2 = vld [vmem:[%s5335_s0 + $0x360] sm:$0xff]  ;;  %v132_v16 = vld [vmem:[%s5335_s0 + $0x3b0] sm:$0xff] }
  0x5c   :  { %v642_v28 = vadd.f32 %v3657_v5, %v379_v20  ;;  %v3093_v32 = vpack.c.bf16 %v893_v21, %v892_v13  ;;  %v896_v33 = vmax.f32 %v640_v22, 0.0  ;;  %v643_v5 = vadd.f32 %v4330_v35, %v380_v24  ;;  %v133_v21 = vld [vmem:[%s5335_s0 + $0x3b8] sm:$0xff] }
  0x5d   :  { %v897_v34 = vmax.f32 %v641_v23, 0.0  ;;  %v3098_v37 = vpack.c.bf16 %v895_v27, %v894_v26  ;;  %v382_v40 = vmul.f32 %v4342_v39, %v119_v25  ;;  %v644_v41 = vadd.f32 %v4330_v35, %v381_v29  ;;  %v134_v26 = vld [vmem:[%s5335_s0 + $0x3c0] sm:$0xff] }
  0x5e   :  { %v898_v38 = vmax.f32 %v642_v28, 0.0  ;;  %3537 = vst [vmem:[%s5338_s3 + $0x180] sm:$0xff] %v3093_v32   ;;  %v899_v44 = vmax.f32 %v643_v5, 0.0  ;;  %v383_v45 = vmul.f32 %v4342_v39, %v120_v30  ;;  %v384_v46 = vmul.f32 %v4342_v39, %v121_v31  ;;  %v135_v5 = vld [vmem:[%s5335_s0 + $0x3c8] sm:$0xff] }
  0x5f   :  { %v3103_v43 = vpack.c.bf16 %v897_v34, %v896_v33  ;;  %3538 = vst [vmem:[%s5338_s3 + $0x188] sm:$0xff] %v3098_v37   ;;  %v645_v48 = vadd.f32 %v4330_v35, %v382_v40  ;;  %v900_v49 = vmax.f32 %v644_v41, 0.0  ;;  %v385_v50 = vmul.f32 %v4342_v39, %v122_v2  ;;  %v136_v40 = vld [vmem:[%s5335_s0 + $0x3d0] sm:$0xff]  ;;  %v137_v41 = vld [vmem:[%s5335_s0 + $0x3d8] sm:$0xff] }
  0x60   :  { %v386_v51 = vmul.f32 %v4342_v39, %v123_v36  ;;  %v3108_v53 = vpack.c.bf16 %v899_v44, %v898_v38  ;;  %v646_v54 = vadd.f32 %v4330_v35, %v383_v45  ;;  %v647_v55 = vadd.f32 %v4330_v35, %v384_v46  ;;  %v138_v46 = vld [vmem:[%s5335_s0 + $0x3e0] sm:$0xff] }
  0x61   :  { %3539 = vst [vmem:[%s5338_s3 + $0x190] sm:$0xff] %v3103_v43   ;;  %v387_v56 = vmul.f32 %v4342_v39, %v124_v42  ;;  %v901_v57 = vmax.f32 %v645_v48, 0.0  ;;  %v648_v58 = vadd.f32 %v4330_v35, %v385_v50  ;;  %v388_v60 = vmul.f32 %v4342_v39, %v125_v47  ;;  %v139_v47 = vld [vmem:[%s5335_s0 + $0x3e8] sm:$0xff] }
  0x62   :  { %v649_v59 = vadd.f32 %v4330_v35, %v386_v51  ;;  %3540 = vst [vmem:[%s5338_s3 + $0x198] sm:$0xff] %v3108_v53   ;;  %v902_v62 = vmax.f32 %v646_v54, 0.0  ;;  %v903_v63 = vmax.f32 %v647_v55, 0.0  ;;  %v389_v1 = vmul.f32 %v4342_v39, %v126_v52  ;;  %v140_v52 = vld [vmem:[%s5335_s0 + $0x3f0] sm:$0xff] }
  0x63   :  { %v650_v0 = vadd.f32 %v4330_v35, %v387_v56  ;;  %v3113_v6 = vpack.c.bf16 %v901_v57, %v900_v49  ;;  %v904_v7 = vmax.f32 %v648_v58, 0.0  ;;  %v651_v9 = vadd.f32 %v4330_v35, %v388_v60  ;;  %v141_v57 = vld [vmem:[%s5335_s0 + $0x3f8] sm:$0xff] }
  0x64   :  { %v905_v8 = vmax.f32 %v649_v59, 0.0  ;;  %v3118_v12 = vpack.c.bf16 %v903_v63, %v902_v62  ;;  %v390_v14 = vmul.f32 %v4342_v39, %v127_v61  ;;  %v652_v15 = vadd.f32 %v4330_v35, %v389_v1  ;;  %v142_v62 = vld [vmem:[%s5335_s0 + $0x400] sm:$0xff] }
  0x65   :  { %v906_v13 = vmax.f32 %v650_v0, 0.0  ;;  %3541 = vst [vmem:[%s5338_s3 + $0x1a0] sm:$0xff] %v3113_v6   ;;  %v907_v18 = vmax.f32 %v651_v9, 0.0  ;;  %v391_v19 = vmul.f32 %v4342_v39, %v128_v3  ;;  %v392_v20 = vmul.f32 %v4342_v39, %v129_v4  ;;  %v143_v9 = vld [vmem:[%s5335_s0 + $0x408] sm:$0xff] }
  0x66   :  { %v3123_v17 = vpack.c.bf16 %v905_v8, %v904_v7  ;;  %3542 = vst [vmem:[%s5338_s3 + $0x1a8] sm:$0xff] %v3118_v12   ;;  %v653_v22 = vadd.f32 %v4330_v35, %v390_v14  ;;  %v908_v23 = vmax.f32 %v652_v15, 0.0  ;;  %v393_v24 = vmul.f32 %v4342_v39, %v130_v10  ;;  %v144_v14 = vld [vmem:[%s5335_s0 + $0x410] sm:$0xff]  ;;  %v145_v15 = vld [vmem:[%s5335_s0 + $0x418] sm:$0xff] }
  0x67   :  { %v394_v25 = vmul.f32 %v4342_v39, %v131_v11  ;;  %v3128_v27 = vpack.c.bf16 %v907_v18, %v906_v13  ;;  %v654_v28 = vadd.f32 %v4330_v35, %v391_v19  ;;  %v655_v29 = vadd.f32 %v4330_v35, %v392_v20  ;;  %v146_v20 = vld [vmem:[%s5335_s0 + $0x420] sm:$0xff] }
  0x68   :  { %3543 = vst [vmem:[%s5338_s3 + $0x1b0] sm:$0xff] %v3123_v17   ;;  %v395_v30 = vmul.f32 %v4342_v39, %v132_v16  ;;  %v909_v31 = vmax.f32 %v653_v22, 0.0  ;;  %v656_v32 = vadd.f32 %v4330_v35, %v393_v24  ;;  %v396_v34 = vmul.f32 %v4342_v39, %v133_v21  ;;  %v147_v21 = vld [vmem:[%s5335_s0 + $0x428] sm:$0xff] }
  0x69   :  { %v657_v33 = vadd.f32 %v4330_v35, %v394_v25  ;;  %3544 = vst [vmem:[%s5338_s3 + $0x1b8] sm:$0xff] %v3128_v27   ;;  %v910_v2 = vmax.f32 %v654_v28, 0.0  ;;  %v911_v36 = vmax.f32 %v655_v29, 0.0  ;;  %v397_v38 = vmul.f32 %v4342_v39, %v134_v26  ;;  %v148_v26 = vld [vmem:[%s5335_s0 + $0x430] sm:$0xff] }
  0x6a   :  { %v658_v37 = vadd.f32 %v4330_v35, %v395_v30  ;;  %v3133_v42 = vpack.c.bf16 %v909_v31, %v908_v23  ;;  %v912_v43 = vmax.f32 %v656_v32, 0.0  ;;  %v659_v45 = vadd.f32 %v4330_v35, %v396_v34  ;;  %v149_v31 = vld [vmem:[%s5335_s0 + $0x438] sm:$0xff] }
  0x6b   :  { %v913_v44 = vmax.f32 %v657_v33, 0.0  ;;  %v3138_v48 = vpack.c.bf16 %v911_v36, %v910_v2  ;;  %v398_v50 = vmul.f32 %v4342_v39, %v135_v5  ;;  %v660_v51 = vadd.f32 %v4330_v35, %v397_v38  ;;  %v150_v2 = vld [vmem:[%s5335_s0 + $0x440] sm:$0xff] }
  0x6c   :  { %v914_v49 = vmax.f32 %v658_v37, 0.0  ;;  %3545 = vst [vmem:[%s5338_s3 + $0x1c0] sm:$0xff] %v3133_v42   ;;  %v915_v54 = vmax.f32 %v659_v45, 0.0  ;;  %v399_v55 = vmul.f32 %v4342_v39, %v136_v40  ;;  %v400_v56 = vmul.f32 %v4342_v39, %v137_v41  ;;  %v151_v45 = vld [vmem:[%s5335_s0 + $0x448] sm:$0xff] }
  0x6d   :  { %v3143_v53 = vpack.c.bf16 %v913_v44, %v912_v43  ;;  %3546 = vst [vmem:[%s5338_s3 + $0x1c8] sm:$0xff] %v3138_v48   ;;  %v661_v58 = vadd.f32 %v4330_v35, %v398_v50  ;;  %v916_v59 = vmax.f32 %v660_v51, 0.0  ;;  %v401_v60 = vmul.f32 %v4342_v39, %v138_v46  ;;  %v152_v50 = vld [vmem:[%s5335_s0 + $0x450] sm:$0xff]  ;;  %v153_v51 = vld [vmem:[%s5335_s0 + $0x458] sm:$0xff] }
  0x6e   :  { %v402_v61 = vmul.f32 %v4342_v39, %v139_v47  ;;  %v3148_v63 = vpack.c.bf16 %v915_v54, %v914_v49  ;;  %v662_v0 = vadd.f32 %v4330_v35, %v399_v55  ;;  %v663_v1 = vadd.f32 %v4330_v35, %v400_v56  ;;  %v154_v56 = vld [vmem:[%s5335_s0 + $0x460] sm:$0xff] }
  0x6f   :  { %3547 = vst [vmem:[%s5338_s3 + $0x1d0] sm:$0xff] %v3143_v53   ;;  %v403_v3 = vmul.f32 %v4342_v39, %v140_v52  ;;  %v917_v4 = vmax.f32 %v661_v58, 0.0  ;;  %v664_v6 = vadd.f32 %v4330_v35, %v401_v60  ;;  %v404_v8 = vmul.f32 %v4342_v39, %v141_v57  ;;  %v155_v57 = vld [vmem:[%s5335_s0 + $0x468] sm:$0xff] }
  0x70   :  { %v665_v7 = vadd.f32 %v4330_v35, %v402_v61  ;;  %3548 = vst [vmem:[%s5338_s3 + $0x1d8] sm:$0xff] %v3148_v63   ;;  %v918_v10 = vmax.f32 %v662_v0, 0.0  ;;  %v919_v11 = vmax.f32 %v663_v1, 0.0  ;;  %v405_v13 = vmul.f32 %v4342_v39, %v142_v62  ;;  %v156_v62 = vld [vmem:[%s5335_s0 + $0x470] sm:$0xff] }
  0x71   :  { %v666_v12 = vadd.f32 %v4330_v35, %v403_v3  ;;  %v3153_v16 = vpack.c.bf16 %v917_v4, %v916_v59  ;;  %v920_v17 = vmax.f32 %v664_v6, 0.0  ;;  %v667_v19 = vadd.f32 %v4330_v35, %v404_v8  ;;  %v157_v4 = vld [vmem:[%s5335_s0 + $0x478] sm:$0xff] }
  0x72   :  { %v921_v18 = vmax.f32 %v665_v7, 0.0  ;;  %v3158_v22 = vpack.c.bf16 %v919_v11, %v918_v10  ;;  %v406_v24 = vmul.f32 %v4342_v39, %v143_v9  ;;  %v668_v25 = vadd.f32 %v4330_v35, %v405_v13  ;;  %v158_v10 = vld [vmem:[%s5335_s0 + $0x480] sm:$0xff] }
  0x73   :  { %v922_v23 = vmax.f32 %v666_v12, 0.0  ;;  %3549 = vst [vmem:[%s5338_s3 + $0x1e0] sm:$0xff] %v3153_v16   ;;  %v923_v28 = vmax.f32 %v667_v19, 0.0  ;;  %v407_v29 = vmul.f32 %v4342_v39, %v144_v14  ;;  %v408_v30 = vmul.f32 %v4342_v39, %v145_v15  ;;  %v159_v19 = vld [vmem:[%s5335_s0 + $0x488] sm:$0xff] }
  0x74   :  { %v3163_v27 = vpack.c.bf16 %v921_v18, %v920_v17  ;;  %3550 = vst [vmem:[%s5338_s3 + $0x1e8] sm:$0xff] %v3158_v22   ;;  %v669_v32 = vadd.f32 %v4330_v35, %v406_v24  ;;  %v924_v33 = vmax.f32 %v668_v25, 0.0  ;;  %v409_v34 = vmul.f32 %v4342_v39, %v146_v20  ;;  %v160_v24 = vld [vmem:[%s5335_s0 + $0x490] sm:$0xff]  ;;  %v161_v25 = vld [vmem:[%s5335_s0 + $0x498] sm:$0xff] }
  0x75   :  { %v410_v5 = vmul.f32 %v4342_v39, %v147_v21  ;;  %v3168_v36 = vpack.c.bf16 %v923_v28, %v922_v23  ;;  %v670_v37 = vadd.f32 %v4330_v35, %v407_v29  ;;  %v671_v38 = vadd.f32 %v4330_v35, %v408_v30  ;;  %v162_v30 = vld [vmem:[%s5335_s0 + $0x4a0] sm:$0xff] }
  0x76   :  { %3551 = vst [vmem:[%s5338_s3 + $0x1f0] sm:$0xff] %v3163_v27   ;;  %v411_v40 = vmul.f32 %v4342_v39, %v148_v26  ;;  %v925_v41 = vmax.f32 %v669_v32, 0.0  ;;  %v672_v42 = vadd.f32 %v4330_v35, %v409_v34  ;;  %v412_v44 = vmul.f32 %v4342_v39, %v149_v31  ;;  %v163_v31 = vld [vmem:[%s5335_s0 + $0x4a8] sm:$0xff] }
  0x77   :  { %v673_v43 = vadd.f32 %v4330_v35, %v410_v5  ;;  %3552 = vst [vmem:[%s5338_s3 + $0x1f8] sm:$0xff] %v3168_v36   ;;  %v926_v46 = vmax.f32 %v670_v37, 0.0  ;;  %v927_v47 = vmax.f32 %v671_v38, 0.0  ;;  %v413_v49 = vmul.f32 %v4342_v39, %v150_v2  ;;  %v164_v2 = vld [vmem:[%s5335_s0 + $0x4b0] sm:$0xff] }
  0x78   :  { %v674_v48 = vadd.f32 %v4330_v35, %v411_v40  ;;  %v3173_v52 = vpack.c.bf16 %v925_v41, %v924_v33  ;;  %v928_v53 = vmax.f32 %v672_v42, 0.0  ;;  %v675_v55 = vadd.f32 %v4330_v35, %v412_v44  ;;  %v165_v41 = vld [vmem:[%s5335_s0 + $0x4b8] sm:$0xff] }
  0x79   :  { %v929_v54 = vmax.f32 %v673_v43, 0.0  ;;  %v3178_v58 = vpack.c.bf16 %v927_v47, %v926_v46  ;;  %v414_v60 = vmul.f32 %v4342_v39, %v151_v45  ;;  %v676_v61 = vadd.f32 %v4330_v35, %v413_v49  ;;  %v166_v46 = vld [vmem:[%s5335_s0 + $0x4c0] sm:$0xff] }
  0x7a   :  { %v930_v59 = vmax.f32 %v674_v48, 0.0  ;;  %3553 = vst [vmem:[%s5338_s3 + $0x200] sm:$0xff] %v3173_v52   ;;  %v931_v0 = vmax.f32 %v675_v55, 0.0  ;;  %v415_v1 = vmul.f32 %v4342_v39, %v152_v50  ;;  %v416_v3 = vmul.f32 %v4342_v39, %v153_v51  ;;  %v167_v55 = vld [vmem:[%s5335_s0 + $0x4c8] sm:$0xff] }
  0x7b   :  { %v3183_v63 = vpack.c.bf16 %v929_v54, %v928_v53  ;;  %3554 = vst [vmem:[%s5338_s3 + $0x208] sm:$0xff] %v3178_v58   ;;  %v677_v6 = vadd.f32 %v4330_v35, %v414_v60  ;;  %v932_v7 = vmax.f32 %v676_v61, 0.0  ;;  %v417_v8 = vmul.f32 %v4342_v39, %v154_v56  ;;  %v168_v60 = vld [vmem:[%s5335_s0 + $0x4d0] sm:$0xff]  ;;  %v169_v61 = vld [vmem:[%s5335_s0 + $0x4d8] sm:$0xff] }
  0x7c   :  { %v418_v9 = vmul.f32 %v4342_v39, %v155_v57  ;;  %v3188_v11 = vpack.c.bf16 %v931_v0, %v930_v59  ;;  %v678_v12 = vadd.f32 %v4330_v35, %v415_v1  ;;  %v679_v13 = vadd.f32 %v4330_v35, %v416_v3  ;;  %v170_v3 = vld [vmem:[%s5335_s0 + $0x4e0] sm:$0xff] }
  0x7d   :  { %3555 = vst [vmem:[%s5338_s3 + $0x210] sm:$0xff] %v3183_v63   ;;  %v419_v14 = vmul.f32 %v4342_v39, %v156_v62  ;;  %v933_v15 = vmax.f32 %v677_v6, 0.0  ;;  %v680_v16 = vadd.f32 %v4330_v35, %v417_v8  ;;  %v420_v18 = vmul.f32 %v4342_v39, %v157_v4  ;;  %v171_v4 = vld [vmem:[%s5335_s0 + $0x4e8] sm:$0xff] }
  0x7e   :  { %v681_v17 = vadd.f32 %v4330_v35, %v418_v9  ;;  %3556 = vst [vmem:[%s5338_s3 + $0x218] sm:$0xff] %v3188_v11   ;;  %v934_v20 = vmax.f32 %v678_v12, 0.0  ;;  %v935_v21 = vmax.f32 %v679_v13, 0.0  ;;  %v421_v23 = vmul.f32 %v4342_v39, %v158_v10  ;;  %v172_v10 = vld [vmem:[%s5335_s0 + $0x4f0] sm:$0xff] }
  0x7f   :  { %v682_v22 = vadd.f32 %v4330_v35, %v419_v14  ;;  %v3193_v26 = vpack.c.bf16 %v933_v15, %v932_v7  ;;  %v936_v27 = vmax.f32 %v680_v16, 0.0  ;;  %v683_v29 = vadd.f32 %v4330_v35, %v420_v18  ;;  %v173_v15 = vld [vmem:[%s5335_s0 + $0x4f8] sm:$0xff] }
  0x80   :  { %v937_v28 = vmax.f32 %v681_v17, 0.0  ;;  %v3198_v32 = vpack.c.bf16 %v935_v21, %v934_v20  ;;  %v422_v34 = vmul.f32 %v4342_v39, %v159_v19  ;;  %v684_v5 = vadd.f32 %v4330_v35, %v421_v23  ;;  %v174_v20 = vld [vmem:[%s5335_s0 + $0x500] sm:$0xff] }
  0x81   :  { %v938_v33 = vmax.f32 %v682_v22, 0.0  ;;  %3557 = vst [vmem:[%s5338_s3 + $0x220] sm:$0xff] %v3193_v26   ;;  %v939_v37 = vmax.f32 %v683_v29, 0.0  ;;  %v423_v38 = vmul.f32 %v4342_v39, %v160_v24  ;;  %v424_v40 = vmul.f32 %v4342_v39, %v161_v25  ;;  %v175_v29 = vld [vmem:[%s5335_s0 + $0x508] sm:$0xff] }
  0x82   :  { %v3203_v36 = vpack.c.bf16 %v937_v28, %v936_v27  ;;  %3558 = vst [vmem:[%s5338_s3 + $0x228] sm:$0xff] %v3198_v32   ;;  %v685_v42 = vadd.f32 %v4330_v35, %v422_v34  ;;  %v940_v43 = vmax.f32 %v684_v5, 0.0  ;;  %v425_v44 = vmul.f32 %v4342_v39, %v162_v30  ;;  %v176_v34 = vld [vmem:[%s5335_s0 + $0x510] sm:$0xff]  ;;  %v177_v5 = vld [vmem:[%s5335_s0 + $0x518] sm:$0xff] }
  0x83   :  { %v426_v45 = vmul.f32 %v4342_v39, %v163_v31  ;;  %v3208_v47 = vpack.c.bf16 %v939_v37, %v938_v33  ;;  %v686_v48 = vadd.f32 %v4330_v35, %v423_v38  ;;  %v687_v49 = vadd.f32 %v4330_v35, %v424_v40  ;;  %v178_v40 = vld [vmem:[%s5335_s0 + $0x520] sm:$0xff] }
  0x84   :  { %3559 = vst [vmem:[%s5338_s3 + $0x230] sm:$0xff] %v3203_v36   ;;  %v427_v50 = vmul.f32 %v4342_v39, %v164_v2  ;;  %v941_v51 = vmax.f32 %v685_v42, 0.0  ;;  %v688_v52 = vadd.f32 %v4330_v35, %v425_v44  ;;  %v428_v54 = vmul.f32 %v4342_v39, %v165_v41  ;;  %v179_v41 = vld [vmem:[%s5335_s0 + $0x528] sm:$0xff] }
  0x85   :  { %v689_v53 = vadd.f32 %v4330_v35, %v426_v45  ;;  %3560 = vst [vmem:[%s5338_s3 + $0x238] sm:$0xff] %v3208_v47   ;;  %v942_v56 = vmax.f32 %v686_v48, 0.0  ;;  %v943_v57 = vmax.f32 %v687_v49, 0.0  ;;  %v429_v59 = vmul.f32 %v4342_v39, %v166_v46  ;;  %v180_v46 = vld [vmem:[%s5335_s0 + $0x530] sm:$0xff] }
  0x86   :  { %v690_v58 = vadd.f32 %v4330_v35, %v427_v50  ;;  %v3213_v62 = vpack.c.bf16 %v941_v51, %v940_v43  ;;  %v944_v63 = vmax.f32 %v688_v52, 0.0  ;;  %v691_v1 = vadd.f32 %v4330_v35, %v428_v54  ;;  %v181_v51 = vld [vmem:[%s5335_s0 + $0x538] sm:$0xff] }
  0x87   :  { %v945_v0 = vmax.f32 %v689_v53, 0.0  ;;  %v3218_v6 = vpack.c.bf16 %v943_v57, %v942_v56  ;;  %v430_v8 = vmul.f32 %v4342_v39, %v167_v55  ;;  %v692_v9 = vadd.f32 %v4330_v35, %v429_v59  ;;  %v182_v56 = vld [vmem:[%s5335_s0 + $0x540] sm:$0xff] }
  0x88   :  { %v946_v7 = vmax.f32 %v690_v58, 0.0  ;;  %3561 = vst [vmem:[%s5338_s3 + $0x240] sm:$0xff] %v3213_v62   ;;  %v947_v12 = vmax.f32 %v691_v1, 0.0  ;;  %v431_v13 = vmul.f32 %v4342_v39, %v168_v60  ;;  %v432_v14 = vmul.f32 %v4342_v39, %v169_v61  ;;  %v183_v1 = vld [vmem:[%s5335_s0 + $0x548] sm:$0xff] }
  0x89   :  { %v3223_v11 = vpack.c.bf16 %v945_v0, %v944_v63  ;;  %3562 = vst [vmem:[%s5338_s3 + $0x248] sm:$0xff] %v3218_v6   ;;  %v693_v16 = vadd.f32 %v4330_v35, %v430_v8  ;;  %v948_v17 = vmax.f32 %v692_v9, 0.0  ;;  %v433_v18 = vmul.f32 %v4342_v39, %v170_v3  ;;  %v184_v8 = vld [vmem:[%s5335_s0 + $0x550] sm:$0xff]  ;;  %v185_v9 = vld [vmem:[%s5335_s0 + $0x558] sm:$0xff] }
  0x8a   :  { %v434_v19 = vmul.f32 %v4342_v39, %v171_v4  ;;  %v3228_v21 = vpack.c.bf16 %v947_v12, %v946_v7  ;;  %v694_v22 = vadd.f32 %v4330_v35, %v431_v13  ;;  %v695_v23 = vadd.f32 %v4330_v35, %v432_v14  ;;  %v186_v14 = vld [vmem:[%s5335_s0 + $0x560] sm:$0xff] }
  0x8b   :  { %3563 = vst [vmem:[%s5338_s3 + $0x250] sm:$0xff] %v3223_v11   ;;  %v435_v24 = vmul.f32 %v4342_v39, %v172_v10  ;;  %v949_v25 = vmax.f32 %v693_v16, 0.0  ;;  %v696_v26 = vadd.f32 %v4330_v35, %v433_v18  ;;  %v436_v28 = vmul.f32 %v4342_v39, %v173_v15  ;;  %v187_v15 = vld [vmem:[%s5335_s0 + $0x568] sm:$0xff] }
  0x8c   :  { %v697_v27 = vadd.f32 %v4330_v35, %v434_v19  ;;  %3564 = vst [vmem:[%s5338_s3 + $0x258] sm:$0xff] %v3228_v21   ;;  %v950_v30 = vmax.f32 %v694_v22, 0.0  ;;  %v951_v31 = vmax.f32 %v695_v23, 0.0  ;;  %v437_v33 = vmul.f32 %v4342_v39, %v174_v20  ;;  %v188_v20 = vld [vmem:[%s5335_s0 + $0x570] sm:$0xff] }
  0x8d   :  { %v698_v32 = vadd.f32 %v4330_v35, %v435_v24  ;;  %v3233_v2 = vpack.c.bf16 %v949_v25, %v948_v17  ;;  %v952_v36 = vmax.f32 %v696_v26, 0.0  ;;  %v699_v38 = vadd.f32 %v4330_v35, %v436_v28  ;;  %v189_v25 = vld [vmem:[%s5335_s0 + $0x578] sm:$0xff] }
  0x8e   :  { %v953_v37 = vmax.f32 %v697_v27, 0.0  ;;  %v3238_v42 = vpack.c.bf16 %v951_v31, %v950_v30  ;;  %v438_v44 = vmul.f32 %v4342_v39, %v175_v29  ;;  %v700_v45 = vadd.f32 %v4330_v35, %v437_v33  ;;  %v190_v30 = vld [vmem:[%s5335_s0 + $0x580] sm:$0xff] }
  0x8f   :  { %v954_v43 = vmax.f32 %v698_v32, 0.0  ;;  %3565 = vst [vmem:[%s5338_s3 + $0x260] sm:$0xff] %v3233_v2   ;;  %v955_v48 = vmax.f32 %v699_v38, 0.0  ;;  %v439_v49 = vmul.f32 %v4342_v39, %v176_v34  ;;  %v440_v50 = vmul.f32 %v4342_v39, %v177_v5  ;;  %v191_v38 = vld [vmem:[%s5335_s0 + $0x588] sm:$0xff] }
  0x90   :  { %v3243_v47 = vpack.c.bf16 %v953_v37, %v952_v36  ;;  %3566 = vst [vmem:[%s5338_s3 + $0x268] sm:$0xff] %v3238_v42   ;;  %v701_v52 = vadd.f32 %v4330_v35, %v438_v44  ;;  %v956_v53 = vmax.f32 %v700_v45, 0.0  ;;  %v441_v54 = vmul.f32 %v4342_v39, %v178_v40  ;;  %v192_v44 = vld [vmem:[%s5335_s0 + $0x590] sm:$0xff]  ;;  %v193_v45 = vld [vmem:[%s5335_s0 + $0x598] sm:$0xff] }
  0x91   :  { %v442_v55 = vmul.f32 %v4342_v39, %v179_v41  ;;  %v3248_v57 = vpack.c.bf16 %v955_v48, %v954_v43  ;;  %v702_v58 = vadd.f32 %v4330_v35, %v439_v49  ;;  %v703_v59 = vadd.f32 %v4330_v35, %v440_v50  ;;  %v194_v50 = vld [vmem:[%s5335_s0 + $0x5a0] sm:$0xff] }
  0x92   :  { %3567 = vst [vmem:[%s5338_s3 + $0x270] sm:$0xff] %v3243_v47   ;;  %v443_v60 = vmul.f32 %v4342_v39, %v180_v46  ;;  %v957_v61 = vmax.f32 %v701_v52, 0.0  ;;  %v704_v62 = vadd.f32 %v4330_v35, %v441_v54  ;;  %v444_v0 = vmul.f32 %v4342_v39, %v181_v51  ;;  %v195_v51 = vld [vmem:[%s5335_s0 + $0x5a8] sm:$0xff] }
  0x93   :  { %v705_v63 = vadd.f32 %v4330_v35, %v442_v55  ;;  %3568 = vst [vmem:[%s5338_s3 + $0x278] sm:$0xff] %v3248_v57   ;;  %v958_v3 = vmax.f32 %v702_v58, 0.0  ;;  %v959_v4 = vmax.f32 %v703_v59, 0.0  ;;  %v445_v7 = vmul.f32 %v4342_v39, %v182_v56  ;;  %v196_v56 = vld [vmem:[%s5335_s0 + $0x5b0] sm:$0xff] }
  0x94   :  { %v706_v6 = vadd.f32 %v4330_v35, %v443_v60  ;;  %v3253_v10 = vpack.c.bf16 %v957_v61, %v956_v53  ;;  %v960_v11 = vmax.f32 %v704_v62, 0.0  ;;  %v707_v13 = vadd.f32 %v4330_v35, %v444_v0  ;;  %v197_v61 = vld [vmem:[%s5335_s0 + $0x5b8] sm:$0xff] }
  0x95   :  { %v961_v12 = vmax.f32 %v705_v63, 0.0  ;;  %v3258_v16 = vpack.c.bf16 %v959_v4, %v958_v3  ;;  %v446_v18 = vmul.f32 %v4342_v39, %v183_v1  ;;  %v708_v19 = vadd.f32 %v4330_v35, %v445_v7  ;;  %v198_v3 = vld [vmem:[%s5335_s0 + $0x5c0] sm:$0xff] }
  0x96   :  { %v962_v17 = vmax.f32 %v706_v6, 0.0  ;;  %3569 = vst [vmem:[%s5338_s3 + $0x280] sm:$0xff] %v3253_v10   ;;  %v963_v22 = vmax.f32 %v707_v13, 0.0  ;;  %v447_v23 = vmul.f32 %v4342_v39, %v184_v8  ;;  %v448_v24 = vmul.f32 %v4342_v39, %v185_v9  ;;  %v199_v13 = vld [vmem:[%s5335_s0 + $0x5c8] sm:$0xff] }
  0x97   :  { %v3263_v21 = vpack.c.bf16 %v961_v12, %v960_v11  ;;  %3570 = vst [vmem:[%s5338_s3 + $0x288] sm:$0xff] %v3258_v16   ;;  %v709_v26 = vadd.f32 %v4330_v35, %v446_v18  ;;  %v964_v27 = vmax.f32 %v708_v19, 0.0  ;;  %v449_v28 = vmul.f32 %v4342_v39, %v186_v14  ;;  %v200_v18 = vld [vmem:[%s5335_s0 + $0x5d0] sm:$0xff]  ;;  %v201_v19 = vld [vmem:[%s5335_s0 + $0x5d8] sm:$0xff] }
  0x98   :  { %v450_v29 = vmul.f32 %v4342_v39, %v187_v15  ;;  %v3268_v31 = vpack.c.bf16 %v963_v22, %v962_v17  ;;  %v710_v32 = vadd.f32 %v4330_v35, %v447_v23  ;;  %v711_v33 = vadd.f32 %v4330_v35, %v448_v24  ;;  %v202_v24 = vld [vmem:[%s5335_s0 + $0x5e0] sm:$0xff] }
  0x99   :  { %3571 = vst [vmem:[%s5338_s3 + $0x290] sm:$0xff] %v3263_v21   ;;  %v451_v34 = vmul.f32 %v4342_v39, %v188_v20  ;;  %v965_v5 = vmax.f32 %v709_v26, 0.0  ;;  %v712_v2 = vadd.f32 %v4330_v35, %v449_v28  ;;  %v452_v37 = vmul.f32 %v4342_v39, %v189_v25  ;;  %v203_v25 = vld [vmem:[%s5335_s0 + $0x5e8] sm:$0xff] }
  0x9a   :  { %v713_v36 = vadd.f32 %v4330_v35, %v450_v29  ;;  %3572 = vst [vmem:[%s5338_s3 + $0x298] sm:$0xff] %v3268_v31   ;;  %v966_v40 = vmax.f32 %v710_v32, 0.0  ;;  %v967_v41 = vmax.f32 %v711_v33, 0.0  ;;  %v453_v43 = vmul.f32 %v4342_v39, %v190_v30  ;;  %v204_v30 = vld [vmem:[%s5335_s0 + $0x5f0] sm:$0xff] }
  0x9b   :  { %v714_v42 = vadd.f32 %v4330_v35, %v451_v34  ;;  %v3273_v46 = vpack.c.bf16 %v965_v5, %v964_v27  ;;  %v968_v47 = vmax.f32 %v712_v2, 0.0  ;;  %v715_v49 = vadd.f32 %v4330_v35, %v452_v37  ;;  %v205_v5 = vld [vmem:[%s5335_s0 + $0x5f8] sm:$0xff] }
  0x9c   :  { %v969_v48 = vmax.f32 %v713_v36, 0.0  ;;  %v3278_v52 = vpack.c.bf16 %v967_v41, %v966_v40  ;;  %v454_v54 = vmul.f32 %v4342_v39, %v191_v38  ;;  %v716_v55 = vadd.f32 %v4330_v35, %v453_v43  ;;  %v206_v40 = vld [vmem:[%s5335_s0 + $0x600] sm:$0xff] }
  0x9d   :  { %v970_v53 = vmax.f32 %v714_v42, 0.0  ;;  %3573 = vst [vmem:[%s5338_s3 + $0x2a0] sm:$0xff] %v3273_v46   ;;  %v971_v58 = vmax.f32 %v715_v49, 0.0  ;;  %v455_v59 = vmul.f32 %v4342_v39, %v192_v44  ;;  %v456_v60 = vmul.f32 %v4342_v39, %v193_v45  ;;  %v207_v49 = vld [vmem:[%s5335_s0 + $0x608] sm:$0xff] }
  0x9e   :  { %v3283_v57 = vpack.c.bf16 %v969_v48, %v968_v47  ;;  %3574 = vst [vmem:[%s5338_s3 + $0x2a8] sm:$0xff] %v3278_v52   ;;  %v717_v62 = vadd.f32 %v4330_v35, %v454_v54  ;;  %v972_v63 = vmax.f32 %v716_v55, 0.0  ;;  %v457_v0 = vmul.f32 %v4342_v39, %v194_v50  ;;  %v208_v54 = vld [vmem:[%s5335_s0 + $0x610] sm:$0xff]  ;;  %v209_v55 = vld [vmem:[%s5335_s0 + $0x618] sm:$0xff] }
  0x9f   :  { %v458_v1 = vmul.f32 %v4342_v39, %v195_v51  ;;  %v3288_v4 = vpack.c.bf16 %v971_v58, %v970_v53  ;;  %v718_v6 = vadd.f32 %v4330_v35, %v455_v59  ;;  %v719_v7 = vadd.f32 %v4330_v35, %v456_v60  ;;  %v210_v60 = vld [vmem:[%s5335_s0 + $0x620] sm:$0xff] }
  0xa0   :  { %3575 = vst [vmem:[%s5338_s3 + $0x2b0] sm:$0xff] %v3283_v57   ;;  %v459_v8 = vmul.f32 %v4342_v39, %v196_v56  ;;  %v973_v9 = vmax.f32 %v717_v62, 0.0  ;;  %v720_v10 = vadd.f32 %v4330_v35, %v457_v0  ;;  %v460_v12 = vmul.f32 %v4342_v39, %v197_v61  ;;  %v211_v61 = vld [vmem:[%s5335_s0 + $0x628] sm:$0xff] }
  0xa1   :  { %v721_v11 = vadd.f32 %v4330_v35, %v458_v1  ;;  %3576 = vst [vmem:[%s5338_s3 + $0x2b8] sm:$0xff] %v3288_v4   ;;  %v974_v14 = vmax.f32 %v718_v6, 0.0  ;;  %v975_v15 = vmax.f32 %v719_v7, 0.0  ;;  %v461_v17 = vmul.f32 %v4342_v39, %v198_v3  ;;  %v212_v3 = vld [vmem:[%s5335_s0 + $0x630] sm:$0xff] }
  0xa2   :  { %v722_v16 = vadd.f32 %v4330_v35, %v459_v8  ;;  %v3293_v20 = vpack.c.bf16 %v973_v9, %v972_v63  ;;  %v976_v21 = vmax.f32 %v720_v10, 0.0  ;;  %v723_v23 = vadd.f32 %v4330_v35, %v460_v12  ;;  %v213_v9 = vld [vmem:[%s5335_s0 + $0x638] sm:$0xff] }
  0xa3   :  { %v977_v22 = vmax.f32 %v721_v11, 0.0  ;;  %v3298_v26 = vpack.c.bf16 %v975_v15, %v974_v14  ;;  %v462_v28 = vmul.f32 %v4342_v39, %v199_v13  ;;  %v724_v29 = vadd.f32 %v4330_v35, %v461_v17  ;;  %v214_v14 = vld [vmem:[%s5335_s0 + $0x640] sm:$0xff] }
  0xa4   :  { %v978_v27 = vmax.f32 %v722_v16, 0.0  ;;  %3577 = vst [vmem:[%s5338_s3 + $0x2c0] sm:$0xff] %v3293_v20   ;;  %v979_v32 = vmax.f32 %v723_v23, 0.0  ;;  %v463_v33 = vmul.f32 %v4342_v39, %v200_v18  ;;  %v464_v34 = vmul.f32 %v4342_v39, %v201_v19  ;;  %v215_v23 = vld [vmem:[%s5335_s0 + $0x648] sm:$0xff] }
  0xa5   :  { %v3303_v31 = vpack.c.bf16 %v977_v22, %v976_v21  ;;  %3578 = vst [vmem:[%s5338_s3 + $0x2c8] sm:$0xff] %v3298_v26   ;;  %v725_v2 = vadd.f32 %v4330_v35, %v462_v28  ;;  %v980_v36 = vmax.f32 %v724_v29, 0.0  ;;  %v465_v37 = vmul.f32 %v4342_v39, %v202_v24  ;;  %v216_v28 = vld [vmem:[%s5335_s0 + $0x650] sm:$0xff]  ;;  %v217_v29 = vld [vmem:[%s5335_s0 + $0x658] sm:$0xff] }
  0xa6   :  { %v466_v38 = vmul.f32 %v4342_v39, %v203_v25  ;;  %v3308_v41 = vpack.c.bf16 %v979_v32, %v978_v27  ;;  %v726_v42 = vadd.f32 %v4330_v35, %v463_v33  ;;  %v727_v43 = vadd.f32 %v4330_v35, %v464_v34  ;;  %v218_v34 = vld [vmem:[%s5335_s0 + $0x660] sm:$0xff] }
  0xa7   :  { %3579 = vst [vmem:[%s5338_s3 + $0x2d0] sm:$0xff] %v3303_v31   ;;  %v467_v44 = vmul.f32 %v4342_v39, %v204_v30  ;;  %v981_v45 = vmax.f32 %v725_v2, 0.0  ;;  %v728_v46 = vadd.f32 %v4330_v35, %v465_v37  ;;  %v468_v48 = vmul.f32 %v4342_v39, %v205_v5  ;;  %v219_v5 = vld [vmem:[%s5335_s0 + $0x668] sm:$0xff] }
  0xa8   :  { %v729_v47 = vadd.f32 %v4330_v35, %v466_v38  ;;  %3580 = vst [vmem:[%s5338_s3 + $0x2d8] sm:$0xff] %v3308_v41   ;;  %v982_v50 = vmax.f32 %v726_v42, 0.0  ;;  %v983_v51 = vmax.f32 %v727_v43, 0.0  ;;  %v469_v53 = vmul.f32 %v4342_v39, %v206_v40  ;;  %v220_v40 = vld [vmem:[%s5335_s0 + $0x670] sm:$0xff] }
  0xa9   :  { %v730_v52 = vadd.f32 %v4330_v35, %v467_v44  ;;  %v3313_v56 = vpack.c.bf16 %v981_v45, %v980_v36  ;;  %v984_v57 = vmax.f32 %v728_v46, 0.0  ;;  %v731_v59 = vadd.f32 %v4330_v35, %v468_v48  ;;  %v221_v45 = vld [vmem:[%s5335_s0 + $0x678] sm:$0xff] }
  0xaa   :  { %v985_v58 = vmax.f32 %v729_v47, 0.0  ;;  %v3318_v62 = vpack.c.bf16 %v983_v51, %v982_v50  ;;  %v470_v0 = vmul.f32 %v4342_v39, %v207_v49  ;;  %v732_v1 = vadd.f32 %v4330_v35, %v469_v53  ;;  %v222_v50 = vld [vmem:[%s5335_s0 + $0x680] sm:$0xff] }
  0xab   :  { %v986_v63 = vmax.f32 %v730_v52, 0.0  ;;  %3581 = vst [vmem:[%s5338_s3 + $0x2e0] sm:$0xff] %v3313_v56   ;;  %v987_v6 = vmax.f32 %v731_v59, 0.0  ;;  %v471_v7 = vmul.f32 %v4342_v39, %v208_v54  ;;  %v472_v8 = vmul.f32 %v4342_v39, %v209_v55  ;;  %v223_v59 = vld [vmem:[%s5335_s0 + $0x688] sm:$0xff] }
  0xac   :  { %v3323_v4 = vpack.c.bf16 %v985_v58, %v984_v57  ;;  %3582 = vst [vmem:[%s5338_s3 + $0x2e8] sm:$0xff] %v3318_v62   ;;  %v733_v10 = vadd.f32 %v4330_v35, %v470_v0  ;;  %v988_v11 = vmax.f32 %v732_v1, 0.0  ;;  %v473_v12 = vmul.f32 %v4342_v39, %v210_v60  ;;  %v5008_v62 = vld [vmem:[%s5337_s2] ss:$0 sm:$0xff]  ;;  %v224_v0 = vld [vmem:[%s5335_s0 + $0x690] sm:$0xff]  ;;  %v225_v1 = vld [vmem:[%s5335_s0 + $0x698] sm:$0xff] }
  0xad   :  { %v474_v13 = vmul.f32 %v4342_v39, %v211_v61  ;;  %v3328_v15 = vpack.c.bf16 %v987_v6, %v986_v63  ;;  %v734_v16 = vadd.f32 %v4330_v35, %v471_v7  ;;  %v735_v17 = vadd.f32 %v4330_v35, %v472_v8  ;;  %v226_v8 = vld [vmem:[%s5335_s0 + $0x6a0] sm:$0xff] }
  0xae   :  { %3583 = vst [vmem:[%s5338_s3 + $0x2f0] sm:$0xff] %v3323_v4   ;;  %v475_v18 = vmul.f32 %v4342_v39, %v212_v3  ;;  %v989_v19 = vmax.f32 %v733_v10, 0.0  ;;  %v736_v20 = vadd.f32 %v4330_v35, %v473_v12  ;;  %v476_v22 = vmul.f32 %v4342_v39, %v213_v9 }
  0xaf   :  { %v737_v21 = vadd.f32 %v4330_v35, %v474_v13  ;;  %3584 = vst [vmem:[%s5338_s3 + $0x2f8] sm:$0xff] %v3328_v15   ;;  %v990_v24 = vmax.f32 %v734_v16, 0.0  ;;  %v991_v25 = vmax.f32 %v735_v17, 0.0  ;;  %v477_v27 = vmul.f32 %v4342_v39, %v214_v14  ;;  %v228_v14 = vld [vmem:[%s5335_s0 + $0x6b0] sm:$0xff] }
  0xb0   :  { %v738_v26 = vadd.f32 %v4330_v35, %v475_v18  ;;  %v3333_v30 = vpack.c.bf16 %v989_v19, %v988_v11  ;;  %v992_v31 = vmax.f32 %v736_v20, 0.0  ;;  %v739_v33 = vadd.f32 %v4330_v35, %v476_v22  ;;  %v5028_v11 = vld [vmem:[%s5336_s1] ss:$0 sm:$0xff]  ;;  %v229_v19 = vld [vmem:[%s5335_s0 + $0x6b8] sm:$0xff] }
  0xb1   :  { %v993_v32 = vmax.f32 %v737_v21, 0.0  ;;  %v3338_v2 = vpack.c.bf16 %v991_v25, %v990_v24  ;;  %v478_v37 = vmul.f32 %v4342_v39, %v215_v23  ;;  %v740_v38 = vadd.f32 %v4330_v35, %v477_v27  ;;  %v230_v24 = vld [vmem:[%s5335_s0 + $0x6c0] sm:$0xff] }
  0xb2   :  { %v994_v36 = vmax.f32 %v738_v26, 0.0  ;;  %3585 = vst [vmem:[%s5338_s3 + $0x300] sm:$0xff] %v3333_v30   ;;  %v995_v42 = vmax.f32 %v739_v33, 0.0  ;;  %v479_v43 = vmul.f32 %v4342_v39, %v216_v28  ;;  %v480_v44 = vmul.f32 %v4342_v39, %v217_v29  ;;  %v231_v33 = vld [vmem:[%s5335_s0 + $0x6c8] sm:$0xff] }
  0xb3   :  { %v3343_v41 = vpack.c.bf16 %v993_v32, %v992_v31  ;;  %3586 = vst [vmem:[%s5338_s3 + $0x308] sm:$0xff] %v3338_v2   ;;  %v741_v46 = vadd.f32 %v4330_v35, %v478_v37  ;;  %v996_v47 = vmax.f32 %v740_v38, 0.0  ;;  %v481_v48 = vmul.f32 %v4342_v39, %v218_v34  ;;  %v232_v37 = vld [vmem:[%s5335_s0 + $0x6d0] sm:$0xff]  ;;  %v233_v38 = vld [vmem:[%s5335_s0 + $0x6d8] sm:$0xff] }
  0xb4   :  { %v482_v49 = vmul.f32 %v4342_v39, %v219_v5  ;;  %v3348_v51 = vpack.c.bf16 %v995_v42, %v994_v36  ;;  %v742_v52 = vadd.f32 %v4330_v35, %v479_v43  ;;  %v743_v53 = vadd.f32 %v4330_v35, %v480_v44  ;;  %v234_v44 = vld [vmem:[%s5335_s0 + $0x6e0] sm:$0xff] }
  0xb5   :  { %3587 = vst [vmem:[%s5338_s3 + $0x310] sm:$0xff] %v3343_v41   ;;  %v483_v54 = vmul.f32 %v4342_v39, %v220_v40  ;;  %v997_v55 = vmax.f32 %v741_v46, 0.0  ;;  %v744_v56 = vadd.f32 %v4330_v35, %v481_v48  ;;  %v484_v58 = vmul.f32 %v4342_v39, %v221_v45  ;;  %v235_v45 = vld [vmem:[%s5335_s0 + $0x6e8] sm:$0xff] }
  0xb6   :  { %v745_v57 = vadd.f32 %v4330_v35, %v482_v49  ;;  %3588 = vst [vmem:[%s5338_s3 + $0x318] sm:$0xff] %v3348_v51   ;;  %v998_v60 = vmax.f32 %v742_v52, 0.0  ;;  %v999_v61 = vmax.f32 %v743_v53, 0.0  ;;  %v485_v35 = vmul.f32 %v4342_v39, %v222_v50  ;;  %v227_v39 = vld [vmem:[%s5335_s0 + $0x6a8] sm:$0xff]  ;;  %v236_v50 = vld [vmem:[%s5335_s0 + $0x6f0] sm:$0xff] }
  0xb7   :  { %v746_v63 = vadd.f32 %v5008_v62, %v483_v54  ;;  %v3353_v3 = vpack.c.bf16 %v997_v55, %v996_v47  ;;  %v1000_v4 = vmax.f32 %v744_v56, 0.0  ;;  %v747_v7 = vadd.f32 %v5008_v62, %v484_v58  ;;  %v237_v55 = vld [vmem:[%s5335_s0 + $0x6f8] sm:$0xff] }
  0xb8   :  { %v1001_v6 = vmax.f32 %v745_v57, 0.0  ;;  %v3358_v9 = vpack.c.bf16 %v999_v61, %v998_v60  ;;  %v486_v12 = vmul.f32 %v5028_v11, %v223_v59  ;;  %v748_v13 = vadd.f32 %v5008_v62, %v485_v35  ;;  %v238_v60 = vld [vmem:[%s5335_s0 + $0x700] sm:$0xff] }
  0xb9   :  { %v1002_v10 = vmax.f32 %v746_v63, 0.0  ;;  %3589 = vst [vmem:[%s5338_s3 + $0x320] sm:$0xff] %v3353_v3   ;;  %v1003_v16 = vmax.f32 %v747_v7, 0.0  ;;  %v487_v17 = vmul.f32 %v5028_v11, %v224_v0  ;;  %v488_v18 = vmul.f32 %v5028_v11, %v225_v1  ;;  %v239_v7 = vld [vmem:[%s5335_s0 + $0x708] sm:$0xff] }
  0xba   :  { %v3363_v15 = vpack.c.bf16 %v1001_v6, %v1000_v4  ;;  %3590 = vst [vmem:[%s5338_s3 + $0x328] sm:$0xff] %v3358_v9   ;;  %v749_v20 = vadd.f32 %v5008_v62, %v486_v12  ;;  %v1004_v21 = vmax.f32 %v748_v13, 0.0  ;;  %v489_v22 = vmul.f32 %v5028_v11, %v226_v8  ;;  %v240_v12 = vld [vmem:[%s5335_s0 + $0x710] sm:$0xff]  ;;  %v241_v13 = vld [vmem:[%s5335_s0 + $0x718] sm:$0xff] }
  0xbb   :  { %v490_v23 = vmul.f32 %v5028_v11, %v227_v39  ;;  %v3368_v25 = vpack.c.bf16 %v1003_v16, %v1002_v10  ;;  %v750_v26 = vadd.f32 %v5008_v62, %v487_v17  ;;  %v751_v27 = vadd.f32 %v5008_v62, %v488_v18  ;;  %v242_v18 = vld [vmem:[%s5335_s0 + $0x720] sm:$0xff] }
  0xbc   :  { %3591 = vst [vmem:[%s5338_s3 + $0x330] sm:$0xff] %v3363_v15   ;;  %v491_v28 = vmul.f32 %v5028_v11, %v228_v14  ;;  %v1005_v29 = vmax.f32 %v749_v20, 0.0  ;;  %v752_v30 = vadd.f32 %v5008_v62, %v489_v22  ;;  %v492_v32 = vmul.f32 %v5028_v11, %v229_v19  ;;  %v243_v19 = vld [vmem:[%s5335_s0 + $0x728] sm:$0xff] }
  0xbd   :  { %v753_v31 = vadd.f32 %v5008_v62, %v490_v23  ;;  %3592 = vst [vmem:[%s5338_s3 + $0x338] sm:$0xff] %v3368_v25   ;;  %v1006_v34 = vmax.f32 %v750_v26, 0.0  ;;  %v1007_v5 = vmax.f32 %v751_v27, 0.0  ;;  %v493_v36 = vmul.f32 %v5028_v11, %v230_v24  ;;  %v244_v24 = vld [vmem:[%s5335_s0 + $0x730] sm:$0xff] }
  0xbe   :  { %v754_v2 = vadd.f32 %v5008_v62, %v491_v28  ;;  %v3373_v40 = vpack.c.bf16 %v1005_v29, %v1004_v21  ;;  %v1008_v41 = vmax.f32 %v752_v30, 0.0  ;;  %v755_v43 = vadd.f32 %v5008_v62, %v492_v32  ;;  %v245_v29 = vld [vmem:[%s5335_s0 + $0x738] sm:$0xff] }
  0xbf   :  { %v1009_v42 = vmax.f32 %v753_v31, 0.0  ;;  %v3378_v46 = vpack.c.bf16 %v1007_v5, %v1006_v34  ;;  %v494_v48 = vmul.f32 %v5028_v11, %v231_v33  ;;  %v756_v49 = vadd.f32 %v5008_v62, %v493_v36  ;;  %v246_v34 = vld [vmem:[%s5335_s0 + $0x740] sm:$0xff] }
  0xc0   :  { %v1010_v47 = vmax.f32 %v754_v2, 0.0  ;;  %3593 = vst [vmem:[%s5338_s3 + $0x340] sm:$0xff] %v3373_v40   ;;  %v1011_v52 = vmax.f32 %v755_v43, 0.0  ;;  %v495_v53 = vmul.f32 %v5028_v11, %v232_v37  ;;  %v496_v54 = vmul.f32 %v5028_v11, %v233_v38  ;;  %v247_v43 = vld [vmem:[%s5335_s0 + $0x748] sm:$0xff] }
  0xc1   :  { %v3383_v51 = vpack.c.bf16 %v1009_v42, %v1008_v41  ;;  %3594 = vst [vmem:[%s5338_s3 + $0x348] sm:$0xff] %v3378_v46   ;;  %v757_v56 = vadd.f32 %v5008_v62, %v494_v48  ;;  %v1012_v57 = vmax.f32 %v756_v49, 0.0  ;;  %v497_v58 = vmul.f32 %v5028_v11, %v234_v44  ;;  %v248_v48 = vld [vmem:[%s5335_s0 + $0x750] sm:$0xff]  ;;  %v249_v49 = vld [vmem:[%s5335_s0 + $0x758] sm:$0xff] }
  0xc2   :  { %v498_v59 = vmul.f32 %v5028_v11, %v235_v45  ;;  %v3388_v61 = vpack.c.bf16 %v1011_v52, %v1010_v47  ;;  %v758_v63 = vadd.f32 %v5008_v62, %v495_v53  ;;  %v759_v35 = vadd.f32 %v5008_v62, %v496_v54  ;;  %v250_v54 = vld [vmem:[%s5335_s0 + $0x760] sm:$0xff] }
  0xc3   :  { %3595 = vst [vmem:[%s5338_s3 + $0x350] sm:$0xff] %v3383_v51   ;;  %v499_v0 = vmul.f32 %v5028_v11, %v236_v50  ;;  %v1013_v1 = vmax.f32 %v757_v56, 0.0  ;;  %v760_v3 = vadd.f32 %v5008_v62, %v497_v58  ;;  %v500_v6 = vmul.f32 %v5028_v11, %v237_v55  ;;  %v251_v55 = vld [vmem:[%s5335_s0 + $0x768] sm:$0xff] }
  0xc4   :  { %v761_v4 = vadd.f32 %v5008_v62, %v498_v59  ;;  %3596 = vst [vmem:[%s5338_s3 + $0x358] sm:$0xff] %v3388_v61   ;;  %v1014_v8 = vmax.f32 %v758_v63, 0.0  ;;  %v1015_v39 = vmax.f32 %v759_v35, 0.0  ;;  %v501_v10 = vmul.f32 %v5028_v11, %v238_v60  ;;  %v252_v60 = vld [vmem:[%s5335_s0 + $0x770] sm:$0xff] }
  0xc5   :  { %v762_v9 = vadd.f32 %v5008_v62, %v499_v0  ;;  %v3393_v14 = vpack.c.bf16 %v1013_v1, %v1012_v57  ;;  %v1016_v15 = vmax.f32 %v760_v3, 0.0  ;;  %v763_v17 = vadd.f32 %v5008_v62, %v500_v6  ;;  %v253_v1 = vld [vmem:[%s5335_s0 + $0x778] sm:$0xff] }
  0xc6   :  { %v1017_v16 = vmax.f32 %v761_v4, 0.0  ;;  %v3398_v20 = vpack.c.bf16 %v1015_v39, %v1014_v8  ;;  %v502_v22 = vmul.f32 %v5028_v11, %v239_v7  ;;  %v764_v23 = vadd.f32 %v5008_v62, %v501_v10  ;;  %v254_v8 = vld [vmem:[%s5335_s0 + $0x780] sm:$0xff] }
  0xc7   :  { %v1018_v21 = vmax.f32 %v762_v9, 0.0  ;;  %3597 = vst [vmem:[%s5338_s3 + $0x360] sm:$0xff] %v3393_v14   ;;  %v1019_v26 = vmax.f32 %v763_v17, 0.0  ;;  %v503_v27 = vmul.f32 %v5028_v11, %v240_v12  ;;  %v504_v28 = vmul.f32 %v5028_v11, %v241_v13  ;;  %v255_v17 = vld [vmem:[%s5335_s0 + $0x788] sm:$0xff] }
  0xc8   :  { %v3403_v25 = vpack.c.bf16 %v1017_v16, %v1016_v15  ;;  %3598 = vst [vmem:[%s5338_s3 + $0x368] sm:$0xff] %v3398_v20   ;;  %v765_v30 = vadd.f32 %v5008_v62, %v502_v22  ;;  %v1020_v31 = vmax.f32 %v764_v23, 0.0  ;;  %v505_v32 = vmul.f32 %v5028_v11, %v242_v18  ;;  %v256_v22 = vld [vmem:[%s5335_s0 + $0x790] sm:$0xff]  ;;  %v257_v23 = vld [vmem:[%s5335_s0 + $0x798] sm:$0xff] }
  0xc9   :  { %v506_v33 = vmul.f32 %v5028_v11, %v243_v19  ;;  %v3408_v5 = vpack.c.bf16 %v1019_v26, %v1018_v21  ;;  %v766_v2 = vadd.f32 %v5008_v62, %v503_v27  ;;  %v767_v36 = vadd.f32 %v5008_v62, %v504_v28  ;;  %v258_v28 = vld [vmem:[%s5335_s0 + $0x7a0] sm:$0xff] }
  0xca   :  { %3599 = vst [vmem:[%s5338_s3 + $0x370] sm:$0xff] %v3403_v25   ;;  %v507_v37 = vmul.f32 %v5028_v11, %v244_v24  ;;  %v1021_v38 = vmax.f32 %v765_v30, 0.0  ;;  %v768_v40 = vadd.f32 %v5008_v62, %v505_v32  ;;  %v508_v42 = vmul.f32 %v5028_v11, %v245_v29  ;;  %v259_v29 = vld [vmem:[%s5335_s0 + $0x7a8] sm:$0xff] }
  0xcb   :  { %v769_v41 = vadd.f32 %v5008_v62, %v506_v33  ;;  %3600 = vst [vmem:[%s5338_s3 + $0x378] sm:$0xff] %v3408_v5   ;;  %v1022_v44 = vmax.f32 %v766_v2, 0.0  ;;  %v1023_v45 = vmax.f32 %v767_v36, 0.0  ;;  %v509_v47 = vmul.f32 %v5028_v11, %v246_v34  ;;  %v260_v34 = vld [vmem:[%s5335_s0 + $0x7b0] sm:$0xff] }
  0xcc   :  { %v770_v46 = vadd.f32 %v5008_v62, %v507_v37  ;;  %v3413_v50 = vpack.c.bf16 %v1021_v38, %v1020_v31  ;;  %v1024_v51 = vmax.f32 %v768_v40, 0.0  ;;  %v771_v53 = vadd.f32 %v5008_v62, %v508_v42  ;;  %v261_v38 = vld [vmem:[%s5335_s0 + $0x7b8] sm:$0xff] }
  0xcd   :  { %v1025_v52 = vmax.f32 %v769_v41, 0.0  ;;  %v3418_v56 = vpack.c.bf16 %v1023_v45, %v1022_v44  ;;  %v510_v58 = vmul.f32 %v5028_v11, %v247_v43  ;;  %v772_v59 = vadd.f32 %v5008_v62, %v509_v47  ;;  %v262_v44 = vld [vmem:[%s5335_s0 + $0x7c0] sm:$0xff] }
  0xce   :  { %v1026_v57 = vmax.f32 %v770_v46, 0.0  ;;  %3601 = vst [vmem:[%s5338_s3 + $0x380] sm:$0xff] %v3413_v50   ;;  %v1027_v63 = vmax.f32 %v771_v53, 0.0  ;;  %v511_v35 = vmul.f32 %v5028_v11, %v248_v48  ;;  %v512_v0 = vmul.f32 %v5028_v11, %v249_v49  ;;  %v263_v53 = vld [vmem:[%s5335_s0 + $0x7c8] sm:$0xff] }
  0xcf   :  { %v3423_v61 = vpack.c.bf16 %v1025_v52, %v1024_v51  ;;  %3602 = vst [vmem:[%s5338_s3 + $0x388] sm:$0xff] %v3418_v56   ;;  %v773_v3 = vadd.f32 %v5008_v62, %v510_v58  ;;  %v1028_v4 = vmax.f32 %v772_v59, 0.0  ;;  %v513_v6 = vmul.f32 %v5028_v11, %v250_v54  ;;  %v264_v58 = vld [vmem:[%s5335_s0 + $0x7d0] sm:$0xff]  ;;  %v265_v59 = vld [vmem:[%s5335_s0 + $0x7d8] sm:$0xff] }
  0xd0   :  { %v514_v7 = vmul.f32 %v5028_v11, %v251_v55  ;;  %v3428_v39 = vpack.c.bf16 %v1027_v63, %v1026_v57  ;;  %v774_v9 = vadd.f32 %v5008_v62, %v511_v35  ;;  %v775_v10 = vadd.f32 %v5008_v62, %v512_v0  ;;  %v266_v0 = vld [vmem:[%s5335_s0 + $0x7e0] sm:$0xff] }
  0xd1   :  { %3603 = vst [vmem:[%s5338_s3 + $0x390] sm:$0xff] %v3423_v61   ;;  %v515_v12 = vmul.f32 %v5028_v11, %v252_v60  ;;  %v1029_v13 = vmax.f32 %v773_v3, 0.0  ;;  %v776_v14 = vadd.f32 %v5008_v62, %v513_v6  ;;  %v516_v16 = vmul.f32 %v5028_v11, %v253_v1  ;;  %v267_v1 = vld [vmem:[%s5335_s0 + $0x7e8] sm:$0xff] }
  0xd2   :  { %v777_v15 = vadd.f32 %v5008_v62, %v514_v7  ;;  %3604 = vst [vmem:[%s5338_s3 + $0x398] sm:$0xff] %v3428_v39   ;;  %v1030_v18 = vmax.f32 %v774_v9, 0.0  ;;  %v1031_v19 = vmax.f32 %v775_v10, 0.0  ;;  %v517_v21 = vmul.f32 %v5028_v11, %v254_v8  ;;  %v268_v8 = vld [vmem:[%s5335_s0 + $0x7f0] sm:$0xff] }
  0xd3   :  { %v778_v20 = vadd.f32 %v5008_v62, %v515_v12  ;;  %v3433_v24 = vpack.c.bf16 %v1029_v13, %v1028_v4  ;;  %v1032_v25 = vmax.f32 %v776_v14, 0.0  ;;  %v779_v27 = vadd.f32 %v5008_v62, %v516_v16  ;;  %v269_v13 = vld [vmem:[%s5335_s0 + $0x7f8] sm:$0xff] }
  0xd4   :  { %v1033_v26 = vmax.f32 %v777_v15, 0.0  ;;  %v3438_v30 = vpack.c.bf16 %v1031_v19, %v1030_v18  ;;  %v518_v32 = vmul.f32 %v5028_v11, %v255_v17  ;;  %v780_v33 = vadd.f32 %v5008_v62, %v517_v21 }
  0xd5   :  { %v1034_v31 = vmax.f32 %v778_v20, 0.0  ;;  %3605 = vst [vmem:[%s5338_s3 + $0x3a0] sm:$0xff] %v3433_v24   ;;  %v1035_v2 = vmax.f32 %v779_v27, 0.0  ;;  %v519_v36 = vmul.f32 %v5028_v11, %v256_v22  ;;  %v520_v37 = vmul.f32 %v5028_v11, %v257_v23 }
  0xd6   :  { %v3443_v5 = vpack.c.bf16 %v1033_v26, %v1032_v25  ;;  %3606 = vst [vmem:[%s5338_s3 + $0x3a8] sm:$0xff] %v3438_v30   ;;  %v781_v40 = vadd.f32 %v5008_v62, %v518_v32  ;;  %v1036_v41 = vmax.f32 %v780_v33, 0.0  ;;  %v521_v42 = vmul.f32 %v5028_v11, %v258_v28 }
  0xd7   :  { %v522_v43 = vmul.f32 %v5028_v11, %v259_v29  ;;  %v3448_v45 = vpack.c.bf16 %v1035_v2, %v1034_v31  ;;  %v782_v46 = vadd.f32 %v5008_v62, %v519_v36  ;;  %v783_v47 = vadd.f32 %v5008_v62, %v520_v37 }
  0xd8   :  { %3607 = vst [vmem:[%s5338_s3 + $0x3b0] sm:$0xff] %v3443_v5   ;;  %v523_v48 = vmul.f32 %v5028_v11, %v260_v34  ;;  %v1037_v49 = vmax.f32 %v781_v40, 0.0  ;;  %v784_v50 = vadd.f32 %v5008_v62, %v521_v42  ;;  %v524_v52 = vmul.f32 %v5028_v11, %v261_v38 }
  0xd9   :  { %v785_v51 = vadd.f32 %v5008_v62, %v522_v43  ;;  %3608 = vst [vmem:[%s5338_s3 + $0x3b8] sm:$0xff] %v3448_v45   ;;  %v1038_v54 = vmax.f32 %v782_v46, 0.0  ;;  %v1039_v55 = vmax.f32 %v783_v47, 0.0  ;;  %v525_v57 = vmul.f32 %v5028_v11, %v262_v44 }
  0xda   :  { %v786_v56 = vadd.f32 %v5008_v62, %v523_v48  ;;  %v3453_v60 = vpack.c.bf16 %v1037_v49, %v1036_v41  ;;  %v1040_v61 = vmax.f32 %v784_v50, 0.0  ;;  %v787_v35 = vadd.f32 %v5008_v62, %v524_v52 }
  0xdb   :  { %v1041_v63 = vmax.f32 %v785_v51, 0.0  ;;  %v3458_v3 = vpack.c.bf16 %v1039_v55, %v1038_v54  ;;  %v526_v6 = vmul.f32 %v5028_v11, %v263_v53  ;;  %v788_v7 = vadd.f32 %v5008_v62, %v525_v57 }
  0xdc   :  { %v1042_v4 = vmax.f32 %v786_v56, 0.0  ;;  %3609 = vst [vmem:[%s5338_s3 + $0x3c0] sm:$0xff] %v3453_v60   ;;  %v1043_v9 = vmax.f32 %v787_v35, 0.0  ;;  %v527_v10 = vmul.f32 %v5028_v11, %v264_v58  ;;  %v528_v12 = vmul.f32 %v5028_v11, %v265_v59 }
  0xdd   :  { %v3463_v39 = vpack.c.bf16 %v1041_v63, %v1040_v61  ;;  %3610 = vst [vmem:[%s5338_s3 + $0x3c8] sm:$0xff] %v3458_v3   ;;  %v789_v14 = vadd.f32 %v5008_v62, %v526_v6  ;;  %v1044_v15 = vmax.f32 %v788_v7, 0.0  ;;  %v529_v16 = vmul.f32 %v5028_v11, %v266_v0 }
  0xde   :  { %v530_v17 = vmul.f32 %v5028_v11, %v267_v1  ;;  %v3468_v18 = vpack.c.bf16 %v1043_v9, %v1042_v4  ;;  %v790_v19 = vadd.f32 %v5008_v62, %v527_v10  ;;  %v791_v20 = vadd.f32 %v5008_v62, %v528_v12 }
  0xdf   :  { %3611 = vst [vmem:[%s5338_s3 + $0x3d0] sm:$0xff] %v3463_v39   ;;  %v531_v21 = vmul.f32 %v5028_v11, %v268_v8  ;;  %v1045_v22 = vmax.f32 %v789_v14, 0.0  ;;  %v792_v23 = vadd.f32 %v5008_v62, %v529_v16  ;;  %v532_v25 = vmul.f32 %v5028_v11, %v269_v13 }
  0xe0   :  { %v793_v24 = vadd.f32 %v5008_v62, %v530_v17  ;;  %3612 = vst [vmem:[%s5338_s3 + $0x3d8] sm:$0xff] %v3468_v18   ;;  %v1046_v26 = vmax.f32 %v790_v19, 0.0  ;;  %v1047_v27 = vmax.f32 %v791_v20, 0.0 }
  0xe1   :  { %v794_v28 = vadd.f32 %v5008_v62, %v531_v21  ;;  %v3473_v29 = vpack.c.bf16 %v1045_v22, %v1044_v15  ;;  %v1048_v30 = vmax.f32 %v792_v23, 0.0  ;;  %v795_v32 = vadd.f32 %v5008_v62, %v532_v25 }
  0xe2   :  { %v1049_v31 = vmax.f32 %v793_v24, 0.0  ;;  %v3478_v33 = vpack.c.bf16 %v1047_v27, %v1046_v26 }
  0xe3   :  { %v1050_v34 = vmax.f32 %v794_v28, 0.0  ;;  %3613 = vst [vmem:[%s5338_s3 + $0x3e0] sm:$0xff] %v3473_v29   ;;  %v1051_v5 = vmax.f32 %v795_v32, 0.0 }
  0xe4   :  { %v3483_v11 = vpack.c.bf16 %v1049_v31, %v1048_v30  ;;  %3614 = vst [vmem:[%s5338_s3 + $0x3e8] sm:$0xff] %v3478_v33  }
  0xe5   :  { %v3488_v2 = vpack.c.bf16 %v1051_v5, %v1050_v34 }
  0xe6   :  { %3615 = vst [vmem:[%s5338_s3 + $0x3f0] sm:$0xff] %v3483_v11  }
  0xe7   :  { %3616 = vst [vmem:[%s5338_s3 + $0x3f8] sm:$0xff] %v3488_v2  }

// kernel: generator_forward.17
= control target key start
LH: loop header
LB: loop body
LE: loop exit
PB: predicated region body
PF: predicated region fallthrough
CT: control target
= control target key end

     0   :  { %s2642_s12 = smov 0   ;;  %s2644_s13 = smov 0   ;;  %s3098_s0 = inlined_call_operand.vmem [shape: bf16[4,2048,32], index: 0, kind: input, shape index: {}]   ;;  %s3099_s1 = inlined_call_operand.vmem [shape: bf16[4,32,128], index: 1, kind: input, shape index: {}]   ;;  %s3100_s2 = inlined_call_operand.vmem [shape: f32[1,128], index: 2, kind: input, shape index: {}]   ;;  %s3101_s3 = inlined_call_operand.vmem [shape: f32[4,2048,128], index: 3, kind: output, shape index: {}]  }
   0x1   :  { %s2646_s14 = smov 0   ;;  %s2648_s15 = smov 0  }
   0x2   :  { %s2650_s16 = smov 0  }
   0x3 LB: > { %s28_s17 = sadd.s32 1, %s2612_s14  ;;  %s32_s18 = sadd.s32 1, %s2616_s15  ;;  %s2620_s16 = sphi %s2650_s16, %s13_s16   ;;  %s2616_s15 = sphi %s2648_s15, %s3105_s15   ;;  %s2612_s14 = sphi %s2646_s14, %s3104_s14   ;;  %s2608_s13 = sphi %s2644_s13, %s3103_s13   ;;  %s2604_s12 = sphi %s2642_s12, %s3102_s12  }
   0x4   : > { %p30_p0 = scmp.ge.s32.totalorder %s28_s17, 2  ;;  %p1874_p1 = scmp.ge.s32.totalorder %s2620_s16, 1 }
   0x5   : > { %p190_p2 = scmp.lt.s32.totalorder %s2620_s16, 9 }
   0x6   : > { %s3107_s17 = smov (%p30_p0, %s28_s17), 0  ;;  %s3109_s18 = smov (!%p30_p0, %s32_s18), %s2616_s15 }
   0x7   : > { %p191_p3 = pnand %p1874_p1, %p190_p2  ;;  %p34_p4 = scmp.ge.s32.totalorder %s3109_s18, 4 }
   0x8   : > { %s1875_s19 = sshll.u32 (!%p191_p3), %s2604_s12, 7  ;;  %p237_p5 = scmp.lt.s32.totalorder (!%p191_p3), %s2608_s13, 3  ;;  %vm742_vm0 = vcmask (!%p191_p3), 261120  }
   0x9   : > { %s3111_s18 = smov (%p34_p4, %s3109_s18), 0  ;;  %194 = sbr.rel (%p191_p3) target bundleno = 384 (0x180), region = 32 }
   0xa   : > { %p239_p6 = scmp.lt.s32.totalorder (!%p191_p3), %s1875_s19, 255 }
  0x10   : > { %s3113_s13 = smov (!%p237_p5, %s2608_s13), 3  ;;  %s3115_s19 = smov (!%p239_p6, %s1875_s19), 255 }
  0x11   : > { %s1876_s20 = sshll.u32 %s3113_s13, 8  ;;  %s2016_s21 = sshll.u32 %s3113_s13, 4 }
  0x12   : > { %s2672_s22 = sadd.s32 %s1876_s20, %s3115_s19  ;;  %s253_s25 = scalar_lea.vmem %s3099_s1, %s2016_s21 }
  0x13   : > { %s1877_s26 = sshll.u32 %s2672_s22, 2  ;;  %v2259_v0 = vld [vmem:[%s253_s25] sm:$0xff]   ;;  %v2260_v1 = vld [vmem:[%s253_s25 + $0x8] sm:$0xff]   ;;  %s1882_s5 = sshll.u32 %s2672_s22, 3 }
  0x14   : > { %s2681_s29 = scalar_lea.vmem %s3098_s0, %s1877_s26  ;;  %2083 = vmatprep.subr.bf16.mxu0 %v2259_v0  ;;  %2215 = vmatprep.subr.bf16.mxu1 %v2259_v0  ;;  %s2832_s8 = scalar_lea.vmem %s3101_s3, %s1882_s5 }
  0x15   : > { %v2261_v2 = vld [vmem:[%s2681_s29] sm:$0xff]   ;;  %2084 = vmatpush3.bf16.msra.mxu0 %v2259_v0  ;;  %2217 = vmatpush3.bf16.msra.mxu1 %v2259_v0  ;;  %v2263_v4 = vld [vmem:[%s2681_s29 + $0x8] sm:$0xff]   ;;  %v2265_v6 = vld [vmem:[%s2681_s29 + $0x10] sm:$0xff]  }
  0x16   : > { %v2262_v3 = vld [vmem:[%s2681_s29 + $0x100] sm:$0xff]   ;;  %2085 = vmatprep.subr.bf16.mxu0 %v2260_v1  ;;  %2216 = vmatprep.subr.bf16.mxu1 %v2260_v1  ;;  %v2264_v5 = vld [vmem:[%s2681_s29 + $0x108] sm:$0xff]   ;;  %v2266_v7 = vld [vmem:[%s2681_s29 + $0x110] sm:$0xff]  }
  0x17   : > { %2087 = vmatprep.mubr.msk.bf16.mxu0 %vm742_vm0, %v2261_v2  ;;  %2151 = vmatprep.mubr.msk.bf16.mxu1 %vm742_vm0, %v2262_v3  ;;  %v2267_v8 = vld [vmem:[%s2681_s29 + $0x18] sm:$0xff]   ;;  %v2269_v10 = vld [vmem:[%s2681_s29 + $0x20] sm:$0xff]   ;;  %v2271_v12 = vld [vmem:[%s2681_s29 + $0x28] sm:$0xff]  }
  0x18   : > { %v2268_v9 = vld [vmem:[%s2681_s29 + $0x118] sm:$0xff]   ;;  %v2270_v11 = vld [vmem:[%s2681_s29 + $0x120] sm:$0xff]   ;;  %v2272_v13 = vld [vmem:[%s2681_s29 + $0x128] sm:$0xff]  }
  0x19   : > { %2086 = vmatpush3.bf16.msra.mxu0 %v2260_v1  ;;  %2218 = vmatpush3.bf16.msra.mxu1 %v2260_v1  ;;  %v2273_v14 = vld [vmem:[%s2681_s29 + $0x30] sm:$0xff]   ;;  %v2275_v16 = vld [vmem:[%s2681_s29 + $0x38] sm:$0xff]   ;;  %v2277_v18 = vld [vmem:[%s2681_s29 + $0x40] sm:$0xff]  }
  0x1a   : > { %v2274_v15 = vld [vmem:[%s2681_s29 + $0x130] sm:$0xff]   ;;  %v2276_v17 = vld [vmem:[%s2681_s29 + $0x138] sm:$0xff]   ;;  %v2278_v19 = vld [vmem:[%s2681_s29 + $0x140] sm:$0xff]  }
  0x1b   : > { %v2279_v20 = vld [vmem:[%s2681_s29 + $0x48] sm:$0xff]   ;;  %v2281_v22 = vld [vmem:[%s2681_s29 + $0x50] sm:$0xff]   ;;  %v2283_v24 = vld [vmem:[%s2681_s29 + $0x58] sm:$0xff]  }
  0x1c   : > { %2088 = vmatmul.mubr.msk.bf16.vlgmr.msra.gmra.mrb[0].mxu0 %vm742_vm0, %v2263_v4  ;;  %2152 = vmatmul.mubr.msk.bf16.vlgmr.msra.gmra.mrb[0].mxu1 %vm742_vm0, %v2264_v5  ;;  %v2280_v21 = vld [vmem:[%s2681_s29 + $0x148] sm:$0xff]   ;;  %v2282_v23 = vld [vmem:[%s2681_s29 + $0x150] sm:$0xff]   ;;  %v2284_v25 = vld [vmem:[%s2681_s29 + $0x158] sm:$0xff]  }
  0x1d   : > { %2091 = vmatprep.mubr.msk.bf16.mxu0 %vm742_vm0, %v2265_v6  ;;  %2155 = vmatprep.mubr.msk.bf16.mxu1 %vm742_vm0, %v2266_v7  ;;  %v2285_v26 = vld [vmem:[%s2681_s29 + $0x60] sm:$0xff]   ;;  %v2287_v28 = vld [vmem:[%s2681_s29 + $0x68] sm:$0xff]   ;;  %v2289_v30 = vld [vmem:[%s2681_s29 + $0x70] sm:$0xff]  }
  0x1e   : > { %v2286_v27 = vld [vmem:[%s2681_s29 + $0x160] sm:$0xff]   ;;  %v2288_v29 = vld [vmem:[%s2681_s29 + $0x168] sm:$0xff]   ;;  %v2290_v31 = vld [vmem:[%s2681_s29 + $0x170] sm:$0xff]  }
  0x1f   : > { %v2291_v32 = vld [vmem:[%s2681_s29 + $0x78] sm:$0xff]   ;;  %v2293_v34 = vld [vmem:[%s2681_s29 + $0x80] sm:$0xff]   ;;  %v2295_v36 = vld [vmem:[%s2681_s29 + $0x88] sm:$0xff]  }
  0x20   : > { %v2292_v33 = vld [vmem:[%s2681_s29 + $0x178] sm:$0xff]   ;;  %v2294_v35 = vld [vmem:[%s2681_s29 + $0x180] sm:$0xff]   ;;  %v2296_v37 = vld [vmem:[%s2681_s29 + $0x188] sm:$0xff]  }
  0x21   : > { %v2297_v38 = vld [vmem:[%s2681_s29 + $0x90] sm:$0xff]   ;;  %v2299_v40 = vld [vmem:[%s2681_s29 + $0x98] sm:$0xff]   ;;  %v2301_v42 = vld [vmem:[%s2681_s29 + $0xa0] sm:$0xff]  }
  0x22   : > { %v2298_v39 = vld [vmem:[%s2681_s29 + $0x190] sm:$0xff]   ;;  %v2300_v41 = vld [vmem:[%s2681_s29 + $0x198] sm:$0xff]   ;;  %v2302_v43 = vld [vmem:[%s2681_s29 + $0x1a0] sm:$0xff]  }
  0x23   : > { %v2303_v44 = vld [vmem:[%s2681_s29 + $0xa8] sm:$0xff]   ;;  %v2305_v46 = vld [vmem:[%s2681_s29 + $0xb0] sm:$0xff]   ;;  %v2307_v48 = vld [vmem:[%s2681_s29 + $0xb8] sm:$0xff]  }
  0x24   : > { %2092 = vmatmul.mubr.msk.bf16.gmra.mrb[4].mxu0 %vm742_vm0, %v2267_v8  ;;  %2156 = vmatmul.mubr.msk.bf16.gmra.mrb[4].mxu1 %vm742_vm0, %v2268_v9  ;;  %v2304_v45 = vld [vmem:[%s2681_s29 + $0x1a8] sm:$0xff]   ;;  %v2306_v47 = vld [vmem:[%s2681_s29 + $0x1b0] sm:$0xff]   ;;  %v2308_v49 = vld [vmem:[%s2681_s29 + $0x1b8] sm:$0xff]  }
  0x25   : > { %2095 = vmatprep.mubr.msk.bf16.mxu0 %vm742_vm0, %v2269_v10  ;;  %2159 = vmatprep.mubr.msk.bf16.mxu1 %vm742_vm0, %v2270_v11  ;;  %v2309_v50 = vld [vmem:[%s2681_s29 + $0xc0] sm:$0xff]   ;;  %v2311_v52 = vld [vmem:[%s2681_s29 + $0xc8] sm:$0xff]   ;;  %v2313_v54 = vld [vmem:[%s2681_s29 + $0xd0] sm:$0xff]  }
  0x26   : > { %v2310_v51 = vld [vmem:[%s2681_s29 + $0x1c0] sm:$0xff]   ;;  %v2312_v53 = vld [vmem:[%s2681_s29 + $0x1c8] sm:$0xff]   ;;  %v2314_v55 = vld [vmem:[%s2681_s29 + $0x1d0] sm:$0xff]  }
  0x27   : > { %v2315_v56 = vld [vmem:[%s2681_s29 + $0xd8] sm:$0xff]   ;;  %v2317_v58 = vld [vmem:[%s2681_s29 + $0xe0] sm:$0xff]   ;;  %v2319_v60 = vld [vmem:[%s2681_s29 + $0xe8] sm:$0xff]  }
  0x28   : > { %v2316_v57 = vld [vmem:[%s2681_s29 + $0x1d8] sm:$0xff]   ;;  %v2318_v59 = vld [vmem:[%s2681_s29 + $0x1e0] sm:$0xff]   ;;  %v2320_v61 = vld [vmem:[%s2681_s29 + $0x1e8] sm:$0xff]  }
  0x29   : > { %v2321_v62 = vld [vmem:[%s2681_s29 + $0xf0] sm:$0xff]   ;;  %v2323_v0 = vld [vmem:[%s2681_s29 + $0xf8] sm:$0xff]   ;;  %v2814_v2 = vld [vmem:[%s3100_s2] ss:$0 sm:$0xff] }
  0x2a   : > { %v2322_v63 = vld [vmem:[%s2681_s29 + $0x1f0] sm:$0xff]   ;;  %v2324_v1 = vld [vmem:[%s2681_s29 + $0x1f8] sm:$0xff]  }
  0x2c   : > { %2096 = vmatmul.mubr.msk.bf16.gmra.mrb[8].mxu0 %vm742_vm0, %v2271_v12  ;;  %2160 = vmatmul.mubr.msk.bf16.gmra.mrb[8].mxu1 %vm742_vm0, %v2272_v13 }
  0x2d   : > { %2099 = vmatprep.mubr.msk.bf16.mxu0 %vm742_vm0, %v2273_v14  ;;  %2163 = vmatprep.mubr.msk.bf16.mxu1 %vm742_vm0, %v2274_v15 }
  0x34   : > { %2100 = vmatmul.mubr.msk.bf16.gmra.mrb[12].mxu0 %vm742_vm0, %v2275_v16  ;;  %2164 = vmatmul.mubr.msk.bf16.gmra.mrb[12].mxu1 %vm742_vm0, %v2276_v17 }
  0x35   : > { %2103 = vmatprep.mubr.msk.bf16.mxu0 %vm742_vm0, %v2277_v18  ;;  %2167 = vmatprep.mubr.msk.bf16.mxu1 %vm742_vm0, %v2278_v19 }
  0x3c   : > { %2104 = vmatmul.mubr.msk.bf16.gmra.mrb[16].mxu0 %vm742_vm0, %v2279_v20  ;;  %2168 = vmatmul.mubr.msk.bf16.gmra.mrb[16].mxu1 %vm742_vm0, %v2280_v21 }
  0x3d   : > { %2107 = vmatprep.mubr.msk.bf16.mxu0 %vm742_vm0, %v2281_v22  ;;  %2171 = vmatprep.mubr.msk.bf16.mxu1 %vm742_vm0, %v2282_v23 }
  0x44   : > { %2108 = vmatmul.mubr.msk.bf16.gmra.mrb[20].mxu0 %vm742_vm0, %v2283_v24  ;;  %2172 = vmatmul.mubr.msk.bf16.gmra.mrb[20].mxu1 %vm742_vm0, %v2284_v25 }
  0x45   : > { %2111 = vmatprep.mubr.msk.bf16.mxu0 %vm742_vm0, %v2285_v26  ;;  %2175 = vmatprep.mubr.msk.bf16.mxu1 %vm742_vm0, %v2286_v27 }
  0x4c   : > { %2112 = vmatmul.mubr.msk.bf16.gmra.mrb[24].mxu0 %vm742_vm0, %v2287_v28  ;;  %2176 = vmatmul.mubr.msk.bf16.gmra.mrb[24].mxu1 %vm742_vm0, %v2288_v29 }
  0x4d   : > { %2115 = vmatprep.mubr.msk.bf16.mxu0 %vm742_vm0, %v2289_v30  ;;  %2179 = vmatprep.mubr.msk.bf16.mxu1 %vm742_vm0, %v2290_v31 }
  0x54   : > { %2116 = vmatmul.mubr.msk.bf16.gmra.mrb[28].mxu0 %vm742_vm0, %v2291_v32  ;;  %2180 = vmatmul.mubr.msk.bf16.gmra.mrb[28].mxu1 %vm742_vm0, %v2292_v33 }
  0x55   : > { %2119 = vmatprep.mubr.msk.bf16.mxu0 %vm742_vm0, %v2293_v34  ;;  %2183 = vmatprep.mubr.msk.bf16.mxu1 %vm742_vm0, %v2294_v35 }
  0x5c   : > { %2120 = vmatmul.mubr.msk.bf16.gmra.mrb[32].mxu0 %vm742_vm0, %v2295_v36  ;;  %2184 = vmatmul.mubr.msk.bf16.gmra.mrb[32].mxu1 %vm742_vm0, %v2296_v37 }
  0x5d   : > { %2123 = vmatprep.mubr.msk.bf16.mxu0 %vm742_vm0, %v2297_v38  ;;  %2187 = vmatprep.mubr.msk.bf16.mxu1 %vm742_vm0, %v2298_v39 }
  0x64   : > { %2124 = vmatmul.mubr.msk.bf16.gmra.mrb[36].mxu0 %vm742_vm0, %v2299_v40  ;;  %2188 = vmatmul.mubr.msk.bf16.gmra.mrb[36].mxu1 %vm742_vm0, %v2300_v41 }
  0x65   : > { %2127 = vmatprep.mubr.msk.bf16.mxu0 %vm742_vm0, %v2301_v42  ;;  %2191 = vmatprep.mubr.msk.bf16.mxu1 %vm742_vm0, %v2302_v43 }
  0x6c   : > { %2128 = vmatmul.mubr.msk.bf16.gmra.mrb[40].mxu0 %vm742_vm0, %v2303_v44  ;;  %2192 = vmatmul.mubr.msk.bf16.gmra.mrb[40].mxu1 %vm742_vm0, %v2304_v45 }
  0x6d   : > { %2131 = vmatprep.mubr.msk.bf16.mxu0 %vm742_vm0, %v2305_v46  ;;  %2195 = vmatprep.mubr.msk.bf16.mxu1 %vm742_vm0, %v2306_v47 }
  0x74   : > { %2132 = vmatmul.mubr.msk.bf16.gmra.mrb[44].mxu0 %vm742_vm0, %v2307_v48  ;;  %2196 = vmatmul.mubr.msk.bf16.gmra.mrb[44].mxu1 %vm742_vm0, %v2308_v49 }
  0x75   : > { %2135 = vmatprep.mubr.msk.bf16.mxu0 %vm742_vm0, %v2309_v50  ;;  %2199 = vmatprep.mubr.msk.bf16.mxu1 %vm742_vm0, %v2310_v51 }
  0x7c   : > { %2136 = vmatmul.mubr.msk.bf16.gmra.mrb[48].mxu0 %vm742_vm0, %v2311_v52  ;;  %2200 = vmatmul.mubr.msk.bf16.gmra.mrb[48].mxu1 %vm742_vm0, %v2312_v53 }
  0x7d   : > { %2139 = vmatprep.mubr.msk.bf16.mxu0 %vm742_vm0, %v2313_v54  ;;  %2203 = vmatprep.mubr.msk.bf16.mxu1 %vm742_vm0, %v2314_v55 }
  0x84   : > { %2140 = vmatmul.mubr.msk.bf16.gmra.mrb[52].mxu0 %vm742_vm0, %v2315_v56  ;;  %2204 = vmatmul.mubr.msk.bf16.gmra.mrb[52].mxu1 %vm742_vm0, %v2316_v57 }
  0x85   : > { %2143 = vmatprep.mubr.msk.bf16.mxu0 %vm742_vm0, %v2317_v58  ;;  %2207 = vmatprep.mubr.msk.bf16.mxu1 %vm742_vm0, %v2318_v59 }
  0x8c   : > { %2144 = vmatmul.mubr.msk.bf16.gmra.mrb[56].mxu0 %vm742_vm0, %v2319_v60  ;;  %2208 = vmatmul.mubr.msk.bf16.gmra.mrb[56].mxu1 %vm742_vm0, %v2320_v61 }
  0x8d   : > { %2147 = vmatprep.mubr.msk.bf16.mxu0 %vm742_vm0, %v2321_v62  ;;  %2211 = vmatprep.mubr.msk.bf16.mxu1 %vm742_vm0, %v2322_v63 }
  0x94   : > { %2148 = vmatmul.mubr.msk.bf16.gmra.mrb[60].mxu0 %vm742_vm0, %v2323_v0  ;;  %2212 = vmatmul.mubr.msk.bf16.gmra.mrb[60].mxu1 %vm742_vm0, %v2324_v1 }
  0xef   : > { %v2089_v3 = vpop.f32.mrb[0].mxu0  ;;  %v2153_v4 = vpop.f32.mrb[0].mxu1 }
  0xf0   : > { %v978_v5 = vadd.f32 %v2089_v3, %v2814_v2  ;;  %v1234_v6 = vadd.f32 %v2153_v4, %v2814_v2  ;;  %v969_v7 = vpop.f32.mrb[1].mxu0  ;;  %v1225_v8 = vpop.f32.mrb[1].mxu1 }
  0xf1   : > { %v970_v9 = vadd.f32 %v2814_v2, %v969_v7  ;;  %v1226_v10 = vadd.f32 %v2814_v2, %v1225_v8  ;;  %v2090_v11 = vpop.f32.mrb[2].mxu0  ;;  %v2154_v12 = vpop.f32.mrb[2].mxu1 }
  0xf2   : > { %2325 = vtanh.f32 %v978_v5  ;;  %v981_v13 = vadd.f32 %v2090_v11, %v2814_v2  ;;  %v972_v14 = vpop.f32.mrb[3].mxu0  ;;  %v1228_v15 = vpop.f32.mrb[3].mxu1  ;;  %v1237_v16 = vadd.f32 %v2154_v12, %v2814_v2 }
  0xf3   : > { %2327 = vtanh.f32 %v1234_v6  ;;  %v973_v17 = vadd.f32 %v2814_v2, %v972_v14  ;;  %v1229_v18 = vadd.f32 %v2814_v2, %v1228_v15 }
  0xf4   : > { %2329 = vtanh.f32 %v970_v9 }
  0xf5   : > { %2331 = vtanh.f32 %v1226_v10 }
  0xf6   : > { %2333 = vtanh.f32 %v981_v13 }
  0xf7   : > { %2335 = vtanh.f32 %v1237_v16  ;;  %v2093_v19 = vpop.f32.mrb[4].mxu0  ;;  %v2157_v20 = vpop.f32.mrb[4].mxu1 }
  0xf8   : > { %2337 = vtanh.f32 %v973_v17  ;;  %v994_v21 = vadd.f32 %v2093_v19, %v2814_v2  ;;  %v1250_v22 = vadd.f32 %v2157_v20, %v2814_v2  ;;  %v985_v23 = vpop.f32.mrb[5].mxu0  ;;  %v1241_v24 = vpop.f32.mrb[5].mxu1 }
  0xf9   : > { %2339 = vtanh.f32 %v1229_v18  ;;  %v986_v25 = vadd.f32 %v2814_v2, %v985_v23  ;;  %v1242_v26 = vadd.f32 %v2814_v2, %v1241_v24  ;;  %v2094_v27 = vpop.f32.mrb[6].mxu0  ;;  %v2158_v28 = vpop.f32.mrb[6].mxu1 }
  0xfa   : > { %2341 = vtanh.f32 %v994_v21  ;;  %v997_v29 = vadd.f32 %v2094_v27, %v2814_v2  ;;  %v988_v30 = vpop.f32.mrb[7].mxu0  ;;  %v1244_v31 = vpop.f32.mrb[7].mxu1  ;;  %v1253_v32 = vadd.f32 %v2158_v28, %v2814_v2 }
  0xfb   : > { %2343 = vtanh.f32 %v1250_v22  ;;  %v989_v34 = vadd.f32 %v2814_v2, %v988_v30  ;;  %v1245_v36 = vadd.f32 %v2814_v2, %v1244_v31 }
  0xfc   : > { %v2326_v33 = vpop.eup %2325  ;;  %2345 = vtanh.f32 %v986_v25 }
  0xfd   : > { %v2328_v35 = vpop.eup %2327  ;;  %1610 = vst [vmem:[%s2832_s8 + $0x10] sm:$0xff] %v2326_v33  ;;  %2347 = vtanh.f32 %v1242_v26 }
  0xfe   : > { %v2330_v37 = vpop.eup %2329  ;;  %1674 = vst [vmem:[%s2832_s8 + $0x210] sm:$0xff] %v2328_v35  ;;  %2349 = vtanh.f32 %v997_v29 }
  0xff   : > { %v2332_v38 = vpop.eup %2331  ;;  %1608 = vst [vmem:[%s2832_s8] sm:$0xff] %v2330_v37  ;;  %2351 = vtanh.f32 %v1253_v32  ;;  %v2097_v39 = vpop.f32.mrb[8].mxu0 }
 0x100   : > { %v2161_v40 = vpop.f32.mrb[8].mxu1  ;;  %v2334_v41 = vpop.eup %2333  ;;  %1672 = vst [vmem:[%s2832_s8 + $0x200] sm:$0xff] %v2332_v38  ;;  %2353 = vtanh.f32 %v989_v34  ;;  %v1010_v42 = vadd.f32 %v2097_v39, %v2814_v2 }
 0x101   : > { %v1266_v43 = vadd.f32 %v2161_v40, %v2814_v2  ;;  %v1001_v44 = vpop.f32.mrb[9].mxu0  ;;  %v1257_v45 = vpop.f32.mrb[9].mxu1  ;;  %1611 = vst [vmem:[%s2832_s8 + $0x18] sm:$0xff] %v2334_v41  ;;  %2355 = vtanh.f32 %v1245_v36 }
 0x102   : > { %v2336_v46 = vpop.eup %2335  ;;  %v1002_v47 = vadd.f32 %v2814_v2, %v1001_v44  ;;  %v1258_v48 = vadd.f32 %v2814_v2, %v1257_v45  ;;  %v2098_v49 = vpop.f32.mrb[10].mxu0  ;;  %2357 = vtanh.f32 %v1010_v42 }
 0x103   : > { %v2162_v50 = vpop.f32.mrb[10].mxu1  ;;  %v2338_v51 = vpop.eup %2337  ;;  %1675 = vst [vmem:[%s2832_s8 + $0x218] sm:$0xff] %v2336_v46  ;;  %v1013_v52 = vadd.f32 %v2098_v49, %v2814_v2  ;;  %2359 = vtanh.f32 %v1266_v43 }
 0x104   : > { %v1004_v53 = vpop.f32.mrb[11].mxu0  ;;  %v1260_v54 = vpop.f32.mrb[11].mxu1  ;;  %1609 = vst [vmem:[%s2832_s8 + $0x8] sm:$0xff] %v2338_v51  ;;  %v1269_v56 = vadd.f32 %v2162_v50, %v2814_v2  ;;  %2361 = vtanh.f32 %v1002_v47 }
 0x105   : > { %v2340_v55 = vpop.eup %2339  ;;  %v1005_v58 = vadd.f32 %v2814_v2, %v1004_v53  ;;  %2363 = vtanh.f32 %v1258_v48  ;;  %v1261_v60 = vadd.f32 %v2814_v2, %v1260_v54 }
 0x106   : > { %v2342_v57 = vpop.eup %2341  ;;  %1673 = vst [vmem:[%s2832_s8 + $0x208] sm:$0xff] %v2340_v55  ;;  %2365 = vtanh.f32 %v1013_v52 }
 0x107   : > { %v2344_v59 = vpop.eup %2343  ;;  %1614 = vst [vmem:[%s2832_s8 + $0x30] sm:$0xff] %v2342_v57  ;;  %2367 = vtanh.f32 %v1269_v56  ;;  %v2101_v63 = vpop.f32.mrb[12].mxu0 }
 0x108   : > { %v2346_v61 = vpop.eup %2345  ;;  %1678 = vst [vmem:[%s2832_s8 + $0x230] sm:$0xff] %v2344_v59  ;;  %v2165_v0 = vpop.f32.mrb[12].mxu1  ;;  %2369 = vtanh.f32 %v1005_v58  ;;  %v1026_v3 = vadd.f32 %v2101_v63, %v2814_v2 }
 0x109   : > { %v2348_v62 = vpop.eup %2347  ;;  %1612 = vst [vmem:[%s2832_s8 + $0x20] sm:$0xff] %v2346_v61  ;;  %v1282_v4 = vadd.f32 %v2165_v0, %v2814_v2  ;;  %v1017_v5 = vpop.f32.mrb[13].mxu0  ;;  %2371 = vtanh.f32 %v1261_v60 }
 0x10a   : > { %v2350_v1 = vpop.eup %2349  ;;  %1676 = vst [vmem:[%s2832_s8 + $0x220] sm:$0xff] %v2348_v62  ;;  %v1273_v6 = vpop.f32.mrb[13].mxu1  ;;  %v1018_v8 = vadd.f32 %v2814_v2, %v1017_v5  ;;  %2373 = vtanh.f32 %v1026_v3 }
 0x10b   : > { %v2352_v7 = vpop.eup %2351  ;;  %1615 = vst [vmem:[%s2832_s8 + $0x38] sm:$0xff] %v2350_v1  ;;  %v1274_v9 = vadd.f32 %v2814_v2, %v1273_v6  ;;  %v2102_v10 = vpop.f32.mrb[14].mxu0  ;;  %2375 = vtanh.f32 %v1282_v4 }
 0x10c   : > { %v2166_v11 = vpop.f32.mrb[14].mxu1  ;;  %v2354_v12 = vpop.eup %2353  ;;  %1679 = vst [vmem:[%s2832_s8 + $0x238] sm:$0xff] %v2352_v7  ;;  %v1029_v13 = vadd.f32 %v2102_v10, %v2814_v2  ;;  %2377 = vtanh.f32 %v1018_v8 }
 0x10d   : > { %v1020_v14 = vpop.f32.mrb[15].mxu0  ;;  %v1276_v15 = vpop.f32.mrb[15].mxu1  ;;  %1613 = vst [vmem:[%s2832_s8 + $0x28] sm:$0xff] %v2354_v12  ;;  %v1285_v17 = vadd.f32 %v2166_v11, %v2814_v2  ;;  %2379 = vtanh.f32 %v1274_v9 }
 0x10e   : > { %v2356_v16 = vpop.eup %2355  ;;  %v1021_v19 = vadd.f32 %v2814_v2, %v1020_v14  ;;  %v1277_v21 = vadd.f32 %v2814_v2, %v1276_v15  ;;  %2381 = vtanh.f32 %v1029_v13 }
 0x10f   : > { %v2358_v18 = vpop.eup %2357  ;;  %1677 = vst [vmem:[%s2832_s8 + $0x228] sm:$0xff] %v2356_v16  ;;  %2383 = vtanh.f32 %v1285_v17  ;;  %v2105_v24 = vpop.f32.mrb[16].mxu0 }
 0x110   : > { %v2360_v20 = vpop.eup %2359  ;;  %1618 = vst [vmem:[%s2832_s8 + $0x50] sm:$0xff] %v2358_v18  ;;  %v2169_v25 = vpop.f32.mrb[16].mxu1  ;;  %2385 = vtanh.f32 %v1021_v19  ;;  %v1042_v27 = vadd.f32 %v2105_v24, %v2814_v2 }
 0x111   : > { %v2362_v22 = vpop.eup %2361  ;;  %1682 = vst [vmem:[%s2832_s8 + $0x250] sm:$0xff] %v2360_v20  ;;  %v1298_v28 = vadd.f32 %v2169_v25, %v2814_v2  ;;  %v1033_v29 = vpop.f32.mrb[17].mxu0  ;;  %2387 = vtanh.f32 %v1277_v21 }
 0x112   : > { %v2364_v23 = vpop.eup %2363  ;;  %1616 = vst [vmem:[%s2832_s8 + $0x40] sm:$0xff] %v2362_v22  ;;  %v1289_v30 = vpop.f32.mrb[17].mxu1  ;;  %v1034_v32 = vadd.f32 %v2814_v2, %v1033_v29  ;;  %2389 = vtanh.f32 %v1042_v27 }
 0x113   : > { %v2366_v26 = vpop.eup %2365  ;;  %1680 = vst [vmem:[%s2832_s8 + $0x240] sm:$0xff] %v2364_v23  ;;  %v1290_v33 = vadd.f32 %v2814_v2, %v1289_v30  ;;  %v2106_v34 = vpop.f32.mrb[18].mxu0  ;;  %2391 = vtanh.f32 %v1298_v28 }
 0x114   : > { %v2368_v31 = vpop.eup %2367  ;;  %1619 = vst [vmem:[%s2832_s8 + $0x58] sm:$0xff] %v2366_v26  ;;  %v2170_v35 = vpop.f32.mrb[18].mxu1  ;;  %v1045_v37 = vadd.f32 %v2106_v34, %v2814_v2  ;;  %2393 = vtanh.f32 %v1034_v32 }
 0x115   : > { %v2370_v36 = vpop.eup %2369  ;;  %1683 = vst [vmem:[%s2832_s8 + $0x258] sm:$0xff] %v2368_v31  ;;  %v1036_v38 = vpop.f32.mrb[19].mxu0  ;;  %v1301_v41 = vadd.f32 %v2170_v35, %v2814_v2  ;;  %2395 = vtanh.f32 %v1290_v33 }
 0x116   : > { %v1292_v39 = vpop.f32.mrb[19].mxu1  ;;  %v2372_v40 = vpop.eup %2371  ;;  %1617 = vst [vmem:[%s2832_s8 + $0x48] sm:$0xff] %v2370_v36  ;;  %v1037_v43 = vadd.f32 %v2814_v2, %v1036_v38  ;;  %2397 = vtanh.f32 %v1045_v37 }
 0x117   : > { %v2374_v42 = vpop.eup %2373  ;;  %1681 = vst [vmem:[%s2832_s8 + $0x248] sm:$0xff] %v2372_v40  ;;  %v1293_v45 = vadd.f32 %v2814_v2, %v1292_v39  ;;  %2399 = vtanh.f32 %v1301_v41  ;;  %v2109_v48 = vpop.f32.mrb[20].mxu0 }
 0x118   : > { %v2376_v44 = vpop.eup %2375  ;;  %1622 = vst [vmem:[%s2832_s8 + $0x70] sm:$0xff] %v2374_v42  ;;  %v2173_v49 = vpop.f32.mrb[20].mxu1  ;;  %2401 = vtanh.f32 %v1037_v43  ;;  %v1058_v51 = vadd.f32 %v2109_v48, %v2814_v2 }
 0x119   : > { %v2378_v46 = vpop.eup %2377  ;;  %1686 = vst [vmem:[%s2832_s8 + $0x270] sm:$0xff] %v2376_v44  ;;  %v1314_v52 = vadd.f32 %v2173_v49, %v2814_v2  ;;  %v1049_v53 = vpop.f32.mrb[21].mxu0  ;;  %2403 = vtanh.f32 %v1293_v45 }
 0x11a   : > { %v2380_v47 = vpop.eup %2379  ;;  %1620 = vst [vmem:[%s2832_s8 + $0x60] sm:$0xff] %v2378_v46  ;;  %v1305_v54 = vpop.f32.mrb[21].mxu1  ;;  %v1050_v56 = vadd.f32 %v2814_v2, %v1049_v53  ;;  %2405 = vtanh.f32 %v1058_v51 }
 0x11b   : > { %v2382_v50 = vpop.eup %2381  ;;  %1684 = vst [vmem:[%s2832_s8 + $0x260] sm:$0xff] %v2380_v47  ;;  %v1306_v57 = vadd.f32 %v2814_v2, %v1305_v54  ;;  %v2110_v58 = vpop.f32.mrb[22].mxu0  ;;  %2407 = vtanh.f32 %v1314_v52 }
 0x11c   : > { %v2384_v55 = vpop.eup %2383  ;;  %1623 = vst [vmem:[%s2832_s8 + $0x78] sm:$0xff] %v2382_v50  ;;  %v2174_v59 = vpop.f32.mrb[22].mxu1  ;;  %v1061_v61 = vadd.f32 %v2110_v58, %v2814_v2  ;;  %2409 = vtanh.f32 %v1050_v56 }
 0x11d   : > { %v2386_v60 = vpop.eup %2385  ;;  %1687 = vst [vmem:[%s2832_s8 + $0x278] sm:$0xff] %v2384_v55  ;;  %v1052_v62 = vpop.f32.mrb[23].mxu0  ;;  %v1317_v1 = vadd.f32 %v2174_v59, %v2814_v2  ;;  %2411 = vtanh.f32 %v1306_v57 }
 0x11e   : > { %v1308_v63 = vpop.f32.mrb[23].mxu1  ;;  %v2388_v0 = vpop.eup %2387  ;;  %1621 = vst [vmem:[%s2832_s8 + $0x68] sm:$0xff] %v2386_v60  ;;  %v1053_v4 = vadd.f32 %v2814_v2, %v1052_v62  ;;  %2413 = vtanh.f32 %v1061_v61 }
 0x11f   : > { %v2390_v3 = vpop.eup %2389  ;;  %1685 = vst [vmem:[%s2832_s8 + $0x268] sm:$0xff] %v2388_v0  ;;  %v1309_v6 = vadd.f32 %v2814_v2, %v1308_v63  ;;  %2415 = vtanh.f32 %v1317_v1  ;;  %v2113_v9 = vpop.f32.mrb[24].mxu0 }
 0x120   : > { %v2392_v5 = vpop.eup %2391  ;;  %1626 = vst [vmem:[%s2832_s8 + $0x90] sm:$0xff] %v2390_v3  ;;  %v2177_v10 = vpop.f32.mrb[24].mxu1  ;;  %2417 = vtanh.f32 %v1053_v4  ;;  %v1074_v12 = vadd.f32 %v2113_v9, %v2814_v2 }
 0x121   : > { %v2394_v7 = vpop.eup %2393  ;;  %1690 = vst [vmem:[%s2832_s8 + $0x290] sm:$0xff] %v2392_v5  ;;  %v1330_v13 = vadd.f32 %v2177_v10, %v2814_v2  ;;  %v1065_v14 = vpop.f32.mrb[25].mxu0  ;;  %2419 = vtanh.f32 %v1309_v6 }
 0x122   : > { %v2396_v8 = vpop.eup %2395  ;;  %1624 = vst [vmem:[%s2832_s8 + $0x80] sm:$0xff] %v2394_v7  ;;  %v1321_v15 = vpop.f32.mrb[25].mxu1  ;;  %v1066_v17 = vadd.f32 %v2814_v2, %v1065_v14  ;;  %2421 = vtanh.f32 %v1074_v12 }
 0x123   : > { %v2398_v11 = vpop.eup %2397  ;;  %1688 = vst [vmem:[%s2832_s8 + $0x280] sm:$0xff] %v2396_v8  ;;  %v1322_v18 = vadd.f32 %v2814_v2, %v1321_v15  ;;  %v2114_v19 = vpop.f32.mrb[26].mxu0  ;;  %2423 = vtanh.f32 %v1330_v13 }
 0x124   : > { %v2400_v16 = vpop.eup %2399  ;;  %1627 = vst [vmem:[%s2832_s8 + $0x98] sm:$0xff] %v2398_v11  ;;  %v2178_v20 = vpop.f32.mrb[26].mxu1  ;;  %v1077_v22 = vadd.f32 %v2114_v19, %v2814_v2  ;;  %2425 = vtanh.f32 %v1066_v17 }
 0x125   : > { %v2402_v21 = vpop.eup %2401  ;;  %1691 = vst [vmem:[%s2832_s8 + $0x298] sm:$0xff] %v2400_v16  ;;  %v1068_v23 = vpop.f32.mrb[27].mxu0  ;;  %v1333_v26 = vadd.f32 %v2178_v20, %v2814_v2  ;;  %2427 = vtanh.f32 %v1322_v18 }
 0x126   : > { %v1324_v24 = vpop.f32.mrb[27].mxu1  ;;  %v2404_v25 = vpop.eup %2403  ;;  %1625 = vst [vmem:[%s2832_s8 + $0x88] sm:$0xff] %v2402_v21  ;;  %v1069_v28 = vadd.f32 %v2814_v2, %v1068_v23  ;;  %2429 = vtanh.f32 %v1077_v22 }
 0x127   : > { %v2406_v27 = vpop.eup %2405  ;;  %1689 = vst [vmem:[%s2832_s8 + $0x288] sm:$0xff] %v2404_v25  ;;  %v1325_v30 = vadd.f32 %v2814_v2, %v1324_v24  ;;  %2431 = vtanh.f32 %v1333_v26  ;;  %v2117_v33 = vpop.f32.mrb[28].mxu0 }
 0x128   : > { %v2408_v29 = vpop.eup %2407  ;;  %1630 = vst [vmem:[%s2832_s8 + $0xb0] sm:$0xff] %v2406_v27  ;;  %v2181_v34 = vpop.f32.mrb[28].mxu1  ;;  %2433 = vtanh.f32 %v1069_v28  ;;  %v1090_v36 = vadd.f32 %v2117_v33, %v2814_v2 }
 0x129   : > { %v2410_v31 = vpop.eup %2409  ;;  %1694 = vst [vmem:[%s2832_s8 + $0x2b0] sm:$0xff] %v2408_v29  ;;  %v1346_v37 = vadd.f32 %v2181_v34, %v2814_v2  ;;  %v1081_v38 = vpop.f32.mrb[29].mxu0  ;;  %2435 = vtanh.f32 %v1325_v30 }
 0x12a   : > { %v2412_v32 = vpop.eup %2411  ;;  %1628 = vst [vmem:[%s2832_s8 + $0xa0] sm:$0xff] %v2410_v31  ;;  %v1337_v39 = vpop.f32.mrb[29].mxu1  ;;  %v1082_v41 = vadd.f32 %v2814_v2, %v1081_v38  ;;  %2437 = vtanh.f32 %v1090_v36 }
 0x12b   : > { %v2414_v35 = vpop.eup %2413  ;;  %1692 = vst [vmem:[%s2832_s8 + $0x2a0] sm:$0xff] %v2412_v32  ;;  %v1338_v42 = vadd.f32 %v2814_v2, %v1337_v39  ;;  %v2118_v43 = vpop.f32.mrb[30].mxu0  ;;  %2439 = vtanh.f32 %v1346_v37 }
 0x12c   : > { %v2416_v40 = vpop.eup %2415  ;;  %1631 = vst [vmem:[%s2832_s8 + $0xb8] sm:$0xff] %v2414_v35  ;;  %v2182_v44 = vpop.f32.mrb[30].mxu1  ;;  %v1093_v46 = vadd.f32 %v2118_v43, %v2814_v2  ;;  %2441 = vtanh.f32 %v1082_v41 }
 0x12d   : > { %v2418_v45 = vpop.eup %2417  ;;  %1695 = vst [vmem:[%s2832_s8 + $0x2b8] sm:$0xff] %v2416_v40  ;;  %v1084_v47 = vpop.f32.mrb[31].mxu0  ;;  %v1349_v50 = vadd.f32 %v2182_v44, %v2814_v2  ;;  %2443 = vtanh.f32 %v1338_v42 }
 0x12e   : > { %v1340_v48 = vpop.f32.mrb[31].mxu1  ;;  %v2420_v49 = vpop.eup %2419  ;;  %1629 = vst [vmem:[%s2832_s8 + $0xa8] sm:$0xff] %v2418_v45  ;;  %v1085_v52 = vadd.f32 %v2814_v2, %v1084_v47  ;;  %2445 = vtanh.f32 %v1093_v46 }
 0x12f   : > { %v2422_v51 = vpop.eup %2421  ;;  %1693 = vst [vmem:[%s2832_s8 + $0x2a8] sm:$0xff] %v2420_v49  ;;  %v1341_v54 = vadd.f32 %v2814_v2, %v1340_v48  ;;  %2447 = vtanh.f32 %v1349_v50  ;;  %v2121_v57 = vpop.f32.mrb[32].mxu0 }
 0x130   : > { %v2424_v53 = vpop.eup %2423  ;;  %1634 = vst [vmem:[%s2832_s8 + $0xd0] sm:$0xff] %v2422_v51  ;;  %v2185_v58 = vpop.f32.mrb[32].mxu1  ;;  %2449 = vtanh.f32 %v1085_v52  ;;  %v1106_v60 = vadd.f32 %v2121_v57, %v2814_v2 }
 0x131   : > { %v2426_v55 = vpop.eup %2425  ;;  %1698 = vst [vmem:[%s2832_s8 + $0x2d0] sm:$0xff] %v2424_v53  ;;  %v1362_v61 = vadd.f32 %v2185_v58, %v2814_v2  ;;  %v1097_v62 = vpop.f32.mrb[33].mxu0  ;;  %2451 = vtanh.f32 %v1341_v54 }
 0x132   : > { %v2428_v56 = vpop.eup %2427  ;;  %1632 = vst [vmem:[%s2832_s8 + $0xc0] sm:$0xff] %v2426_v55  ;;  %v1353_v63 = vpop.f32.mrb[33].mxu1  ;;  %v1098_v1 = vadd.f32 %v2814_v2, %v1097_v62  ;;  %2453 = vtanh.f32 %v1106_v60 }
 0x133   : > { %v2430_v59 = vpop.eup %2429  ;;  %1696 = vst [vmem:[%s2832_s8 + $0x2c0] sm:$0xff] %v2428_v56  ;;  %v1354_v3 = vadd.f32 %v2814_v2, %v1353_v63  ;;  %v2122_v4 = vpop.f32.mrb[34].mxu0  ;;  %2455 = vtanh.f32 %v1362_v61 }
 0x134   : > { %v2432_v0 = vpop.eup %2431  ;;  %1635 = vst [vmem:[%s2832_s8 + $0xd8] sm:$0xff] %v2430_v59  ;;  %v2186_v5 = vpop.f32.mrb[34].mxu1  ;;  %v1109_v7 = vadd.f32 %v2122_v4, %v2814_v2  ;;  %2457 = vtanh.f32 %v1098_v1 }
 0x135   : > { %v2434_v6 = vpop.eup %2433  ;;  %1699 = vst [vmem:[%s2832_s8 + $0x2d8] sm:$0xff] %v2432_v0  ;;  %v1100_v8 = vpop.f32.mrb[35].mxu0  ;;  %v1365_v11 = vadd.f32 %v2186_v5, %v2814_v2  ;;  %2459 = vtanh.f32 %v1354_v3 }
 0x136   : > { %v1356_v9 = vpop.f32.mrb[35].mxu1  ;;  %v2436_v10 = vpop.eup %2435  ;;  %1633 = vst [vmem:[%s2832_s8 + $0xc8] sm:$0xff] %v2434_v6  ;;  %v1101_v13 = vadd.f32 %v2814_v2, %v1100_v8  ;;  %2461 = vtanh.f32 %v1109_v7 }
 0x137   : > { %v2438_v12 = vpop.eup %2437  ;;  %1697 = vst [vmem:[%s2832_s8 + $0x2c8] sm:$0xff] %v2436_v10  ;;  %v1357_v15 = vadd.f32 %v2814_v2, %v1356_v9  ;;  %2463 = vtanh.f32 %v1365_v11  ;;  %v2125_v18 = vpop.f32.mrb[36].mxu0 }
 0x138   : > { %v2440_v14 = vpop.eup %2439  ;;  %1638 = vst [vmem:[%s2832_s8 + $0xf0] sm:$0xff] %v2438_v12  ;;  %v2189_v19 = vpop.f32.mrb[36].mxu1  ;;  %2465 = vtanh.f32 %v1101_v13  ;;  %v1122_v21 = vadd.f32 %v2125_v18, %v2814_v2 }
 0x139   : > { %v2442_v16 = vpop.eup %2441  ;;  %1702 = vst [vmem:[%s2832_s8 + $0x2f0] sm:$0xff] %v2440_v14  ;;  %v1378_v22 = vadd.f32 %v2189_v19, %v2814_v2  ;;  %v1113_v23 = vpop.f32.mrb[37].mxu0  ;;  %2467 = vtanh.f32 %v1357_v15 }
 0x13a   : > { %v2444_v17 = vpop.eup %2443  ;;  %1636 = vst [vmem:[%s2832_s8 + $0xe0] sm:$0xff] %v2442_v16  ;;  %v1369_v24 = vpop.f32.mrb[37].mxu1  ;;  %v1114_v26 = vadd.f32 %v2814_v2, %v1113_v23  ;;  %2469 = vtanh.f32 %v1122_v21 }
 0x13b   : > { %v2446_v20 = vpop.eup %2445  ;;  %1700 = vst [vmem:[%s2832_s8 + $0x2e0] sm:$0xff] %v2444_v17  ;;  %v1370_v27 = vadd.f32 %v2814_v2, %v1369_v24  ;;  %v2126_v28 = vpop.f32.mrb[38].mxu0  ;;  %2471 = vtanh.f32 %v1378_v22 }
 0x13c   : > { %v2448_v25 = vpop.eup %2447  ;;  %1639 = vst [vmem:[%s2832_s8 + $0xf8] sm:$0xff] %v2446_v20  ;;  %v2190_v29 = vpop.f32.mrb[38].mxu1  ;;  %v1125_v31 = vadd.f32 %v2126_v28, %v2814_v2  ;;  %2473 = vtanh.f32 %v1114_v26 }
 0x13d   : > { %v2450_v30 = vpop.eup %2449  ;;  %1703 = vst [vmem:[%s2832_s8 + $0x2f8] sm:$0xff] %v2448_v25  ;;  %v1116_v32 = vpop.f32.mrb[39].mxu0  ;;  %v1381_v35 = vadd.f32 %v2190_v29, %v2814_v2  ;;  %2475 = vtanh.f32 %v1370_v27 }
 0x13e   : > { %v1372_v33 = vpop.f32.mrb[39].mxu1  ;;  %v2452_v34 = vpop.eup %2451  ;;  %1637 = vst [vmem:[%s2832_s8 + $0xe8] sm:$0xff] %v2450_v30  ;;  %v1117_v37 = vadd.f32 %v2814_v2, %v1116_v32  ;;  %2477 = vtanh.f32 %v1125_v31 }
 0x13f   : > { %v2454_v36 = vpop.eup %2453  ;;  %1701 = vst [vmem:[%s2832_s8 + $0x2e8] sm:$0xff] %v2452_v34  ;;  %v1373_v39 = vadd.f32 %v2814_v2, %v1372_v33  ;;  %2479 = vtanh.f32 %v1381_v35  ;;  %v2129_v42 = vpop.f32.mrb[40].mxu0 }
 0x140   : > { %v2456_v38 = vpop.eup %2455  ;;  %1642 = vst [vmem:[%s2832_s8 + $0x110] sm:$0xff] %v2454_v36  ;;  %v2193_v43 = vpop.f32.mrb[40].mxu1  ;;  %2481 = vtanh.f32 %v1117_v37  ;;  %v1138_v45 = vadd.f32 %v2129_v42, %v2814_v2 }
 0x141   : > { %v2458_v40 = vpop.eup %2457  ;;  %1706 = vst [vmem:[%s2832_s8 + $0x310] sm:$0xff] %v2456_v38  ;;  %v1394_v46 = vadd.f32 %v2193_v43, %v2814_v2  ;;  %v1129_v47 = vpop.f32.mrb[41].mxu0  ;;  %2483 = vtanh.f32 %v1373_v39 }
 0x142   : > { %v2460_v41 = vpop.eup %2459  ;;  %1640 = vst [vmem:[%s2832_s8 + $0x100] sm:$0xff] %v2458_v40  ;;  %v1385_v48 = vpop.f32.mrb[41].mxu1  ;;  %v1130_v50 = vadd.f32 %v2814_v2, %v1129_v47  ;;  %2485 = vtanh.f32 %v1138_v45 }
 0x143   : > { %v2462_v44 = vpop.eup %2461  ;;  %1704 = vst [vmem:[%s2832_s8 + $0x300] sm:$0xff] %v2460_v41  ;;  %v1386_v51 = vadd.f32 %v2814_v2, %v1385_v48  ;;  %v2130_v52 = vpop.f32.mrb[42].mxu0  ;;  %2487 = vtanh.f32 %v1394_v46 }
 0x144   : > { %v2464_v49 = vpop.eup %2463  ;;  %1643 = vst [vmem:[%s2832_s8 + $0x118] sm:$0xff] %v2462_v44  ;;  %v2194_v53 = vpop.f32.mrb[42].mxu1  ;;  %v1141_v55 = vadd.f32 %v2130_v52, %v2814_v2  ;;  %2489 = vtanh.f32 %v1130_v50 }
 0x145   : > { %v2466_v54 = vpop.eup %2465  ;;  %1707 = vst [vmem:[%s2832_s8 + $0x318] sm:$0xff] %v2464_v49  ;;  %v1132_v56 = vpop.f32.mrb[43].mxu0  ;;  %v1397_v59 = vadd.f32 %v2194_v53, %v2814_v2  ;;  %2491 = vtanh.f32 %v1386_v51 }
 0x146   : > { %v1388_v57 = vpop.f32.mrb[43].mxu1  ;;  %v2468_v58 = vpop.eup %2467  ;;  %1641 = vst [vmem:[%s2832_s8 + $0x108] sm:$0xff] %v2466_v54  ;;  %v1133_v61 = vadd.f32 %v2814_v2, %v1132_v56  ;;  %2493 = vtanh.f32 %v1141_v55 }
 0x147   : > { %v2470_v60 = vpop.eup %2469  ;;  %1705 = vst [vmem:[%s2832_s8 + $0x308] sm:$0xff] %v2468_v58  ;;  %v1389_v63 = vadd.f32 %v2814_v2, %v1388_v57  ;;  %2495 = vtanh.f32 %v1397_v59  ;;  %v2133_v3 = vpop.f32.mrb[44].mxu0 }
 0x148   : > { %v2472_v62 = vpop.eup %2471  ;;  %1646 = vst [vmem:[%s2832_s8 + $0x130] sm:$0xff] %v2470_v60  ;;  %v2197_v4 = vpop.f32.mrb[44].mxu1  ;;  %2497 = vtanh.f32 %v1133_v61  ;;  %v1154_v6 = vadd.f32 %v2133_v3, %v2814_v2 }
 0x149   : > { %v2474_v0 = vpop.eup %2473  ;;  %1710 = vst [vmem:[%s2832_s8 + $0x330] sm:$0xff] %v2472_v62  ;;  %v1410_v7 = vadd.f32 %v2197_v4, %v2814_v2  ;;  %v1145_v8 = vpop.f32.mrb[45].mxu0  ;;  %2499 = vtanh.f32 %v1389_v63 }
 0x14a   : > { %v2476_v1 = vpop.eup %2475  ;;  %1644 = vst [vmem:[%s2832_s8 + $0x120] sm:$0xff] %v2474_v0  ;;  %v1401_v9 = vpop.f32.mrb[45].mxu1  ;;  %v1146_v11 = vadd.f32 %v2814_v2, %v1145_v8  ;;  %2501 = vtanh.f32 %v1154_v6  ;;  %v3027_v0 = vld [vmem:[%s3100_s2] ss:$0 sm:$0xff] }
 0x14b   : > { %v2478_v5 = vpop.eup %2477  ;;  %1708 = vst [vmem:[%s2832_s8 + $0x320] sm:$0xff] %v2476_v1  ;;  %v1402_v12 = vadd.f32 %v2814_v2, %v1401_v9  ;;  %v2134_v13 = vpop.f32.mrb[46].mxu0  ;;  %2503 = vtanh.f32 %v1410_v7 }
 0x14c   : > { %v2480_v10 = vpop.eup %2479  ;;  %1647 = vst [vmem:[%s2832_s8 + $0x138] sm:$0xff] %v2478_v5  ;;  %v2198_v14 = vpop.f32.mrb[46].mxu1  ;;  %v1157_v16 = vadd.f32 %v2134_v13, %v2814_v2  ;;  %2505 = vtanh.f32 %v1146_v11 }
 0x14d   : > { %v2482_v15 = vpop.eup %2481  ;;  %1711 = vst [vmem:[%s2832_s8 + $0x338] sm:$0xff] %v2480_v10  ;;  %v1148_v17 = vpop.f32.mrb[47].mxu0  ;;  %v1413_v20 = vadd.f32 %v2198_v14, %v2814_v2  ;;  %2507 = vtanh.f32 %v1402_v12 }
 0x14e   : > { %v1404_v18 = vpop.f32.mrb[47].mxu1  ;;  %v2484_v19 = vpop.eup %2483  ;;  %1645 = vst [vmem:[%s2832_s8 + $0x128] sm:$0xff] %v2482_v15  ;;  %v1149_v22 = vadd.f32 %v2814_v2, %v1148_v17  ;;  %2509 = vtanh.f32 %v1157_v16 }
 0x14f   : > { %v2486_v21 = vpop.eup %2485  ;;  %1709 = vst [vmem:[%s2832_s8 + $0x328] sm:$0xff] %v2484_v19  ;;  %v1405_v24 = vadd.f32 %v2814_v2, %v1404_v18  ;;  %2511 = vtanh.f32 %v1413_v20  ;;  %v2137_v27 = vpop.f32.mrb[48].mxu0 }
 0x150   : > { %v2488_v23 = vpop.eup %2487  ;;  %1650 = vst [vmem:[%s2832_s8 + $0x150] sm:$0xff] %v2486_v21  ;;  %v2201_v28 = vpop.f32.mrb[48].mxu1  ;;  %2513 = vtanh.f32 %v1149_v22  ;;  %v1170_v30 = vadd.f32 %v2137_v27, %v2814_v2 }
 0x151   : > { %v2490_v25 = vpop.eup %2489  ;;  %1714 = vst [vmem:[%s2832_s8 + $0x350] sm:$0xff] %v2488_v23  ;;  %v1426_v31 = vadd.f32 %v2201_v28, %v2814_v2  ;;  %v1161_v32 = vpop.f32.mrb[49].mxu0  ;;  %2515 = vtanh.f32 %v1405_v24 }
 0x152   : > { %v2492_v26 = vpop.eup %2491  ;;  %1648 = vst [vmem:[%s2832_s8 + $0x140] sm:$0xff] %v2490_v25  ;;  %v1417_v33 = vpop.f32.mrb[49].mxu1  ;;  %v1162_v35 = vadd.f32 %v2814_v2, %v1161_v32  ;;  %2517 = vtanh.f32 %v1170_v30 }
 0x153   : > { %v2494_v29 = vpop.eup %2493  ;;  %1712 = vst [vmem:[%s2832_s8 + $0x340] sm:$0xff] %v2492_v26  ;;  %v1418_v36 = vadd.f32 %v2814_v2, %v1417_v33  ;;  %v2138_v37 = vpop.f32.mrb[50].mxu0  ;;  %2519 = vtanh.f32 %v1426_v31 }
 0x154   : > { %v2496_v34 = vpop.eup %2495  ;;  %1651 = vst [vmem:[%s2832_s8 + $0x158] sm:$0xff] %v2494_v29  ;;  %v2202_v38 = vpop.f32.mrb[50].mxu1  ;;  %v1173_v40 = vadd.f32 %v2138_v37, %v2814_v2  ;;  %2521 = vtanh.f32 %v1162_v35 }
 0x155   : > { %v2498_v39 = vpop.eup %2497  ;;  %1715 = vst [vmem:[%s2832_s8 + $0x358] sm:$0xff] %v2496_v34  ;;  %v1164_v41 = vpop.f32.mrb[51].mxu0  ;;  %v1429_v44 = vadd.f32 %v2202_v38, %v2814_v2  ;;  %2523 = vtanh.f32 %v1418_v36 }
 0x156   : > { %v1420_v42 = vpop.f32.mrb[51].mxu1  ;;  %v2500_v43 = vpop.eup %2499  ;;  %1649 = vst [vmem:[%s2832_s8 + $0x148] sm:$0xff] %v2498_v39  ;;  %v1165_v46 = vadd.f32 %v2814_v2, %v1164_v41  ;;  %2525 = vtanh.f32 %v1173_v40 }
 0x157   : > { %v2502_v45 = vpop.eup %2501  ;;  %1713 = vst [vmem:[%s2832_s8 + $0x348] sm:$0xff] %v2500_v43  ;;  %v1421_v48 = vadd.f32 %v2814_v2, %v1420_v42  ;;  %2527 = vtanh.f32 %v1429_v44  ;;  %v2141_v51 = vpop.f32.mrb[52].mxu0 }
 0x158   : > { %v2504_v47 = vpop.eup %2503  ;;  %1654 = vst [vmem:[%s2832_s8 + $0x170] sm:$0xff] %v2502_v45  ;;  %v2205_v52 = vpop.f32.mrb[52].mxu1  ;;  %2529 = vtanh.f32 %v1165_v46  ;;  %v1186_v54 = vadd.f32 %v2141_v51, %v2814_v2 }
 0x159   : > { %v2506_v49 = vpop.eup %2505  ;;  %1718 = vst [vmem:[%s2832_s8 + $0x370] sm:$0xff] %v2504_v47  ;;  %v1442_v55 = vadd.f32 %v2205_v52, %v2814_v2  ;;  %v1177_v56 = vpop.f32.mrb[53].mxu0  ;;  %2531 = vtanh.f32 %v1421_v48 }
 0x15a   : > { %v2508_v50 = vpop.eup %2507  ;;  %1652 = vst [vmem:[%s2832_s8 + $0x160] sm:$0xff] %v2506_v49  ;;  %v1433_v57 = vpop.f32.mrb[53].mxu1  ;;  %v1178_v59 = vadd.f32 %v2814_v2, %v1177_v56  ;;  %2533 = vtanh.f32 %v1186_v54 }
 0x15b   : > { %v2510_v53 = vpop.eup %2509  ;;  %1716 = vst [vmem:[%s2832_s8 + $0x360] sm:$0xff] %v2508_v50  ;;  %v1434_v60 = vadd.f32 %v2814_v2, %v1433_v57  ;;  %v2142_v61 = vpop.f32.mrb[54].mxu0  ;;  %2535 = vtanh.f32 %v1442_v55 }
 0x15c   : > { %v2512_v58 = vpop.eup %2511  ;;  %1655 = vst [vmem:[%s2832_s8 + $0x178] sm:$0xff] %v2510_v53  ;;  %v2206_v62 = vpop.f32.mrb[54].mxu1  ;;  %v1189_v1 = vadd.f32 %v3027_v0, %v2142_v61  ;;  %2537 = vtanh.f32 %v1178_v59 }
 0x15d   : > { %v2514_v63 = vpop.eup %2513  ;;  %1719 = vst [vmem:[%s2832_s8 + $0x378] sm:$0xff] %v2512_v58  ;;  %v1180_v3 = vpop.f32.mrb[55].mxu0  ;;  %v1445_v2 = vadd.f32 %v3027_v0, %v2206_v62  ;;  %2539 = vtanh.f32 %v1434_v60 }
 0x15e   : > { %v1436_v4 = vpop.f32.mrb[55].mxu1  ;;  %v2516_v5 = vpop.eup %2515  ;;  %1653 = vst [vmem:[%s2832_s8 + $0x168] sm:$0xff] %v2514_v63  ;;  %v1181_v7 = vadd.f32 %v3027_v0, %v1180_v3  ;;  %2541 = vtanh.f32 %v1189_v1 }
 0x15f   : > { %v2518_v6 = vpop.eup %2517  ;;  %1717 = vst [vmem:[%s2832_s8 + $0x368] sm:$0xff] %v2516_v5  ;;  %v1437_v9 = vadd.f32 %v3027_v0, %v1436_v4  ;;  %2543 = vtanh.f32 %v1445_v2  ;;  %v2145_v12 = vpop.f32.mrb[56].mxu0 }
 0x160   : > { %v2520_v8 = vpop.eup %2519  ;;  %1658 = vst [vmem:[%s2832_s8 + $0x190] sm:$0xff] %v2518_v6  ;;  %v2209_v13 = vpop.f32.mrb[56].mxu1  ;;  %2545 = vtanh.f32 %v1181_v7  ;;  %v1202_v15 = vadd.f32 %v3027_v0, %v2145_v12 }
 0x161   : > { %v2522_v10 = vpop.eup %2521  ;;  %1722 = vst [vmem:[%s2832_s8 + $0x390] sm:$0xff] %v2520_v8  ;;  %v1458_v16 = vadd.f32 %v3027_v0, %v2209_v13  ;;  %v1193_v17 = vpop.f32.mrb[57].mxu0  ;;  %2547 = vtanh.f32 %v1437_v9 }
 0x162   : > { %v2524_v11 = vpop.eup %2523  ;;  %1656 = vst [vmem:[%s2832_s8 + $0x180] sm:$0xff] %v2522_v10  ;;  %v1449_v18 = vpop.f32.mrb[57].mxu1  ;;  %v1194_v20 = vadd.f32 %v3027_v0, %v1193_v17  ;;  %2549 = vtanh.f32 %v1202_v15 }
 0x163   : > { %v2526_v14 = vpop.eup %2525  ;;  %1720 = vst [vmem:[%s2832_s8 + $0x380] sm:$0xff] %v2524_v11  ;;  %v1450_v21 = vadd.f32 %v3027_v0, %v1449_v18  ;;  %v2146_v22 = vpop.f32.mrb[58].mxu0  ;;  %2551 = vtanh.f32 %v1458_v16 }
 0x164   : > { %v2528_v19 = vpop.eup %2527  ;;  %1659 = vst [vmem:[%s2832_s8 + $0x198] sm:$0xff] %v2526_v14  ;;  %v2210_v23 = vpop.f32.mrb[58].mxu1  ;;  %v1205_v25 = vadd.f32 %v3027_v0, %v2146_v22  ;;  %2553 = vtanh.f32 %v1194_v20 }
 0x165   : > { %v2530_v24 = vpop.eup %2529  ;;  %1723 = vst [vmem:[%s2832_s8 + $0x398] sm:$0xff] %v2528_v19  ;;  %v1196_v26 = vpop.f32.mrb[59].mxu0  ;;  %v1461_v29 = vadd.f32 %v3027_v0, %v2210_v23  ;;  %2555 = vtanh.f32 %v1450_v21 }
 0x166   : > { %v1452_v27 = vpop.f32.mrb[59].mxu1  ;;  %v2532_v28 = vpop.eup %2531  ;;  %1657 = vst [vmem:[%s2832_s8 + $0x188] sm:$0xff] %v2530_v24  ;;  %v1197_v31 = vadd.f32 %v3027_v0, %v1196_v26  ;;  %2557 = vtanh.f32 %v1205_v25 }
 0x167   : > { %v2534_v30 = vpop.eup %2533  ;;  %1721 = vst [vmem:[%s2832_s8 + $0x388] sm:$0xff] %v2532_v28  ;;  %v1453_v33 = vadd.f32 %v3027_v0, %v1452_v27  ;;  %2559 = vtanh.f32 %v1461_v29  ;;  %v2149_v36 = vpop.f32.mrb[60].mxu0 }
 0x168   : > { %v2536_v32 = vpop.eup %2535  ;;  %1662 = vst [vmem:[%s2832_s8 + $0x1b0] sm:$0xff] %v2534_v30  ;;  %v2213_v37 = vpop.f32.mrb[60].mxu1  ;;  %2561 = vtanh.f32 %v1197_v31  ;;  %v1218_v39 = vadd.f32 %v3027_v0, %v2149_v36 }
 0x169   : > { %v2538_v34 = vpop.eup %2537  ;;  %1726 = vst [vmem:[%s2832_s8 + $0x3b0] sm:$0xff] %v2536_v32  ;;  %v1474_v40 = vadd.f32 %v3027_v0, %v2213_v37  ;;  %v1209_v41 = vpop.f32.mrb[61].mxu0  ;;  %2563 = vtanh.f32 %v1453_v33 }
 0x16a   : > { %v2540_v35 = vpop.eup %2539  ;;  %1660 = vst [vmem:[%s2832_s8 + $0x1a0] sm:$0xff] %v2538_v34  ;;  %v1465_v42 = vpop.f32.mrb[61].mxu1  ;;  %v1210_v44 = vadd.f32 %v3027_v0, %v1209_v41  ;;  %2565 = vtanh.f32 %v1218_v39 }
 0x16b   : > { %v2542_v38 = vpop.eup %2541  ;;  %1724 = vst [vmem:[%s2832_s8 + $0x3a0] sm:$0xff] %v2540_v35  ;;  %v1466_v45 = vadd.f32 %v3027_v0, %v1465_v42  ;;  %v2150_v46 = vpop.f32.mrb[62].mxu0  ;;  %2567 = vtanh.f32 %v1474_v40 }
 0x16c   : > { %v2544_v43 = vpop.eup %2543  ;;  %1663 = vst [vmem:[%s2832_s8 + $0x1b8] sm:$0xff] %v2542_v38  ;;  %v2214_v47 = vpop.f32.mrb[62].mxu1  ;;  %v1221_v49 = vadd.f32 %v3027_v0, %v2150_v46  ;;  %2569 = vtanh.f32 %v1210_v44 }
 0x16d   : > { %v2546_v48 = vpop.eup %2545  ;;  %1727 = vst [vmem:[%s2832_s8 + $0x3b8] sm:$0xff] %v2544_v43  ;;  %v1212_v50 = vpop.f32.mrb[63].mxu0  ;;  %v1477_v53 = vadd.f32 %v3027_v0, %v2214_v47  ;;  %2571 = vtanh.f32 %v1466_v45 }
 0x16e   : > { %v1468_v51 = vpop.f32.mrb[63].mxu1  ;;  %v2548_v52 = vpop.eup %2547  ;;  %1661 = vst [vmem:[%s2832_s8 + $0x1a8] sm:$0xff] %v2546_v48  ;;  %v1213_v55 = vadd.f32 %v3027_v0, %v1212_v50  ;;  %2573 = vtanh.f32 %v1221_v49 }
 0x16f   : > { %v2550_v54 = vpop.eup %2549  ;;  %1725 = vst [vmem:[%s2832_s8 + $0x3a8] sm:$0xff] %v2548_v52  ;;  %v1469_v57 = vadd.f32 %v3027_v0, %v1468_v51  ;;  %2575 = vtanh.f32 %v1477_v53 }
 0x170   : > { %v2552_v56 = vpop.eup %2551  ;;  %1666 = vst [vmem:[%s2832_s8 + $0x1d0] sm:$0xff] %v2550_v54  ;;  %2577 = vtanh.f32 %v1213_v55 }
 0x171   : > { %v2554_v58 = vpop.eup %2553  ;;  %1730 = vst [vmem:[%s2832_s8 + $0x3d0] sm:$0xff] %v2552_v56  ;;  %2579 = vtanh.f32 %v1469_v57 }
 0x172   : > { %v2556_v59 = vpop.eup %2555  ;;  %1664 = vst [vmem:[%s2832_s8 + $0x1c0] sm:$0xff] %v2554_v58 }
 0x173   : > { %v2558_v60 = vpop.eup %2557  ;;  %1728 = vst [vmem:[%s2832_s8 + $0x3c0] sm:$0xff] %v2556_v59 }
 0x174   : > { %v2560_v61 = vpop.eup %2559  ;;  %1667 = vst [vmem:[%s2832_s8 + $0x1d8] sm:$0xff] %v2558_v60 }
 0x175   : > { %v2562_v62 = vpop.eup %2561  ;;  %1731 = vst [vmem:[%s2832_s8 + $0x3d8] sm:$0xff] %v2560_v61 }
 0x176   : > { %v2564_v63 = vpop.eup %2563  ;;  %1665 = vst [vmem:[%s2832_s8 + $0x1c8] sm:$0xff] %v2562_v62 }
 0x177   : > { %v2566_v0 = vpop.eup %2565  ;;  %1729 = vst [vmem:[%s2832_s8 + $0x3c8] sm:$0xff] %v2564_v63 }
 0x178   : > { %v2568_v1 = vpop.eup %2567  ;;  %1670 = vst [vmem:[%s2832_s8 + $0x1f0] sm:$0xff] %v2566_v0 }
 0x179   : > { %v2570_v3 = vpop.eup %2569  ;;  %1734 = vst [vmem:[%s2832_s8 + $0x3f0] sm:$0xff] %v2568_v1 }
 0x17a   : > { %v2572_v4 = vpop.eup %2571  ;;  %1668 = vst [vmem:[%s2832_s8 + $0x1e0] sm:$0xff] %v2570_v3 }
 0x17b   : > { %v2574_v5 = vpop.eup %2573  ;;  %1732 = vst [vmem:[%s2832_s8 + $0x3e0] sm:$0xff] %v2572_v4 }
 0x17c   : > { %v2576_v2 = vpop.eup %2575  ;;  %1671 = vst [vmem:[%s2832_s8 + $0x1f8] sm:$0xff] %v2574_v5 }
 0x17d   : > { %v2578_v6 = vpop.eup %2577  ;;  %1735 = vst [vmem:[%s2832_s8 + $0x3f8] sm:$0xff] %v2576_v2 }
 0x17e   : > { %v2580_v7 = vpop.eup %2579  ;;  %1669 = vst [vmem:[%s2832_s8 + $0x1e8] sm:$0xff] %v2578_v6 }
 0x17f   : > { %1733 = vst [vmem:[%s2832_s8 + $0x3e8] sm:$0xff] %v2580_v7 }
 0x180 PF: > { %s13_s16 = sadd.s32 1, %s2620_s16   ;;  %s3102_s12 = smov %s2612_s14 }
 0x181   : > { %p10_p7 = scmp.ge.s32.totalorder %s13_s16, 10   ;;  %s3103_s13 = smov %s2616_s15 }
 0x182   : > { %s3104_s14 = smov %s3107_s17  ;;  %s3105_s15 = smov %s3111_s18 }
 0x183   :  { %12 = sbr.rel (!%p10_p7) target bundleno = 3 (0x3), region = 68 }

</bundles_post_ra>
